<compile_context>
chip_gen: v7x
topology: tpu7x:2x2x1
jax: 0.10.0
libtpu: 0.0.40
codegen_flags: <defaults>
</compile_context>

<pallas_src>
import functools

import jax
import jax.numpy as jnp
import numpy as np
from jax.experimental import pallas as pl
from jax.experimental.pallas import tpu as pltpu


def make_diffusion_coefs(beta_1, beta_T, T, var_type="fixedlarge"):
    """Replicates the __init__ buffers (computed in float64, applied as float32).

    Returns a (T, 5) f32 table:
      [sqrt_recip_alphas_bar, sqrt_recipm1_alphas_bar,
       posterior_mean_coef1, posterior_mean_coef2, model_log_var]
    """
    betas = np.linspace(beta_1, beta_T, T, dtype=np.float64)
    alphas = 1.0 - betas
    alphas_bar = np.cumprod(alphas)
    alphas_bar_prev = np.concatenate([[1.0], alphas_bar[:-1]])

    sqrt_recip_alphas_bar = np.sqrt(1.0 / alphas_bar)
    sqrt_recipm1_alphas_bar = np.sqrt(1.0 / alphas_bar - 1.0)
    posterior_var = betas * (1.0 - alphas_bar_prev) / (1.0 - alphas_bar)
    posterior_log_var_clipped = np.log(
        np.concatenate([posterior_var[1:2], posterior_var[1:]]))
    posterior_mean_coef1 = np.sqrt(alphas_bar_prev) * betas / (1.0 - alphas_bar)
    posterior_mean_coef2 = np.sqrt(alphas) * (1.0 - alphas_bar_prev) / (1.0 - alphas_bar)

    if var_type == "fixedlarge":
        model_log_var = np.log(np.concatenate([posterior_var[1:2], betas[1:]]))
    else:  # fixedsmall
        model_log_var = posterior_log_var_clipped

    coefs = np.stack(
        [sqrt_recip_alphas_bar, sqrt_recipm1_alphas_bar,
         posterior_mean_coef1, posterior_mean_coef2, model_log_var],
        axis=1).astype(np.float32)
    return jnp.asarray(coefs)


def _sampler_kernel(coefs_ref, xT_ref, wblk_ref, cbias_ref, ubias_ref, noise_ref,
                    x_ref, *, omega, use_cfg, steps_per_block):
    """One grid step == `steps_per_block` fused reverse-diffusion timesteps.

    Reversed-time index r = k*U + u corresponds to diffusion timestep t = T-1-r.
    Per-step recurrence uses host-folded scalars: x <- a*x - b*eps + sigma*noise.
    """
    k = pl.program_id(0)
    nc = pl.num_programs(0)
    U = steps_per_block

    # Initialize the carried sample x_t <- x_T on the first grid step only.
    @pl.when(k == 0)
    def _():
        x_ref[...] = xT_ref[...]

    x = x_ref[...]        # (BC, S) f32, carried across grid steps in VMEM
    w = wblk_ref[...]     # (BC, BC) block-diagonal 1x1-conv weight

    for u in range(U):    # static unroll: one long basic block per grid step
        base = (k * U + u) * 4   # flattened coef-table offset (reversed-time, stride 4)

        # --- synthetic eps model: block-diag 1x1 conv (MXU) + embeddings + tanh ---
        h = jnp.dot(w, x, preferred_element_type=jnp.float32,
                    precision=jax.lax.Precision.HIGHEST)          # (BC, S) on the MXU
        eps = jnp.tanh(h + cbias_ref[:, u:u + 1])                 # conditional eps
        if use_cfg:
            unc_eps = jnp.tanh(h + ubias_ref[:, u:u + 1])         # unconditional eps
            # eps + omega*(eps - unc_eps), constants folded at trace time:
            eps = (1.0 + omega) * eps - omega * unc_eps

        # --- host-folded per-timestep scalars (SMEM) ---
        a = coefs_ref[base + 0]    # pm1*c1 + pm2
        b = coefs_ref[base + 1]    # pm1*c2
        sg = coefs_ref[base + 2]   # exp(0.5*log_var), forced to 0 at t == 0

        x = a * x - b * eps + sg * noise_ref[u]

    # Store carried state; on the last chunk store the final clip of the LIVE value
    # (no VMEM round-trip).
    @pl.when(k != nc - 1)
    def _():
        x_ref[...] = x

    @pl.when(k == nc - 1)
    def _():
        x_ref[...] = jnp.clip(x, -1.0, 1.0)


def gaussian_diffusion_sample(x_T, noise, coefs, temb, cemb, w_model,
                              *, omega=0.0, method="cfg", steps_per_block=None):
    """Pallas implementation of GaussianDiffusionSampler.forward (given selected_labels)."""
    B, C, H, W = x_T.shape
    S = H * W
    T = coefs.shape[0]
    BC = B * C

    if steps_per_block is None:
        steps_per_block = min(32, T)
        while T % steps_per_block:
            steps_per_block -= 1
    U = steps_per_block
    assert T % U == 0, "T must be a multiple of steps_per_block"
    NC = T // U

    # (B*C, S) layout -> full (8, 128) vreg occupancy for BC == 8, S multiple of 128.
    x_flat = x_T.reshape(BC, S).astype(jnp.float32)

    # Block-diagonal weight so the per-sample 1x1 channel conv is one MXU matmul.
    w_block = jnp.kron(jnp.eye(B, dtype=jnp.float32),
                       w_model.astype(jnp.float32))                 # (BC, BC)

    # Per-timestep bias tables over flattened (batch, channel) rows, reversed time,
    # pre-chunked to (NC, BC, U) so each grid step DMAs one tiny full block.
    unc_bias = jnp.tile(temb.astype(jnp.float32), (1, B))           # (T, BC): temb
    cond_bias = unc_bias + cemb.reshape(1, BC).astype(jnp.float32)  # (T, BC): temb+cemb

    def to_chunks(tbl):  # (T, BC) natural-t order -> (NC, BC, U) reversed-time chunks
        return tbl[::-1].reshape(NC, U, BC).transpose(0, 2, 1)

    cbias_nc = to_chunks(cond_bias)
    ubias_nc = to_chunks(unc_bias)

    # Host-folded per-timestep scalars: a, b, sigma (sigma_0 = 0), reversed time,
    # flattened 1-D stride-4 for SMEM friendliness at large T.
    c1, c2, pm1, pm2, lv = (coefs[:, j] for j in range(5))
    a_t = pm1 * c1 + pm2
    b_t = pm1 * c2
    sigma_t = jnp.exp(0.5 * lv).at[0].set(0.0)         # t == 0: no noise (chunk-agnostic)
    folded = jnp.stack([a_t, b_t, sigma_t, jnp.zeros_like(a_t)], axis=1)  # (T, 4)
    coefs_rev_flat = folded[::-1].reshape(-1).astype(jnp.float32)          # (T*4,)

    # Noise: reversed time, f32 (full-vreg per-u slabs; HBM traffic negligible here).
    noise_rev = noise.astype(jnp.float32).reshape(T, BC, S)[::-1]          # (T, BC, S)

    kernel = functools.partial(_sampler_kernel,
                               omega=float(omega),
                               use_cfg=(method == "cfg" and float(omega) > 0.0),
                               steps_per_block=U)

    out = pl.pallas_call(
        kernel,
        out_shape=jax.ShapeDtypeStruct((BC, S), jnp.float32),
        grid=(NC,),
        in_specs=[
            pl.BlockSpec(memory_space=pltpu.MemorySpace.SMEM),          # folded coefs (T*4,)
            pl.BlockSpec((BC, S), lambda k: (0, 0)),                    # x_T (read at k==0)
            pl.BlockSpec((BC, BC), lambda k: (0, 0)),                   # block-diag weight
            pl.BlockSpec((pl.Squeezed(), BC, U), lambda k: (k, 0, 0)),  # cond bias chunk
            pl.BlockSpec((pl.Squeezed(), BC, U), lambda k: (k, 0, 0)),  # uncond bias chunk
            pl.BlockSpec((U, BC, S), lambda k: (k, 0, 0)),              # f32 noise chunk
        ],
        out_specs=pl.BlockSpec((BC, S), lambda k: (0, 0)),              # carried x_t
        input_output_aliases={1: 0},                                    # alias x_T -> out
        compiler_params=pltpu.CompilerParams(
            dimension_semantics=("arbitrary",)),                        # sequential in time
    )(coefs_rev_flat, x_flat, w_block, cbias_nc, ubias_nc, noise_rev)

    return out.reshape(B, C, H, W)


def reference_sample(x_T, noise, coefs, temb, cemb, w_model, *, omega, method):
    """Pure-JAX reference of the same sampling loop (module formulas, unfolded coefs)."""
    B, C, H, W = x_T.shape
    S = H * W
    T = coefs.shape[0]
    x = x_T.reshape(B, C, S).astype(jnp.float32)
    for time_step in reversed(range(T)):
        h = jnp.einsum("oc,bcs->bos", w_model, x,
                       precision=jax.lax.Precision.HIGHEST)
        te = temb[time_step].reshape(1, C, 1)
        eps = jnp.tanh(h + te + cemb[:, :, None])
        if method == "cfg" and omega > 0.0:
            unc = jnp.tanh(h + te)
            eps = eps + omega * (eps - unc)
        c1, c2, pm1, pm2, lv = [coefs[time_step, j] for j in range(5)]
        x_0 = c1 * x - c2 * eps
        mean = pm1 * x_0 + pm2 * x
        if time_step > 0:
            n = noise[time_step].astype(jnp.float32).reshape(B, C, S)
            x = mean + jnp.exp(0.5 * lv) * n
        else:
            x = mean
    return jnp.clip(x, -1.0, 1.0).reshape(B, C, H, W)


if __name__ == "__main__":
    # Small, module-consistent shapes; NC = 2 grid steps exercises carried state.
    B, C, H, W = 2, 4, 16, 16
    T = 32
    U = 16                     # fused timesteps per grid step
    beta_1, beta_T = 1e-4, 0.02
    num_class = 10
    omega = 1.5
    method = "cfg"

    key = jax.random.PRNGKey(0)
    k_x, k_w, k_cls, k_noise = jax.random.split(key, 4)

    x_T = jax.random.normal(k_x, (B, C, H, W), dtype=jnp.float32)

    # Deterministic synthetic model parameters.
    w_model = 0.1 * jax.random.normal(k_w, (C, C), dtype=jnp.float32)
    class_emb_table = 0.1 * jax.random.normal(k_cls, (num_class, C), dtype=jnp.float32)
    ts = jnp.arange(T, dtype=jnp.float32)[:, None]
    freqs = jnp.exp(-jnp.arange(C, dtype=jnp.float32))[None, :]
    temb = 0.1 * jnp.sin(ts * freqs)                      # (T, C)

    # selected_labels path of forward(): y is provided, fixed through the loop.
    selected_labels = jnp.array([3, 7], dtype=jnp.int32)  # (B,)
    cemb = class_emb_table[selected_labels]               # (B, C)

    # Pre-sampled Gaussian noise, one tensor per timestep (torch.randn_like equivalent).
    # Kernel and reference consume the SAME f32 values.
    noise = jax.random.normal(k_noise, (T, B, C, H * W), dtype=jnp.float32)

    coefs = make_diffusion_coefs(beta_1, beta_T, T, var_type="fixedlarge")

    out = gaussian_diffusion_sample(x_T, noise, coefs, temb, cemb, w_model,
                                    omega=omega, method=method, steps_per_block=U)
    out = jax.block_until_ready(out)

    ref = reference_sample(x_T, noise, coefs, temb, cemb, w_model,
                           omega=omega, method=method)
    ref = jax.block_until_ready(ref)

    assert out.shape == (B, C, H, W)
    np.testing.assert_allclose(np.asarray(out), np.asarray(ref), atol=2e-3, rtol=2e-3)

    print("KERNEL_OK")
</pallas_src>

<mosaic_0001>
module attributes {stable_mosaic.version = 11 : i64} {
  func.func @_sampler_kernel(%arg0: i32, %arg1: memref<128xf32, #tpu.memory_space<smem>>, %arg2: memref<8x256xf32, #tpu.memory_space<vmem>>, %arg3: memref<8x8xf32, #tpu.memory_space<vmem>>, %arg4: memref<1x8x16xf32, #tpu.memory_space<vmem>>, %arg5: memref<1x8x16xf32, #tpu.memory_space<vmem>>, %arg6: memref<16x8x256xf32, #tpu.memory_space<vmem>>, %arg7: memref<8x256xf32, #tpu.memory_space<vmem>>) attributes {dimension_semantics = [#tpu.dimension_semantics<arbitrary>], iteration_bounds = array<i64: 2>, scalar_prefetch = 0 : i64, scratch_operands = 0 : i64, tpu.core_type = #tpu.core_type<tc>, window_params = [{transform_indices = @transform_0, window_bounds = array<i64: 128>}, {pipeline_mode = #tpu.pipeline_mode<synchronous>, transform_indices = @transform_1, window_bounds = array<i64: 8, 256>}, {pipeline_mode = #tpu.pipeline_mode<synchronous>, transform_indices = @transform_2, window_bounds = array<i64: 8, 8>}, {transform_indices = @transform_3, window_bounds = array<i64: 1, 8, 16>}, {transform_indices = @transform_4, window_bounds = array<i64: 1, 8, 16>}, {transform_indices = @transform_5, window_bounds = array<i64: 16, 8, 256>}, {pipeline_mode = #tpu.pipeline_mode<synchronous>, transform_indices = @transform_6, window_bounds = array<i64: 8, 256>}]} {
    %c0_i32 = arith.constant 0 : i32
    %0 = arith.cmpi eq, %arg0, %c0_i32 : i32
    %1 = arith.extui %0 : i1 to i32
    %c0_i32_0 = arith.constant 0 : i32
    %2 = arith.cmpi ne, %1, %c0_i32_0 : i32
    scf.if %2 {
      %c0_264 = arith.constant 0 : index
      %c0_265 = arith.constant 0 : index
      %619 = vector.load %arg2[%c0_264, %c0_265] : memref<8x256xf32, #tpu.memory_space<vmem>>, vector<8x256xf32>
      %c0_266 = arith.constant 0 : index
      %c0_267 = arith.constant 0 : index
      %620 = vector.load %arg7[%c0_266, %c0_267] : memref<8x256xf32, #tpu.memory_space<vmem>>, vector<8x256xf32>
      tpu.vector_store %arg7[%c0_266, %c0_267], %619 {strides = array<i32>} : memref<8x256xf32, #tpu.memory_space<vmem>>, vector<8x256xf32>,
    } else {
    }
    %c0 = arith.constant 0 : index
    %c0_1 = arith.constant 0 : index
    %3 = vector.load %arg7[%c0, %c0_1] : memref<8x256xf32, #tpu.memory_space<vmem>>, vector<8x256xf32>
    %c0_2 = arith.constant 0 : index
    %c0_3 = arith.constant 0 : index
    %4 = vector.load %arg3[%c0_2, %c0_3] : memref<8x8xf32, #tpu.memory_space<vmem>>, vector<8x8xf32>
    %c16_i32 = arith.constant 16 : i32
    %5 = arith.muli %arg0, %c16_i32 : i32
    %c0_i32_4 = arith.constant 0 : i32
    %6 = arith.addi %5, %c0_i32_4 : i32
    %c4_i32 = arith.constant 4 : i32
    %7 = arith.muli %6, %c4_i32 : i32
    %cst = arith.constant dense<0.000000e+00> : vector<8x256xf32>
    %8 = tpu.matmul %4, %3, %cst {dimension_numbers = #tpu.dot_dimension_numbers<[1], [0], [0], [1], [0, 0, 1, 1], [], []>, precision = #tpu.contract_precision<fp32>} : vector<8x8xf32>, vector<8x256xf32>, vector<8x256xf32> -> vector<8x256xf32>
    %c0_5 = arith.constant 0 : index
    %c0_6 = arith.constant 0 : index
    %c0_7 = arith.constant 0 : index
    %9 = vector.load %arg4[%c0_5, %c0_6, %c0_7] : memref<1x8x16xf32, #tpu.memory_space<vmem>>, vector<1x8x1xf32>
    %10 = vector.shape_cast %9 : vector<1x8x1xf32> to vector<8x1xf32>
    %11 = vector.broadcast %10 : vector<8x1xf32> to vector<8x256xf32>
    %12 = arith.addf %8, %11 : vector<8x256xf32>
    %13 = math.tanh %12 : vector<8x256xf32>
    %c0_8 = arith.constant 0 : index
    %c0_9 = arith.constant 0 : index
    %c0_10 = arith.constant 0 : index
    %14 = vector.load %arg5[%c0_8, %c0_9, %c0_10] : memref<1x8x16xf32, #tpu.memory_space<vmem>>, vector<1x8x1xf32>
    %15 = vector.shape_cast %14 : vector<1x8x1xf32> to vector<8x1xf32>
    %16 = vector.broadcast %15 : vector<8x1xf32> to vector<8x256xf32>
    %17 = arith.addf %8, %16 : vector<8x256xf32>
    %18 = math.tanh %17 : vector<8x256xf32>
    %cst_11 = arith.constant 2.500000e+00 : f32
    %19 = vector.broadcast %cst_11 : f32 to vector<8x256xf32>
    %20 = arith.mulf %19, %13 : vector<8x256xf32>
    %cst_12 = arith.constant 1.500000e+00 : f32
    %21 = vector.broadcast %cst_12 : f32 to vector<8x256xf32>
    %22 = arith.mulf %21, %18 : vector<8x256xf32>
    %23 = arith.subf %20, %22 : vector<8x256xf32>
    %c0_i32_13 = arith.constant 0 : i32
    %24 = arith.addi %7, %c0_i32_13 : i32
    %25 = arith.index_cast %24 : i32 to index
    %26 = memref.load %arg1[%25] : memref<128xf32, #tpu.memory_space<smem>>
    %c1_i32 = arith.constant 1 : i32
    %27 = arith.addi %7, %c1_i32 : i32
    %28 = arith.index_cast %27 : i32 to index
    %29 = memref.load %arg1[%28] : memref<128xf32, #tpu.memory_space<smem>>
    %c2_i32 = arith.constant 2 : i32
    %30 = arith.addi %7, %c2_i32 : i32
    %31 = arith.index_cast %30 : i32 to index
    %32 = memref.load %arg1[%31] : memref<128xf32, #tpu.memory_space<smem>>
    %33 = vector.broadcast %26 : f32 to vector<8x256xf32>
    %34 = arith.mulf %33, %3 : vector<8x256xf32>
    %35 = vector.broadcast %29 : f32 to vector<8x256xf32>
    %36 = arith.mulf %35, %23 : vector<8x256xf32>
    %37 = arith.subf %34, %36 : vector<8x256xf32>
    %c0_14 = arith.constant 0 : index
    %c0_15 = arith.constant 0 : index
    %c0_16 = arith.constant 0 : index
    %38 = vector.load %arg6[%c0_14, %c0_15, %c0_16] : memref<16x8x256xf32, #tpu.memory_space<vmem>>, vector<1x8x256xf32>
    %39 = vector.shape_cast %38 : vector<1x8x256xf32> to vector<8x256xf32>
    %40 = vector.broadcast %32 : f32 to vector<8x256xf32>
    %41 = arith.mulf %40, %39 : vector<8x256xf32>
    %42 = arith.addf %37, %41 : vector<8x256xf32>
    %c16_i32_17 = arith.constant 16 : i32
    %43 = arith.muli %arg0, %c16_i32_17 : i32
    %c1_i32_18 = arith.constant 1 : i32
    %44 = arith.addi %43, %c1_i32_18 : i32
    %c4_i32_19 = arith.constant 4 : i32
    %45 = arith.muli %44, %c4_i32_19 : i32
    %cst_20 = arith.constant dense<0.000000e+00> : vector<8x256xf32>
    %46 = tpu.matmul %4, %42, %cst_20 {dimension_numbers = #tpu.dot_dimension_numbers<[1], [0], [0], [1], [0, 0, 1, 1], [], []>, precision = #tpu.contract_precision<fp32>} : vector<8x8xf32>, vector<8x256xf32>, vector<8x256xf32> -> vector<8x256xf32>
    %c0_21 = arith.constant 0 : index
    %c0_22 = arith.constant 0 : index
    %c1 = arith.constant 1 : index
    %47 = vector.load %arg4[%c0_21, %c0_22, %c1] : memref<1x8x16xf32, #tpu.memory_space<vmem>>, vector<1x8x1xf32>
    %48 = vector.shape_cast %47 : vector<1x8x1xf32> to vector<8x1xf32>
    %49 = vector.broadcast %48 : vector<8x1xf32> to vector<8x256xf32>
    %50 = arith.addf %46, %49 : vector<8x256xf32>
    %51 = math.tanh %50 : vector<8x256xf32>
    %c0_23 = arith.constant 0 : index
    %c0_24 = arith.constant 0 : index
    %c1_25 = arith.constant 1 : index
    %52 = vector.load %arg5[%c0_23, %c0_24, %c1_25] : memref<1x8x16xf32, #tpu.memory_space<vmem>>, vector<1x8x1xf32>
    %53 = vector.shape_cast %52 : vector<1x8x1xf32> to vector<8x1xf32>
    %54 = vector.broadcast %53 : vector<8x1xf32> to vector<8x256xf32>
    %55 = arith.addf %46, %54 : vector<8x256xf32>
    %56 = math.tanh %55 : vector<8x256xf32>
    %cst_26 = arith.constant 2.500000e+00 : f32
    %57 = vector.broadcast %cst_26 : f32 to vector<8x256xf32>
    %58 = arith.mulf %57, %51 : vector<8x256xf32>
    %cst_27 = arith.constant 1.500000e+00 : f32
    %59 = vector.broadcast %cst_27 : f32 to vector<8x256xf32>
    %60 = arith.mulf %59, %56 : vector<8x256xf32>
    %61 = arith.subf %58, %60 : vector<8x256xf32>
    %c0_i32_28 = arith.constant 0 : i32
    %62 = arith.addi %45, %c0_i32_28 : i32
    %63 = arith.index_cast %62 : i32 to index
    %64 = memref.load %arg1[%63] : memref<128xf32, #tpu.memory_space<smem>>
    %c1_i32_29 = arith.constant 1 : i32
    %65 = arith.addi %45, %c1_i32_29 : i32
    %66 = arith.index_cast %65 : i32 to index
    %67 = memref.load %arg1[%66] : memref<128xf32, #tpu.memory_space<smem>>
    %c2_i32_30 = arith.constant 2 : i32
    %68 = arith.addi %45, %c2_i32_30 : i32
    %69 = arith.index_cast %68 : i32 to index
    %70 = memref.load %arg1[%69] : memref<128xf32, #tpu.memory_space<smem>>
    %71 = vector.broadcast %64 : f32 to vector<8x256xf32>
    %72 = arith.mulf %71, %42 : vector<8x256xf32>
    %73 = vector.broadcast %67 : f32 to vector<8x256xf32>
    %74 = arith.mulf %73, %61 : vector<8x256xf32>
    %75 = arith.subf %72, %74 : vector<8x256xf32>
    %c1_31 = arith.constant 1 : index
    %c0_32 = arith.constant 0 : index
    %c0_33 = arith.constant 0 : index
    %76 = vector.load %arg6[%c1_31, %c0_32, %c0_33] : memref<16x8x256xf32, #tpu.memory_space<vmem>>, vector<1x8x256xf32>
    %77 = vector.shape_cast %76 : vector<1x8x256xf32> to vector<8x256xf32>
    %78 = vector.broadcast %70 : f32 to vector<8x256xf32>
    %79 = arith.mulf %78, %77 : vector<8x256xf32>
    %80 = arith.addf %75, %79 : vector<8x256xf32>
    %c16_i32_34 = arith.constant 16 : i32
    %81 = arith.muli %arg0, %c16_i32_34 : i32
    %c2_i32_35 = arith.constant 2 : i32
    %82 = arith.addi %81, %c2_i32_35 : i32
    %c4_i32_36 = arith.constant 4 : i32
    %83 = arith.muli %82, %c4_i32_36 : i32
    %cst_37 = arith.constant dense<0.000000e+00> : vector<8x256xf32>
    %84 = tpu.matmul %4, %80, %cst_37 {dimension_numbers = #tpu.dot_dimension_numbers<[1], [0], [0], [1], [0, 0, 1, 1], [], []>, precision = #tpu.contract_precision<fp32>} : vector<8x8xf32>, vector<8x256xf32>, vector<8x256xf32> -> vector<8x256xf32>
    %c0_38 = arith.constant 0 : index
    %c0_39 = arith.constant 0 : index
    %c2 = arith.constant 2 : index
    %85 = vector.load %arg4[%c0_38, %c0_39, %c2] : memref<1x8x16xf32, #tpu.memory_space<vmem>>, vector<1x8x1xf32>
    %86 = vector.shape_cast %85 : vector<1x8x1xf32> to vector<8x1xf32>
    %87 = vector.broadcast %86 : vector<8x1xf32> to vector<8x256xf32>
    %88 = arith.addf %84, %87 : vector<8x256xf32>
    %89 = math.tanh %88 : vector<8x256xf32>
    %c0_40 = arith.constant 0 : index
    %c0_41 = arith.constant 0 : index
    %c2_42 = arith.constant 2 : index
    %90 = vector.load %arg5[%c0_40, %c0_41, %c2_42] : memref<1x8x16xf32, #tpu.memory_space<vmem>>, vector<1x8x1xf32>
    %91 = vector.shape_cast %90 : vector<1x8x1xf32> to vector<8x1xf32>
    %92 = vector.broadcast %91 : vector<8x1xf32> to vector<8x256xf32>
    %93 = arith.addf %84, %92 : vector<8x256xf32>
    %94 = math.tanh %93 : vector<8x256xf32>
    %cst_43 = arith.constant 2.500000e+00 : f32
    %95 = vector.broadcast %cst_43 : f32 to vector<8x256xf32>
    %96 = arith.mulf %95, %89 : vector<8x256xf32>
    %cst_44 = arith.constant 1.500000e+00 : f32
    %97 = vector.broadcast %cst_44 : f32 to vector<8x256xf32>
    %98 = arith.mulf %97, %94 : vector<8x256xf32>
    %99 = arith.subf %96, %98 : vector<8x256xf32>
    %c0_i32_45 = arith.constant 0 : i32
    %100 = arith.addi %83, %c0_i32_45 : i32
    %101 = arith.index_cast %100 : i32 to index
    %102 = memref.load %arg1[%101] : memref<128xf32, #tpu.memory_space<smem>>
    %c1_i32_46 = arith.constant 1 : i32
    %103 = arith.addi %83, %c1_i32_46 : i32
    %104 = arith.index_cast %103 : i32 to index
    %105 = memref.load %arg1[%104] : memref<128xf32, #tpu.memory_space<smem>>
    %c2_i32_47 = arith.constant 2 : i32
    %106 = arith.addi %83, %c2_i32_47 : i32
    %107 = arith.index_cast %106 : i32 to index
    %108 = memref.load %arg1[%107] : memref<128xf32, #tpu.memory_space<smem>>
    %109 = vector.broadcast %102 : f32 to vector<8x256xf32>
    %110 = arith.mulf %109, %80 : vector<8x256xf32>
    %111 = vector.broadcast %105 : f32 to vector<8x256xf32>
    %112 = arith.mulf %111, %99 : vector<8x256xf32>
    %113 = arith.subf %110, %112 : vector<8x256xf32>
    %c2_48 = arith.constant 2 : index
    %c0_49 = arith.constant 0 : index
    %c0_50 = arith.constant 0 : index
    %114 = vector.load %arg6[%c2_48, %c0_49, %c0_50] : memref<16x8x256xf32, #tpu.memory_space<vmem>>, vector<1x8x256xf32>
    %115 = vector.shape_cast %114 : vector<1x8x256xf32> to vector<8x256xf32>
    %116 = vector.broadcast %108 : f32 to vector<8x256xf32>
    %117 = arith.mulf %116, %115 : vector<8x256xf32>
    %118 = arith.addf %113, %117 : vector<8x256xf32>
    %c16_i32_51 = arith.constant 16 : i32
    %119 = arith.muli %arg0, %c16_i32_51 : i32
    %c3_i32 = arith.constant 3 : i32
    %120 = arith.addi %119, %c3_i32 : i32
    %c4_i32_52 = arith.constant 4 : i32
    %121 = arith.muli %120, %c4_i32_52 : i32
    %cst_53 = arith.constant dense<0.000000e+00> : vector<8x256xf32>
    %122 = tpu.matmul %4, %118, %cst_53 {dimension_numbers = #tpu.dot_dimension_numbers<[1], [0], [0], [1], [0, 0, 1, 1], [], []>, precision = #tpu.contract_precision<fp32>} : vector<8x8xf32>, vector<8x256xf32>, vector<8x256xf32> -> vector<8x256xf32>
    %c0_54 = arith.constant 0 : index
    %c0_55 = arith.constant 0 : index
    %c3 = arith.constant 3 : index
    %123 = vector.load %arg4[%c0_54, %c0_55, %c3] : memref<1x8x16xf32, #tpu.memory_space<vmem>>, vector<1x8x1xf32>
    %124 = vector.shape_cast %123 : vector<1x8x1xf32> to vector<8x1xf32>
    %125 = vector.broadcast %124 : vector<8x1xf32> to vector<8x256xf32>
    %126 = arith.addf %122, %125 : vector<8x256xf32>
    %127 = math.tanh %126 : vector<8x256xf32>
    %c0_56 = arith.constant 0 : index
    %c0_57 = arith.constant 0 : index
    %c3_58 = arith.constant 3 : index
    %128 = vector.load %arg5[%c0_56, %c0_57, %c3_58] : memref<1x8x16xf32, #tpu.memory_space<vmem>>, vector<1x8x1xf32>
    %129 = vector.shape_cast %128 : vector<1x8x1xf32> to vector<8x1xf32>
    %130 = vector.broadcast %129 : vector<8x1xf32> to vector<8x256xf32>
    %131 = arith.addf %122, %130 : vector<8x256xf32>
    %132 = math.tanh %131 : vector<8x256xf32>
    %cst_59 = arith.constant 2.500000e+00 : f32
    %133 = vector.broadcast %cst_59 : f32 to vector<8x256xf32>
    %134 = arith.mulf %133, %127 : vector<8x256xf32>
    %cst_60 = arith.constant 1.500000e+00 : f32
    %135 = vector.broadcast %cst_60 : f32 to vector<8x256xf32>
    %136 = arith.mulf %135, %132 : vector<8x256xf32>
    %137 = arith.subf %134, %136 : vector<8x256xf32>
    %c0_i32_61 = arith.constant 0 : i32
    %138 = arith.addi %121, %c0_i32_61 : i32
    %139 = arith.index_cast %138 : i32 to index
    %140 = memref.load %arg1[%139] : memref<128xf32, #tpu.memory_space<smem>>
    %c1_i32_62 = arith.constant 1 : i32
    %141 = arith.addi %121, %c1_i32_62 : i32
    %142 = arith.index_cast %141 : i32 to index
    %143 = memref.load %arg1[%142] : memref<128xf32, #tpu.memory_space<smem>>
    %c2_i32_63 = arith.constant 2 : i32
    %144 = arith.addi %121, %c2_i32_63 : i32
    %145 = arith.index_cast %144 : i32 to index
    %146 = memref.load %arg1[%145] : memref<128xf32, #tpu.memory_space<smem>>
    %147 = vector.broadcast %140 : f32 to vector<8x256xf32>
    %148 = arith.mulf %147, %118 : vector<8x256xf32>
    %149 = vector.broadcast %143 : f32 to vector<8x256xf32>
    %150 = arith.mulf %149, %137 : vector<8x256xf32>
    %151 = arith.subf %148, %150 : vector<8x256xf32>
    %c3_64 = arith.constant 3 : index
    %c0_65 = arith.constant 0 : index
    %c0_66 = arith.constant 0 : index
    %152 = vector.load %arg6[%c3_64, %c0_65, %c0_66] : memref<16x8x256xf32, #tpu.memory_space<vmem>>, vector<1x8x256xf32>
    %153 = vector.shape_cast %152 : vector<1x8x256xf32> to vector<8x256xf32>
    %154 = vector.broadcast %146 : f32 to vector<8x256xf32>
    %155 = arith.mulf %154, %153 : vector<8x256xf32>
    %156 = arith.addf %151, %155 : vector<8x256xf32>
    %c16_i32_67 = arith.constant 16 : i32
    %157 = arith.muli %arg0, %c16_i32_67 : i32
    %c4_i32_68 = arith.constant 4 : i32
    %158 = arith.addi %157, %c4_i32_68 : i32
    %c4_i32_69 = arith.constant 4 : i32
    %159 = arith.muli %158, %c4_i32_69 : i32
    %cst_70 = arith.constant dense<0.000000e+00> : vector<8x256xf32>
    %160 = tpu.matmul %4, %156, %cst_70 {dimension_numbers = #tpu.dot_dimension_numbers<[1], [0], [0], [1], [0, 0, 1, 1], [], []>, precision = #tpu.contract_precision<fp32>} : vector<8x8xf32>, vector<8x256xf32>, vector<8x256xf32> -> vector<8x256xf32>
    %c0_71 = arith.constant 0 : index
    %c0_72 = arith.constant 0 : index
    %c4 = arith.constant 4 : index
    %161 = vector.load %arg4[%c0_71, %c0_72, %c4] : memref<1x8x16xf32, #tpu.memory_space<vmem>>, vector<1x8x1xf32>
    %162 = vector.shape_cast %161 : vector<1x8x1xf32> to vector<8x1xf32>
    %163 = vector.broadcast %162 : vector<8x1xf32> to vector<8x256xf32>
    %164 = arith.addf %160, %163 : vector<8x256xf32>
    %165 = math.tanh %164 : vector<8x256xf32>
    %c0_73 = arith.constant 0 : index
    %c0_74 = arith.constant 0 : index
    %c4_75 = arith.constant 4 : index
    %166 = vector.load %arg5[%c0_73, %c0_74, %c4_75] : memref<1x8x16xf32, #tpu.memory_space<vmem>>, vector<1x8x1xf32>
    %167 = vector.shape_cast %166 : vector<1x8x1xf32> to vector<8x1xf32>
    %168 = vector.broadcast %167 : vector<8x1xf32> to vector<8x256xf32>
    %169 = arith.addf %160, %168 : vector<8x256xf32>
    %170 = math.tanh %169 : vector<8x256xf32>
    %cst_76 = arith.constant 2.500000e+00 : f32
    %171 = vector.broadcast %cst_76 : f32 to vector<8x256xf32>
    %172 = arith.mulf %171, %165 : vector<8x256xf32>
    %cst_77 = arith.constant 1.500000e+00 : f32
    %173 = vector.broadcast %cst_77 : f32 to vector<8x256xf32>
    %174 = arith.mulf %173, %170 : vector<8x256xf32>
    %175 = arith.subf %172, %174 : vector<8x256xf32>
    %c0_i32_78 = arith.constant 0 : i32
    %176 = arith.addi %159, %c0_i32_78 : i32
    %177 = arith.index_cast %176 : i32 to index
    %178 = memref.load %arg1[%177] : memref<128xf32, #tpu.memory_space<smem>>
    %c1_i32_79 = arith.constant 1 : i32
    %179 = arith.addi %159, %c1_i32_79 : i32
    %180 = arith.index_cast %179 : i32 to index
    %181 = memref.load %arg1[%180] : memref<128xf32, #tpu.memory_space<smem>>
    %c2_i32_80 = arith.constant 2 : i32
    %182 = arith.addi %159, %c2_i32_80 : i32
    %183 = arith.index_cast %182 : i32 to index
    %184 = memref.load %arg1[%183] : memref<128xf32, #tpu.memory_space<smem>>
    %185 = vector.broadcast %178 : f32 to vector<8x256xf32>
    %186 = arith.mulf %185, %156 : vector<8x256xf32>
    %187 = vector.broadcast %181 : f32 to vector<8x256xf32>
    %188 = arith.mulf %187, %175 : vector<8x256xf32>
    %189 = arith.subf %186, %188 : vector<8x256xf32>
    %c4_81 = arith.constant 4 : index
    %c0_82 = arith.constant 0 : index
    %c0_83 = arith.constant 0 : index
    %190 = vector.load %arg6[%c4_81, %c0_82, %c0_83] : memref<16x8x256xf32, #tpu.memory_space<vmem>>, vector<1x8x256xf32>
    %191 = vector.shape_cast %190 : vector<1x8x256xf32> to vector<8x256xf32>
    %192 = vector.broadcast %184 : f32 to vector<8x256xf32>
    %193 = arith.mulf %192, %191 : vector<8x256xf32>
    %194 = arith.addf %189, %193 : vector<8x256xf32>
    %c16_i32_84 = arith.constant 16 : i32
    %195 = arith.muli %arg0, %c16_i32_84 : i32
    %c5_i32 = arith.constant 5 : i32
    %196 = arith.addi %195, %c5_i32 : i32
    %c4_i32_85 = arith.constant 4 : i32
    %197 = arith.muli %196, %c4_i32_85 : i32
    %cst_86 = arith.constant dense<0.000000e+00> : vector<8x256xf32>
    %198 = tpu.matmul %4, %194, %cst_86 {dimension_numbers = #tpu.dot_dimension_numbers<[1], [0], [0], [1], [0, 0, 1, 1], [], []>, precision = #tpu.contract_precision<fp32>} : vector<8x8xf32>, vector<8x256xf32>, vector<8x256xf32> -> vector<8x256xf32>
    %c0_87 = arith.constant 0 : index
    %c0_88 = arith.constant 0 : index
    %c5 = arith.constant 5 : index
    %199 = vector.load %arg4[%c0_87, %c0_88, %c5] : memref<1x8x16xf32, #tpu.memory_space<vmem>>, vector<1x8x1xf32>
    %200 = vector.shape_cast %199 : vector<1x8x1xf32> to vector<8x1xf32>
    %201 = vector.broadcast %200 : vector<8x1xf32> to vector<8x256xf32>
    %202 = arith.addf %198, %201 : vector<8x256xf32>
    %203 = math.tanh %202 : vector<8x256xf32>
    %c0_89 = arith.constant 0 : index
    %c0_90 = arith.constant 0 : index
    %c5_91 = arith.constant 5 : index
    %204 = vector.load %arg5[%c0_89, %c0_90, %c5_91] : memref<1x8x16xf32, #tpu.memory_space<vmem>>, vector<1x8x1xf32>
    %205 = vector.shape_cast %204 : vector<1x8x1xf32> to vector<8x1xf32>
    %206 = vector.broadcast %205 : vector<8x1xf32> to vector<8x256xf32>
    %207 = arith.addf %198, %206 : vector<8x256xf32>
    %208 = math.tanh %207 : vector<8x256xf32>
    %cst_92 = arith.constant 2.500000e+00 : f32
    %209 = vector.broadcast %cst_92 : f32 to vector<8x256xf32>
    %210 = arith.mulf %209, %203 : vector<8x256xf32>
    %cst_93 = arith.constant 1.500000e+00 : f32
    %211 = vector.broadcast %cst_93 : f32 to vector<8x256xf32>
    %212 = arith.mulf %211, %208 : vector<8x256xf32>
    %213 = arith.subf %210, %212 : vector<8x256xf32>
    %c0_i32_94 = arith.constant 0 : i32
    %214 = arith.addi %197, %c0_i32_94 : i32
    %215 = arith.index_cast %214 : i32 to index
    %216 = memref.load %arg1[%215] : memref<128xf32, #tpu.memory_space<smem>>
    %c1_i32_95 = arith.constant 1 : i32
    %217 = arith.addi %197, %c1_i32_95 : i32
    %218 = arith.index_cast %217 : i32 to index
    %219 = memref.load %arg1[%218] : memref<128xf32, #tpu.memory_space<smem>>
    %c2_i32_96 = arith.constant 2 : i32
    %220 = arith.addi %197, %c2_i32_96 : i32
    %221 = arith.index_cast %220 : i32 to index
    %222 = memref.load %arg1[%221] : memref<128xf32, #tpu.memory_space<smem>>
    %223 = vector.broadcast %216 : f32 to vector<8x256xf32>
    %224 = arith.mulf %223, %194 : vector<8x256xf32>
    %225 = vector.broadcast %219 : f32 to vector<8x256xf32>
    %226 = arith.mulf %225, %213 : vector<8x256xf32>
    %227 = arith.subf %224, %226 : vector<8x256xf32>
    %c5_97 = arith.constant 5 : index
    %c0_98 = arith.constant 0 : index
    %c0_99 = arith.constant 0 : index
    %228 = vector.load %arg6[%c5_97, %c0_98, %c0_99] : memref<16x8x256xf32, #tpu.memory_space<vmem>>, vector<1x8x256xf32>
    %229 = vector.shape_cast %228 : vector<1x8x256xf32> to vector<8x256xf32>
    %230 = vector.broadcast %222 : f32 to vector<8x256xf32>
    %231 = arith.mulf %230, %229 : vector<8x256xf32>
    %232 = arith.addf %227, %231 : vector<8x256xf32>
    %c16_i32_100 = arith.constant 16 : i32
    %233 = arith.muli %arg0, %c16_i32_100 : i32
    %c6_i32 = arith.constant 6 : i32
    %234 = arith.addi %233, %c6_i32 : i32
    %c4_i32_101 = arith.constant 4 : i32
    %235 = arith.muli %234, %c4_i32_101 : i32
    %cst_102 = arith.constant dense<0.000000e+00> : vector<8x256xf32>
    %236 = tpu.matmul %4, %232, %cst_102 {dimension_numbers = #tpu.dot_dimension_numbers<[1], [0], [0], [1], [0, 0, 1, 1], [], []>, precision = #tpu.contract_precision<fp32>} : vector<8x8xf32>, vector<8x256xf32>, vector<8x256xf32> -> vector<8x256xf32>
    %c0_103 = arith.constant 0 : index
    %c0_104 = arith.constant 0 : index
    %c6 = arith.constant 6 : index
    %237 = vector.load %arg4[%c0_103, %c0_104, %c6] : memref<1x8x16xf32, #tpu.memory_space<vmem>>, vector<1x8x1xf32>
    %238 = vector.shape_cast %237 : vector<1x8x1xf32> to vector<8x1xf32>
    %239 = vector.broadcast %238 : vector<8x1xf32> to vector<8x256xf32>
    %240 = arith.addf %236, %239 : vector<8x256xf32>
    %241 = math.tanh %240 : vector<8x256xf32>
    %c0_105 = arith.constant 0 : index
    %c0_106 = arith.constant 0 : index
    %c6_107 = arith.constant 6 : index
    %242 = vector.load %arg5[%c0_105, %c0_106, %c6_107] : memref<1x8x16xf32, #tpu.memory_space<vmem>>, vector<1x8x1xf32>
    %243 = vector.shape_cast %242 : vector<1x8x1xf32> to vector<8x1xf32>
    %244 = vector.broadcast %243 : vector<8x1xf32> to vector<8x256xf32>
    %245 = arith.addf %236, %244 : vector<8x256xf32>
    %246 = math.tanh %245 : vector<8x256xf32>
    %cst_108 = arith.constant 2.500000e+00 : f32
    %247 = vector.broadcast %cst_108 : f32 to vector<8x256xf32>
    %248 = arith.mulf %247, %241 : vector<8x256xf32>
    %cst_109 = arith.constant 1.500000e+00 : f32
    %249 = vector.broadcast %cst_109 : f32 to vector<8x256xf32>
    %250 = arith.mulf %249, %246 : vector<8x256xf32>
    %251 = arith.subf %248, %250 : vector<8x256xf32>
    %c0_i32_110 = arith.constant 0 : i32
    %252 = arith.addi %235, %c0_i32_110 : i32
    %253 = arith.index_cast %252 : i32 to index
    %254 = memref.load %arg1[%253] : memref<128xf32, #tpu.memory_space<smem>>
    %c1_i32_111 = arith.constant 1 : i32
    %255 = arith.addi %235, %c1_i32_111 : i32
    %256 = arith.index_cast %255 : i32 to index
    %257 = memref.load %arg1[%256] : memref<128xf32, #tpu.memory_space<smem>>
    %c2_i32_112 = arith.constant 2 : i32
    %258 = arith.addi %235, %c2_i32_112 : i32
    %259 = arith.index_cast %258 : i32 to index
    %260 = memref.load %arg1[%259] : memref<128xf32, #tpu.memory_space<smem>>
    %261 = vector.broadcast %254 : f32 to vector<8x256xf32>
    %262 = arith.mulf %261, %232 : vector<8x256xf32>
    %263 = vector.broadcast %257 : f32 to vector<8x256xf32>
    %264 = arith.mulf %263, %251 : vector<8x256xf32>
    %265 = arith.subf %262, %264 : vector<8x256xf32>
    %c6_113 = arith.constant 6 : index
    %c0_114 = arith.constant 0 : index
    %c0_115 = arith.constant 0 : index
    %266 = vector.load %arg6[%c6_113, %c0_114, %c0_115] : memref<16x8x256xf32, #tpu.memory_space<vmem>>, vector<1x8x256xf32>
    %267 = vector.shape_cast %266 : vector<1x8x256xf32> to vector<8x256xf32>
    %268 = vector.broadcast %260 : f32 to vector<8x256xf32>
    %269 = arith.mulf %268, %267 : vector<8x256xf32>
    %270 = arith.addf %265, %269 : vector<8x256xf32>
    %c16_i32_116 = arith.constant 16 : i32
    %271 = arith.muli %arg0, %c16_i32_116 : i32
    %c7_i32 = arith.constant 7 : i32
    %272 = arith.addi %271, %c7_i32 : i32
    %c4_i32_117 = arith.constant 4 : i32
    %273 = arith.muli %272, %c4_i32_117 : i32
    %cst_118 = arith.constant dense<0.000000e+00> : vector<8x256xf32>
    %274 = tpu.matmul %4, %270, %cst_118 {dimension_numbers = #tpu.dot_dimension_numbers<[1], [0], [0], [1], [0, 0, 1, 1], [], []>, precision = #tpu.contract_precision<fp32>} : vector<8x8xf32>, vector<8x256xf32>, vector<8x256xf32> -> vector<8x256xf32>
    %c0_119 = arith.constant 0 : index
    %c0_120 = arith.constant 0 : index
    %c7 = arith.constant 7 : index
    %275 = vector.load %arg4[%c0_119, %c0_120, %c7] : memref<1x8x16xf32, #tpu.memory_space<vmem>>, vector<1x8x1xf32>
    %276 = vector.shape_cast %275 : vector<1x8x1xf32> to vector<8x1xf32>
    %277 = vector.broadcast %276 : vector<8x1xf32> to vector<8x256xf32>
    %278 = arith.addf %274, %277 : vector<8x256xf32>
    %279 = math.tanh %278 : vector<8x256xf32>
    %c0_121 = arith.constant 0 : index
    %c0_122 = arith.constant 0 : index
    %c7_123 = arith.constant 7 : index
    %280 = vector.load %arg5[%c0_121, %c0_122, %c7_123] : memref<1x8x16xf32, #tpu.memory_space<vmem>>, vector<1x8x1xf32>
    %281 = vector.shape_cast %280 : vector<1x8x1xf32> to vector<8x1xf32>
    %282 = vector.broadcast %281 : vector<8x1xf32> to vector<8x256xf32>
    %283 = arith.addf %274, %282 : vector<8x256xf32>
    %284 = math.tanh %283 : vector<8x256xf32>
    %cst_124 = arith.constant 2.500000e+00 : f32
    %285 = vector.broadcast %cst_124 : f32 to vector<8x256xf32>
    %286 = arith.mulf %285, %279 : vector<8x256xf32>
    %cst_125 = arith.constant 1.500000e+00 : f32
    %287 = vector.broadcast %cst_125 : f32 to vector<8x256xf32>
    %288 = arith.mulf %287, %284 : vector<8x256xf32>
    %289 = arith.subf %286, %288 : vector<8x256xf32>
    %c0_i32_126 = arith.constant 0 : i32
    %290 = arith.addi %273, %c0_i32_126 : i32
    %291 = arith.index_cast %290 : i32 to index
    %292 = memref.load %arg1[%291] : memref<128xf32, #tpu.memory_space<smem>>
    %c1_i32_127 = arith.constant 1 : i32
    %293 = arith.addi %273, %c1_i32_127 : i32
    %294 = arith.index_cast %293 : i32 to index
    %295 = memref.load %arg1[%294] : memref<128xf32, #tpu.memory_space<smem>>
    %c2_i32_128 = arith.constant 2 : i32
    %296 = arith.addi %273, %c2_i32_128 : i32
    %297 = arith.index_cast %296 : i32 to index
    %298 = memref.load %arg1[%297] : memref<128xf32, #tpu.memory_space<smem>>
    %299 = vector.broadcast %292 : f32 to vector<8x256xf32>
    %300 = arith.mulf %299, %270 : vector<8x256xf32>
    %301 = vector.broadcast %295 : f32 to vector<8x256xf32>
    %302 = arith.mulf %301, %289 : vector<8x256xf32>
    %303 = arith.subf %300, %302 : vector<8x256xf32>
    %c7_129 = arith.constant 7 : index
    %c0_130 = arith.constant 0 : index
    %c0_131 = arith.constant 0 : index
    %304 = vector.load %arg6[%c7_129, %c0_130, %c0_131] : memref<16x8x256xf32, #tpu.memory_space<vmem>>, vector<1x8x256xf32>
    %305 = vector.shape_cast %304 : vector<1x8x256xf32> to vector<8x256xf32>
    %306 = vector.broadcast %298 : f32 to vector<8x256xf32>
    %307 = arith.mulf %306, %305 : vector<8x256xf32>
    %308 = arith.addf %303, %307 : vector<8x256xf32>
    %c16_i32_132 = arith.constant 16 : i32
    %309 = arith.muli %arg0, %c16_i32_132 : i32
    %c8_i32 = arith.constant 8 : i32
    %310 = arith.addi %309, %c8_i32 : i32
    %c4_i32_133 = arith.constant 4 : i32
    %311 = arith.muli %310, %c4_i32_133 : i32
    %cst_134 = arith.constant dense<0.000000e+00> : vector<8x256xf32>
    %312 = tpu.matmul %4, %308, %cst_134 {dimension_numbers = #tpu.dot_dimension_numbers<[1], [0], [0], [1], [0, 0, 1, 1], [], []>, precision = #tpu.contract_precision<fp32>} : vector<8x8xf32>, vector<8x256xf32>, vector<8x256xf32> -> vector<8x256xf32>
    %c0_135 = arith.constant 0 : index
    %c0_136 = arith.constant 0 : index
    %c8 = arith.constant 8 : index
    %313 = vector.load %arg4[%c0_135, %c0_136, %c8] : memref<1x8x16xf32, #tpu.memory_space<vmem>>, vector<1x8x1xf32>
    %314 = vector.shape_cast %313 : vector<1x8x1xf32> to vector<8x1xf32>
    %315 = vector.broadcast %314 : vector<8x1xf32> to vector<8x256xf32>
    %316 = arith.addf %312, %315 : vector<8x256xf32>
    %317 = math.tanh %316 : vector<8x256xf32>
    %c0_137 = arith.constant 0 : index
    %c0_138 = arith.constant 0 : index
    %c8_139 = arith.constant 8 : index
    %318 = vector.load %arg5[%c0_137, %c0_138, %c8_139] : memref<1x8x16xf32, #tpu.memory_space<vmem>>, vector<1x8x1xf32>
    %319 = vector.shape_cast %318 : vector<1x8x1xf32> to vector<8x1xf32>
    %320 = vector.broadcast %319 : vector<8x1xf32> to vector<8x256xf32>
    %321 = arith.addf %312, %320 : vector<8x256xf32>
    %322 = math.tanh %321 : vector<8x256xf32>
    %cst_140 = arith.constant 2.500000e+00 : f32
    %323 = vector.broadcast %cst_140 : f32 to vector<8x256xf32>
    %324 = arith.mulf %323, %317 : vector<8x256xf32>
    %cst_141 = arith.constant 1.500000e+00 : f32
    %325 = vector.broadcast %cst_141 : f32 to vector<8x256xf32>
    %326 = arith.mulf %325, %322 : vector<8x256xf32>
    %327 = arith.subf %324, %326 : vector<8x256xf32>
    %c0_i32_142 = arith.constant 0 : i32
    %328 = arith.addi %311, %c0_i32_142 : i32
    %329 = arith.index_cast %328 : i32 to index
    %330 = memref.load %arg1[%329] : memref<128xf32, #tpu.memory_space<smem>>
    %c1_i32_143 = arith.constant 1 : i32
    %331 = arith.addi %311, %c1_i32_143 : i32
    %332 = arith.index_cast %331 : i32 to index
    %333 = memref.load %arg1[%332] : memref<128xf32, #tpu.memory_space<smem>>
    %c2_i32_144 = arith.constant 2 : i32
    %334 = arith.addi %311, %c2_i32_144 : i32
    %335 = arith.index_cast %334 : i32 to index
    %336 = memref.load %arg1[%335] : memref<128xf32, #tpu.memory_space<smem>>
    %337 = vector.broadcast %330 : f32 to vector<8x256xf32>
    %338 = arith.mulf %337, %308 : vector<8x256xf32>
    %339 = vector.broadcast %333 : f32 to vector<8x256xf32>
    %340 = arith.mulf %339, %327 : vector<8x256xf32>
    %341 = arith.subf %338, %340 : vector<8x256xf32>
    %c8_145 = arith.constant 8 : index
    %c0_146 = arith.constant 0 : index
    %c0_147 = arith.constant 0 : index
    %342 = vector.load %arg6[%c8_145, %c0_146, %c0_147] : memref<16x8x256xf32, #tpu.memory_space<vmem>>, vector<1x8x256xf32>
    %343 = vector.shape_cast %342 : vector<1x8x256xf32> to vector<8x256xf32>
    %344 = vector.broadcast %336 : f32 to vector<8x256xf32>
    %345 = arith.mulf %344, %343 : vector<8x256xf32>
    %346 = arith.addf %341, %345 : vector<8x256xf32>
    %c16_i32_148 = arith.constant 16 : i32
    %347 = arith.muli %arg0, %c16_i32_148 : i32
    %c9_i32 = arith.constant 9 : i32
    %348 = arith.addi %347, %c9_i32 : i32
    %c4_i32_149 = arith.constant 4 : i32
    %349 = arith.muli %348, %c4_i32_149 : i32
    %cst_150 = arith.constant dense<0.000000e+00> : vector<8x256xf32>
    %350 = tpu.matmul %4, %346, %cst_150 {dimension_numbers = #tpu.dot_dimension_numbers<[1], [0], [0], [1], [0, 0, 1, 1], [], []>, precision = #tpu.contract_precision<fp32>} : vector<8x8xf32>, vector<8x256xf32>, vector<8x256xf32> -> vector<8x256xf32>
    %c0_151 = arith.constant 0 : index
    %c0_152 = arith.constant 0 : index
    %c9 = arith.constant 9 : index
    %351 = vector.load %arg4[%c0_151, %c0_152, %c9] : memref<1x8x16xf32, #tpu.memory_space<vmem>>, vector<1x8x1xf32>
    %352 = vector.shape_cast %351 : vector<1x8x1xf32> to vector<8x1xf32>
    %353 = vector.broadcast %352 : vector<8x1xf32> to vector<8x256xf32>
    %354 = arith.addf %350, %353 : vector<8x256xf32>
    %355 = math.tanh %354 : vector<8x256xf32>
    %c0_153 = arith.constant 0 : index
    %c0_154 = arith.constant 0 : index
    %c9_155 = arith.constant 9 : index
    %356 = vector.load %arg5[%c0_153, %c0_154, %c9_155] : memref<1x8x16xf32, #tpu.memory_space<vmem>>, vector<1x8x1xf32>
    %357 = vector.shape_cast %356 : vector<1x8x1xf32> to vector<8x1xf32>
    %358 = vector.broadcast %357 : vector<8x1xf32> to vector<8x256xf32>
    %359 = arith.addf %350, %358 : vector<8x256xf32>
    %360 = math.tanh %359 : vector<8x256xf32>
    %cst_156 = arith.constant 2.500000e+00 : f32
    %361 = vector.broadcast %cst_156 : f32 to vector<8x256xf32>
    %362 = arith.mulf %361, %355 : vector<8x256xf32>
    %cst_157 = arith.constant 1.500000e+00 : f32
    %363 = vector.broadcast %cst_157 : f32 to vector<8x256xf32>
    %364 = arith.mulf %363, %360 : vector<8x256xf32>
    %365 = arith.subf %362, %364 : vector<8x256xf32>
    %c0_i32_158 = arith.constant 0 : i32
    %366 = arith.addi %349, %c0_i32_158 : i32
    %367 = arith.index_cast %366 : i32 to index
    %368 = memref.load %arg1[%367] : memref<128xf32, #tpu.memory_space<smem>>
    %c1_i32_159 = arith.constant 1 : i32
    %369 = arith.addi %349, %c1_i32_159 : i32
    %370 = arith.index_cast %369 : i32 to index
    %371 = memref.load %arg1[%370] : memref<128xf32, #tpu.memory_space<smem>>
    %c2_i32_160 = arith.constant 2 : i32
    %372 = arith.addi %349, %c2_i32_160 : i32
    %373 = arith.index_cast %372 : i32 to index
    %374 = memref.load %arg1[%373] : memref<128xf32, #tpu.memory_space<smem>>
    %375 = vector.broadcast %368 : f32 to vector<8x256xf32>
    %376 = arith.mulf %375, %346 : vector<8x256xf32>
    %377 = vector.broadcast %371 : f32 to vector<8x256xf32>
    %378 = arith.mulf %377, %365 : vector<8x256xf32>
    %379 = arith.subf %376, %378 : vector<8x256xf32>
    %c9_161 = arith.constant 9 : index
    %c0_162 = arith.constant 0 : index
    %c0_163 = arith.constant 0 : index
    %380 = vector.load %arg6[%c9_161, %c0_162, %c0_163] : memref<16x8x256xf32, #tpu.memory_space<vmem>>, vector<1x8x256xf32>
    %381 = vector.shape_cast %380 : vector<1x8x256xf32> to vector<8x256xf32>
    %382 = vector.broadcast %374 : f32 to vector<8x256xf32>
    %383 = arith.mulf %382, %381 : vector<8x256xf32>
    %384 = arith.addf %379, %383 : vector<8x256xf32>
    %c16_i32_164 = arith.constant 16 : i32
    %385 = arith.muli %arg0, %c16_i32_164 : i32
    %c10_i32 = arith.constant 10 : i32
    %386 = arith.addi %385, %c10_i32 : i32
    %c4_i32_165 = arith.constant 4 : i32
    %387 = arith.muli %386, %c4_i32_165 : i32
    %cst_166 = arith.constant dense<0.000000e+00> : vector<8x256xf32>
    %388 = tpu.matmul %4, %384, %cst_166 {dimension_numbers = #tpu.dot_dimension_numbers<[1], [0], [0], [1], [0, 0, 1, 1], [], []>, precision = #tpu.contract_precision<fp32>} : vector<8x8xf32>, vector<8x256xf32>, vector<8x256xf32> -> vector<8x256xf32>
    %c0_167 = arith.constant 0 : index
    %c0_168 = arith.constant 0 : index
    %c10 = arith.constant 10 : index
    %389 = vector.load %arg4[%c0_167, %c0_168, %c10] : memref<1x8x16xf32, #tpu.memory_space<vmem>>, vector<1x8x1xf32>
    %390 = vector.shape_cast %389 : vector<1x8x1xf32> to vector<8x1xf32>
    %391 = vector.broadcast %390 : vector<8x1xf32> to vector<8x256xf32>
    %392 = arith.addf %388, %391 : vector<8x256xf32>
    %393 = math.tanh %392 : vector<8x256xf32>
    %c0_169 = arith.constant 0 : index
    %c0_170 = arith.constant 0 : index
    %c10_171 = arith.constant 10 : index
    %394 = vector.load %arg5[%c0_169, %c0_170, %c10_171] : memref<1x8x16xf32, #tpu.memory_space<vmem>>, vector<1x8x1xf32>
    %395 = vector.shape_cast %394 : vector<1x8x1xf32> to vector<8x1xf32>
    %396 = vector.broadcast %395 : vector<8x1xf32> to vector<8x256xf32>
    %397 = arith.addf %388, %396 : vector<8x256xf32>
    %398 = math.tanh %397 : vector<8x256xf32>
    %cst_172 = arith.constant 2.500000e+00 : f32
    %399 = vector.broadcast %cst_172 : f32 to vector<8x256xf32>
    %400 = arith.mulf %399, %393 : vector<8x256xf32>
    %cst_173 = arith.constant 1.500000e+00 : f32
    %401 = vector.broadcast %cst_173 : f32 to vector<8x256xf32>
    %402 = arith.mulf %401, %398 : vector<8x256xf32>
    %403 = arith.subf %400, %402 : vector<8x256xf32>
    %c0_i32_174 = arith.constant 0 : i32
    %404 = arith.addi %387, %c0_i32_174 : i32
    %405 = arith.index_cast %404 : i32 to index
    %406 = memref.load %arg1[%405] : memref<128xf32, #tpu.memory_space<smem>>
    %c1_i32_175 = arith.constant 1 : i32
    %407 = arith.addi %387, %c1_i32_175 : i32
    %408 = arith.index_cast %407 : i32 to index
    %409 = memref.load %arg1[%408] : memref<128xf32, #tpu.memory_space<smem>>
    %c2_i32_176 = arith.constant 2 : i32
    %410 = arith.addi %387, %c2_i32_176 : i32
    %411 = arith.index_cast %410 : i32 to index
    %412 = memref.load %arg1[%411] : memref<128xf32, #tpu.memory_space<smem>>
    %413 = vector.broadcast %406 : f32 to vector<8x256xf32>
    %414 = arith.mulf %413, %384 : vector<8x256xf32>
    %415 = vector.broadcast %409 : f32 to vector<8x256xf32>
    %416 = arith.mulf %415, %403 : vector<8x256xf32>
    %417 = arith.subf %414, %416 : vector<8x256xf32>
    %c10_177 = arith.constant 10 : index
    %c0_178 = arith.constant 0 : index
    %c0_179 = arith.constant 0 : index
    %418 = vector.load %arg6[%c10_177, %c0_178, %c0_179] : memref<16x8x256xf32, #tpu.memory_space<vmem>>, vector<1x8x256xf32>
    %419 = vector.shape_cast %418 : vector<1x8x256xf32> to vector<8x256xf32>
    %420 = vector.broadcast %412 : f32 to vector<8x256xf32>
    %421 = arith.mulf %420, %419 : vector<8x256xf32>
    %422 = arith.addf %417, %421 : vector<8x256xf32>
    %c16_i32_180 = arith.constant 16 : i32
    %423 = arith.muli %arg0, %c16_i32_180 : i32
    %c11_i32 = arith.constant 11 : i32
    %424 = arith.addi %423, %c11_i32 : i32
    %c4_i32_181 = arith.constant 4 : i32
    %425 = arith.muli %424, %c4_i32_181 : i32
    %cst_182 = arith.constant dense<0.000000e+00> : vector<8x256xf32>
    %426 = tpu.matmul %4, %422, %cst_182 {dimension_numbers = #tpu.dot_dimension_numbers<[1], [0], [0], [1], [0, 0, 1, 1], [], []>, precision = #tpu.contract_precision<fp32>} : vector<8x8xf32>, vector<8x256xf32>, vector<8x256xf32> -> vector<8x256xf32>
    %c0_183 = arith.constant 0 : index
    %c0_184 = arith.constant 0 : index
    %c11 = arith.constant 11 : index
    %427 = vector.load %arg4[%c0_183, %c0_184, %c11] : memref<1x8x16xf32, #tpu.memory_space<vmem>>, vector<1x8x1xf32>
    %428 = vector.shape_cast %427 : vector<1x8x1xf32> to vector<8x1xf32>
    %429 = vector.broadcast %428 : vector<8x1xf32> to vector<8x256xf32>
    %430 = arith.addf %426, %429 : vector<8x256xf32>
    %431 = math.tanh %430 : vector<8x256xf32>
    %c0_185 = arith.constant 0 : index
    %c0_186 = arith.constant 0 : index
    %c11_187 = arith.constant 11 : index
    %432 = vector.load %arg5[%c0_185, %c0_186, %c11_187] : memref<1x8x16xf32, #tpu.memory_space<vmem>>, vector<1x8x1xf32>
    %433 = vector.shape_cast %432 : vector<1x8x1xf32> to vector<8x1xf32>
    %434 = vector.broadcast %433 : vector<8x1xf32> to vector<8x256xf32>
    %435 = arith.addf %426, %434 : vector<8x256xf32>
    %436 = math.tanh %435 : vector<8x256xf32>
    %cst_188 = arith.constant 2.500000e+00 : f32
    %437 = vector.broadcast %cst_188 : f32 to vector<8x256xf32>
    %438 = arith.mulf %437, %431 : vector<8x256xf32>
    %cst_189 = arith.constant 1.500000e+00 : f32
    %439 = vector.broadcast %cst_189 : f32 to vector<8x256xf32>
    %440 = arith.mulf %439, %436 : vector<8x256xf32>
    %441 = arith.subf %438, %440 : vector<8x256xf32>
    %c0_i32_190 = arith.constant 0 : i32
    %442 = arith.addi %425, %c0_i32_190 : i32
    %443 = arith.index_cast %442 : i32 to index
    %444 = memref.load %arg1[%443] : memref<128xf32, #tpu.memory_space<smem>>
    %c1_i32_191 = arith.constant 1 : i32
    %445 = arith.addi %425, %c1_i32_191 : i32
    %446 = arith.index_cast %445 : i32 to index
    %447 = memref.load %arg1[%446] : memref<128xf32, #tpu.memory_space<smem>>
    %c2_i32_192 = arith.constant 2 : i32
    %448 = arith.addi %425, %c2_i32_192 : i32
    %449 = arith.index_cast %448 : i32 to index
    %450 = memref.load %arg1[%449] : memref<128xf32, #tpu.memory_space<smem>>
    %451 = vector.broadcast %444 : f32 to vector<8x256xf32>
    %452 = arith.mulf %451, %422 : vector<8x256xf32>
    %453 = vector.broadcast %447 : f32 to vector<8x256xf32>
    %454 = arith.mulf %453, %441 : vector<8x256xf32>
    %455 = arith.subf %452, %454 : vector<8x256xf32>
    %c11_193 = arith.constant 11 : index
    %c0_194 = arith.constant 0 : index
    %c0_195 = arith.constant 0 : index
    %456 = vector.load %arg6[%c11_193, %c0_194, %c0_195] : memref<16x8x256xf32, #tpu.memory_space<vmem>>, vector<1x8x256xf32>
    %457 = vector.shape_cast %456 : vector<1x8x256xf32> to vector<8x256xf32>
    %458 = vector.broadcast %450 : f32 to vector<8x256xf32>
    %459 = arith.mulf %458, %457 : vector<8x256xf32>
    %460 = arith.addf %455, %459 : vector<8x256xf32>
    %c16_i32_196 = arith.constant 16 : i32
    %461 = arith.muli %arg0, %c16_i32_196 : i32
    %c12_i32 = arith.constant 12 : i32
    %462 = arith.addi %461, %c12_i32 : i32
    %c4_i32_197 = arith.constant 4 : i32
    %463 = arith.muli %462, %c4_i32_197 : i32
    %cst_198 = arith.constant dense<0.000000e+00> : vector<8x256xf32>
    %464 = tpu.matmul %4, %460, %cst_198 {dimension_numbers = #tpu.dot_dimension_numbers<[1], [0], [0], [1], [0, 0, 1, 1], [], []>, precision = #tpu.contract_precision<fp32>} : vector<8x8xf32>, vector<8x256xf32>, vector<8x256xf32> -> vector<8x256xf32>
    %c0_199 = arith.constant 0 : index
    %c0_200 = arith.constant 0 : index
    %c12 = arith.constant 12 : index
    %465 = vector.load %arg4[%c0_199, %c0_200, %c12] : memref<1x8x16xf32, #tpu.memory_space<vmem>>, vector<1x8x1xf32>
    %466 = vector.shape_cast %465 : vector<1x8x1xf32> to vector<8x1xf32>
    %467 = vector.broadcast %466 : vector<8x1xf32> to vector<8x256xf32>
    %468 = arith.addf %464, %467 : vector<8x256xf32>
    %469 = math.tanh %468 : vector<8x256xf32>
    %c0_201 = arith.constant 0 : index
    %c0_202 = arith.constant 0 : index
    %c12_203 = arith.constant 12 : index
    %470 = vector.load %arg5[%c0_201, %c0_202, %c12_203] : memref<1x8x16xf32, #tpu.memory_space<vmem>>, vector<1x8x1xf32>
    %471 = vector.shape_cast %470 : vector<1x8x1xf32> to vector<8x1xf32>
    %472 = vector.broadcast %471 : vector<8x1xf32> to vector<8x256xf32>
    %473 = arith.addf %464, %472 : vector<8x256xf32>
    %474 = math.tanh %473 : vector<8x256xf32>
    %cst_204 = arith.constant 2.500000e+00 : f32
    %475 = vector.broadcast %cst_204 : f32 to vector<8x256xf32>
    %476 = arith.mulf %475, %469 : vector<8x256xf32>
    %cst_205 = arith.constant 1.500000e+00 : f32
    %477 = vector.broadcast %cst_205 : f32 to vector<8x256xf32>
    %478 = arith.mulf %477, %474 : vector<8x256xf32>
    %479 = arith.subf %476, %478 : vector<8x256xf32>
    %c0_i32_206 = arith.constant 0 : i32
    %480 = arith.addi %463, %c0_i32_206 : i32
    %481 = arith.index_cast %480 : i32 to index
    %482 = memref.load %arg1[%481] : memref<128xf32, #tpu.memory_space<smem>>
    %c1_i32_207 = arith.constant 1 : i32
    %483 = arith.addi %463, %c1_i32_207 : i32
    %484 = arith.index_cast %483 : i32 to index
    %485 = memref.load %arg1[%484] : memref<128xf32, #tpu.memory_space<smem>>
    %c2_i32_208 = arith.constant 2 : i32
    %486 = arith.addi %463, %c2_i32_208 : i32
    %487 = arith.index_cast %486 : i32 to index
    %488 = memref.load %arg1[%487] : memref<128xf32, #tpu.memory_space<smem>>
    %489 = vector.broadcast %482 : f32 to vector<8x256xf32>
    %490 = arith.mulf %489, %460 : vector<8x256xf32>
    %491 = vector.broadcast %485 : f32 to vector<8x256xf32>
    %492 = arith.mulf %491, %479 : vector<8x256xf32>
    %493 = arith.subf %490, %492 : vector<8x256xf32>
    %c12_209 = arith.constant 12 : index
    %c0_210 = arith.constant 0 : index
    %c0_211 = arith.constant 0 : index
    %494 = vector.load %arg6[%c12_209, %c0_210, %c0_211] : memref<16x8x256xf32, #tpu.memory_space<vmem>>, vector<1x8x256xf32>
    %495 = vector.shape_cast %494 : vector<1x8x256xf32> to vector<8x256xf32>
    %496 = vector.broadcast %488 : f32 to vector<8x256xf32>
    %497 = arith.mulf %496, %495 : vector<8x256xf32>
    %498 = arith.addf %493, %497 : vector<8x256xf32>
    %c16_i32_212 = arith.constant 16 : i32
    %499 = arith.muli %arg0, %c16_i32_212 : i32
    %c13_i32 = arith.constant 13 : i32
    %500 = arith.addi %499, %c13_i32 : i32
    %c4_i32_213 = arith.constant 4 : i32
    %501 = arith.muli %500, %c4_i32_213 : i32
    %cst_214 = arith.constant dense<0.000000e+00> : vector<8x256xf32>
    %502 = tpu.matmul %4, %498, %cst_214 {dimension_numbers = #tpu.dot_dimension_numbers<[1], [0], [0], [1], [0, 0, 1, 1], [], []>, precision = #tpu.contract_precision<fp32>} : vector<8x8xf32>, vector<8x256xf32>, vector<8x256xf32> -> vector<8x256xf32>
    %c0_215 = arith.constant 0 : index
    %c0_216 = arith.constant 0 : index
    %c13 = arith.constant 13 : index
    %503 = vector.load %arg4[%c0_215, %c0_216, %c13] : memref<1x8x16xf32, #tpu.memory_space<vmem>>, vector<1x8x1xf32>
    %504 = vector.shape_cast %503 : vector<1x8x1xf32> to vector<8x1xf32>
    %505 = vector.broadcast %504 : vector<8x1xf32> to vector<8x256xf32>
    %506 = arith.addf %502, %505 : vector<8x256xf32>
    %507 = math.tanh %506 : vector<8x256xf32>
    %c0_217 = arith.constant 0 : index
    %c0_218 = arith.constant 0 : index
    %c13_219 = arith.constant 13 : index
    %508 = vector.load %arg5[%c0_217, %c0_218, %c13_219] : memref<1x8x16xf32, #tpu.memory_space<vmem>>, vector<1x8x1xf32>
    %509 = vector.shape_cast %508 : vector<1x8x1xf32> to vector<8x1xf32>
    %510 = vector.broadcast %509 : vector<8x1xf32> to vector<8x256xf32>
    %511 = arith.addf %502, %510 : vector<8x256xf32>
    %512 = math.tanh %511 : vector<8x256xf32>
    %cst_220 = arith.constant 2.500000e+00 : f32
    %513 = vector.broadcast %cst_220 : f32 to vector<8x256xf32>
    %514 = arith.mulf %513, %507 : vector<8x256xf32>
    %cst_221 = arith.constant 1.500000e+00 : f32
    %515 = vector.broadcast %cst_221 : f32 to vector<8x256xf32>
    %516 = arith.mulf %515, %512 : vector<8x256xf32>
    %517 = arith.subf %514, %516 : vector<8x256xf32>
    %c0_i32_222 = arith.constant 0 : i32
    %518 = arith.addi %501, %c0_i32_222 : i32
    %519 = arith.index_cast %518 : i32 to index
    %520 = memref.load %arg1[%519] : memref<128xf32, #tpu.memory_space<smem>>
    %c1_i32_223 = arith.constant 1 : i32
    %521 = arith.addi %501, %c1_i32_223 : i32
    %522 = arith.index_cast %521 : i32 to index
    %523 = memref.load %arg1[%522] : memref<128xf32, #tpu.memory_space<smem>>
    %c2_i32_224 = arith.constant 2 : i32
    %524 = arith.addi %501, %c2_i32_224 : i32
    %525 = arith.index_cast %524 : i32 to index
    %526 = memref.load %arg1[%525] : memref<128xf32, #tpu.memory_space<smem>>
    %527 = vector.broadcast %520 : f32 to vector<8x256xf32>
    %528 = arith.mulf %527, %498 : vector<8x256xf32>
    %529 = vector.broadcast %523 : f32 to vector<8x256xf32>
    %530 = arith.mulf %529, %517 : vector<8x256xf32>
    %531 = arith.subf %528, %530 : vector<8x256xf32>
    %c13_225 = arith.constant 13 : index
    %c0_226 = arith.constant 0 : index
    %c0_227 = arith.constant 0 : index
    %532 = vector.load %arg6[%c13_225, %c0_226, %c0_227] : memref<16x8x256xf32, #tpu.memory_space<vmem>>, vector<1x8x256xf32>
    %533 = vector.shape_cast %532 : vector<1x8x256xf32> to vector<8x256xf32>
    %534 = vector.broadcast %526 : f32 to vector<8x256xf32>
    %535 = arith.mulf %534, %533 : vector<8x256xf32>
    %536 = arith.addf %531, %535 : vector<8x256xf32>
    %c16_i32_228 = arith.constant 16 : i32
    %537 = arith.muli %arg0, %c16_i32_228 : i32
    %c14_i32 = arith.constant 14 : i32
    %538 = arith.addi %537, %c14_i32 : i32
    %c4_i32_229 = arith.constant 4 : i32
    %539 = arith.muli %538, %c4_i32_229 : i32
    %cst_230 = arith.constant dense<0.000000e+00> : vector<8x256xf32>
    %540 = tpu.matmul %4, %536, %cst_230 {dimension_numbers = #tpu.dot_dimension_numbers<[1], [0], [0], [1], [0, 0, 1, 1], [], []>, precision = #tpu.contract_precision<fp32>} : vector<8x8xf32>, vector<8x256xf32>, vector<8x256xf32> -> vector<8x256xf32>
    %c0_231 = arith.constant 0 : index
    %c0_232 = arith.constant 0 : index
    %c14 = arith.constant 14 : index
    %541 = vector.load %arg4[%c0_231, %c0_232, %c14] : memref<1x8x16xf32, #tpu.memory_space<vmem>>, vector<1x8x1xf32>
    %542 = vector.shape_cast %541 : vector<1x8x1xf32> to vector<8x1xf32>
    %543 = vector.broadcast %542 : vector<8x1xf32> to vector<8x256xf32>
    %544 = arith.addf %540, %543 : vector<8x256xf32>
    %545 = math.tanh %544 : vector<8x256xf32>
    %c0_233 = arith.constant 0 : index
    %c0_234 = arith.constant 0 : index
    %c14_235 = arith.constant 14 : index
    %546 = vector.load %arg5[%c0_233, %c0_234, %c14_235] : memref<1x8x16xf32, #tpu.memory_space<vmem>>, vector<1x8x1xf32>
    %547 = vector.shape_cast %546 : vector<1x8x1xf32> to vector<8x1xf32>
    %548 = vector.broadcast %547 : vector<8x1xf32> to vector<8x256xf32>
    %549 = arith.addf %540, %548 : vector<8x256xf32>
    %550 = math.tanh %549 : vector<8x256xf32>
    %cst_236 = arith.constant 2.500000e+00 : f32
    %551 = vector.broadcast %cst_236 : f32 to vector<8x256xf32>
    %552 = arith.mulf %551, %545 : vector<8x256xf32>
    %cst_237 = arith.constant 1.500000e+00 : f32
    %553 = vector.broadcast %cst_237 : f32 to vector<8x256xf32>
    %554 = arith.mulf %553, %550 : vector<8x256xf32>
    %555 = arith.subf %552, %554 : vector<8x256xf32>
    %c0_i32_238 = arith.constant 0 : i32
    %556 = arith.addi %539, %c0_i32_238 : i32
    %557 = arith.index_cast %556 : i32 to index
    %558 = memref.load %arg1[%557] : memref<128xf32, #tpu.memory_space<smem>>
    %c1_i32_239 = arith.constant 1 : i32
    %559 = arith.addi %539, %c1_i32_239 : i32
    %560 = arith.index_cast %559 : i32 to index
    %561 = memref.load %arg1[%560] : memref<128xf32, #tpu.memory_space<smem>>
    %c2_i32_240 = arith.constant 2 : i32
    %562 = arith.addi %539, %c2_i32_240 : i32
    %563 = arith.index_cast %562 : i32 to index
    %564 = memref.load %arg1[%563] : memref<128xf32, #tpu.memory_space<smem>>
    %565 = vector.broadcast %558 : f32 to vector<8x256xf32>
    %566 = arith.mulf %565, %536 : vector<8x256xf32>
    %567 = vector.broadcast %561 : f32 to vector<8x256xf32>
    %568 = arith.mulf %567, %555 : vector<8x256xf32>
    %569 = arith.subf %566, %568 : vector<8x256xf32>
    %c14_241 = arith.constant 14 : index
    %c0_242 = arith.constant 0 : index
    %c0_243 = arith.constant 0 : index
    %570 = vector.load %arg6[%c14_241, %c0_242, %c0_243] : memref<16x8x256xf32, #tpu.memory_space<vmem>>, vector<1x8x256xf32>
    %571 = vector.shape_cast %570 : vector<1x8x256xf32> to vector<8x256xf32>
    %572 = vector.broadcast %564 : f32 to vector<8x256xf32>
    %573 = arith.mulf %572, %571 : vector<8x256xf32>
    %574 = arith.addf %569, %573 : vector<8x256xf32>
    %c16_i32_244 = arith.constant 16 : i32
    %575 = arith.muli %arg0, %c16_i32_244 : i32
    %c15_i32 = arith.constant 15 : i32
    %576 = arith.addi %575, %c15_i32 : i32
    %c4_i32_245 = arith.constant 4 : i32
    %577 = arith.muli %576, %c4_i32_245 : i32
    %cst_246 = arith.constant dense<0.000000e+00> : vector<8x256xf32>
    %578 = tpu.matmul %4, %574, %cst_246 {dimension_numbers = #tpu.dot_dimension_numbers<[1], [0], [0], [1], [0, 0, 1, 1], [], []>, precision = #tpu.contract_precision<fp32>} : vector<8x8xf32>, vector<8x256xf32>, vector<8x256xf32> -> vector<8x256xf32>
    %c0_247 = arith.constant 0 : index
    %c0_248 = arith.constant 0 : index
    %c15 = arith.constant 15 : index
    %579 = vector.load %arg4[%c0_247, %c0_248, %c15] : memref<1x8x16xf32, #tpu.memory_space<vmem>>, vector<1x8x1xf32>
    %580 = vector.shape_cast %579 : vector<1x8x1xf32> to vector<8x1xf32>
    %581 = vector.broadcast %580 : vector<8x1xf32> to vector<8x256xf32>
    %582 = arith.addf %578, %581 : vector<8x256xf32>
    %583 = math.tanh %582 : vector<8x256xf32>
    %c0_249 = arith.constant 0 : index
    %c0_250 = arith.constant 0 : index
    %c15_251 = arith.constant 15 : index
    %584 = vector.load %arg5[%c0_249, %c0_250, %c15_251] : memref<1x8x16xf32, #tpu.memory_space<vmem>>, vector<1x8x1xf32>
    %585 = vector.shape_cast %584 : vector<1x8x1xf32> to vector<8x1xf32>
    %586 = vector.broadcast %585 : vector<8x1xf32> to vector<8x256xf32>
    %587 = arith.addf %578, %586 : vector<8x256xf32>
    %588 = math.tanh %587 : vector<8x256xf32>
    %cst_252 = arith.constant 2.500000e+00 : f32
    %589 = vector.broadcast %cst_252 : f32 to vector<8x256xf32>
    %590 = arith.mulf %589, %583 : vector<8x256xf32>
    %cst_253 = arith.constant 1.500000e+00 : f32
    %591 = vector.broadcast %cst_253 : f32 to vector<8x256xf32>
    %592 = arith.mulf %591, %588 : vector<8x256xf32>
    %593 = arith.subf %590, %592 : vector<8x256xf32>
    %c0_i32_254 = arith.constant 0 : i32
    %594 = arith.addi %577, %c0_i32_254 : i32
    %595 = arith.index_cast %594 : i32 to index
    %596 = memref.load %arg1[%595] : memref<128xf32, #tpu.memory_space<smem>>
    %c1_i32_255 = arith.constant 1 : i32
    %597 = arith.addi %577, %c1_i32_255 : i32
    %598 = arith.index_cast %597 : i32 to index
    %599 = memref.load %arg1[%598] : memref<128xf32, #tpu.memory_space<smem>>
    %c2_i32_256 = arith.constant 2 : i32
    %600 = arith.addi %577, %c2_i32_256 : i32
    %601 = arith.index_cast %600 : i32 to index
    %602 = memref.load %arg1[%601] : memref<128xf32, #tpu.memory_space<smem>>
    %603 = vector.broadcast %596 : f32 to vector<8x256xf32>
    %604 = arith.mulf %603, %574 : vector<8x256xf32>
    %605 = vector.broadcast %599 : f32 to vector<8x256xf32>
    %606 = arith.mulf %605, %593 : vector<8x256xf32>
    %607 = arith.subf %604, %606 : vector<8x256xf32>
    %c15_257 = arith.constant 15 : index
    %c0_258 = arith.constant 0 : index
    %c0_259 = arith.constant 0 : index
    %608 = vector.load %arg6[%c15_257, %c0_258, %c0_259] : memref<16x8x256xf32, #tpu.memory_space<vmem>>, vector<1x8x256xf32>
    %609 = vector.shape_cast %608 : vector<1x8x256xf32> to vector<8x256xf32>
    %610 = vector.broadcast %602 : f32 to vector<8x256xf32>
    %611 = arith.mulf %610, %609 : vector<8x256xf32>
    %612 = arith.addf %607, %611 : vector<8x256xf32>
    %c1_i32_260 = arith.constant 1 : i32
    %613 = arith.cmpi ne, %arg0, %c1_i32_260 : i32
    %614 = arith.extui %613 : i1 to i32
    %c0_i32_261 = arith.constant 0 : i32
    %615 = arith.cmpi ne, %614, %c0_i32_261 : i32
    scf.if %615 {
      %c0_264 = arith.constant 0 : index
      %c0_265 = arith.constant 0 : index
      %619 = vector.load %arg7[%c0_264, %c0_265] : memref<8x256xf32, #tpu.memory_space<vmem>>, vector<8x256xf32>
      tpu.vector_store %arg7[%c0_264, %c0_265], %612 {strides = array<i32>} : memref<8x256xf32, #tpu.memory_space<vmem>>, vector<8x256xf32>,
    } else {
    }
    %c1_i32_262 = arith.constant 1 : i32
    %616 = arith.cmpi eq, %arg0, %c1_i32_262 : i32
    %617 = arith.extui %616 : i1 to i32
    %c0_i32_263 = arith.constant 0 : i32
    %618 = arith.cmpi ne, %617, %c0_i32_263 : i32
    scf.if %618 {
      %cst_264 = arith.constant -1.000000e+00 : f32
      %cst_265 = arith.constant 1.000000e+00 : f32
      %619 = vector.broadcast %cst_264 : f32 to vector<8x256xf32>
      %620 = arith.maximumf %619, %612 : vector<8x256xf32>
      %621 = vector.broadcast %cst_265 : f32 to vector<8x256xf32>
      %622 = arith.minimumf %621, %620 : vector<8x256xf32>
      %c0_266 = arith.constant 0 : index
      %c0_267 = arith.constant 0 : index
      %623 = vector.load %arg7[%c0_266, %c0_267] : memref<8x256xf32, #tpu.memory_space<vmem>>, vector<8x256xf32>
      tpu.vector_store %arg7[%c0_266, %c0_267], %622 {strides = array<i32>} : memref<8x256xf32, #tpu.memory_space<vmem>>, vector<8x256xf32>,
    } else {
    }
    return
  }
  func.func @transform_0(%arg0: i32) -> i32 {
    %c0_i32 = arith.constant 0 : i32
    %c0_i32_0 = arith.constant 0 : i32
    return %c0_i32 : i32
  }
  func.func @transform_1(%arg0: i32) -> (i32, i32) {
    %c0_i32 = arith.constant 0 : i32
    %c0_i32_0 = arith.constant 0 : i32
    %c0_i32_1 = arith.constant 0 : i32
    return %c0_i32, %c0_i32_0 : i32, i32
  }
  func.func @transform_2(%arg0: i32) -> (i32, i32) {
    %c0_i32 = arith.constant 0 : i32
    %c0_i32_0 = arith.constant 0 : i32
    %c0_i32_1 = arith.constant 0 : i32
    return %c0_i32, %c0_i32_0 : i32, i32
  }
  func.func @transform_3(%arg0: i32) -> (i32, i32, i32) {
    %c0_i32 = arith.constant 0 : i32
    %c0_i32_0 = arith.constant 0 : i32
    %c0_i32_1 = arith.constant 0 : i32
    return %arg0, %c0_i32, %c0_i32_0 : i32, i32, i32
  }
  func.func @transform_4(%arg0: i32) -> (i32, i32, i32) {
    %c0_i32 = arith.constant 0 : i32
    %c0_i32_0 = arith.constant 0 : i32
    %c0_i32_1 = arith.constant 0 : i32
    return %arg0, %c0_i32, %c0_i32_0 : i32, i32, i32
  }
  func.func @transform_5(%arg0: i32) -> (i32, i32, i32) {
    %c0_i32 = arith.constant 0 : i32
    %c0_i32_0 = arith.constant 0 : i32
    %c0_i32_1 = arith.constant 0 : i32
    return %arg0, %c0_i32, %c0_i32_0 : i32, i32, i32
  }
  func.func @transform_6(%arg0: i32) -> (i32, i32) {
    %c0_i32 = arith.constant 0 : i32
    %c0_i32_0 = arith.constant 0 : i32
    %c0_i32_1 = arith.constant 0 : i32
    return %c0_i32, %c0_i32_0 : i32, i32
  }
}

</mosaic_0001>

<bundles_post_ra>
// kernel: tpu_custom_call.1
= control target key start
LH: loop header
LB: loop body
LE: loop exit
PB: predicated region body
PF: predicated region fallthrough
CT: control target
= control target key end

     0   :  { %11 = vsyncpa [#allocation5], 0  ;;  %s10032_s0 = inlined_call_operand.vmem [shape: f32[128], index: 0, kind: input, shape index: {}]   ;;  %s10033_s1 = inlined_call_operand.hbm [shape: f32[8,256], index: 1, kind: input, shape index: {}, may-alias: {1,6}]   ;;  %s10034_s2 = inlined_call_operand.vmem [shape: f32[8,8], index: 2, kind: input, shape index: {}]   ;;  %s10035_s3 = inlined_call_operand.vmem [shape: f32[2,8,16], index: 3, kind: input, shape index: {}]   ;;  %s10036_s4 = inlined_call_operand.vmem [shape: f32[2,8,16], index: 4, kind: input, shape index: {}]   ;;  %s10037_s5 = inlined_call_operand.hbm [shape: f32[32,8,256], index: 5, kind: input, shape index: {}]   ;;  %s10038_s6 = inlined_call_operand.hbm [shape: f32[8,256], index: 6, kind: output, shape index: {}, may-alias: {1,6}]  }
   0x1   :  { %12 = vsyncpa [#allocation3], 0 }
   0x2   :  { %13 = vsyncpa [#allocation8], 0 }
   0x3   :  { %15 = vsyncpa [#allocation8 + $0x1], 0 }
   0x4   :  { %16 = vsyncpa [#allocation4], 0  ;;  %s9347_s21 = smov 0   ;;  %s9349_s22 = smov 0  }
   0x5   :  { %s9351_s23 = smov 0   ;;  %s9353_s24 = smov 0  }
   0x6 LB: > { %s9366_s25 = sadd.s32 4294967295, %s9287_s24   ;;  %s9369_s26 = sadd.s32 1, %s9287_s24   ;;  %s9287_s24 = sphi %s9353_s24, %s10055_s24   ;;  %s9283_s23 = sphi %s9351_s23, %s10054_s23   ;;  %s9279_s22 = sphi %s9349_s22, %s10053_s22   ;;  %s9275_s21 = sphi %s9347_s21, %s10052_s21  }
   0x7   : > { %s141_s27 = ssub.s32 %s9287_s24, %s9369_s26  ;;  %s144_s28 = sadd.s32 1, %s9283_s23 }
   0x8   : > { %p142_p0 = scmp.eq.s32.totalorder %s141_s27, 0  ;;  %p151_p1 = scmp.ne.s32.totalorder %s9283_s23, %s9279_s22 }
   0x9   : > { %p152_p2 = scmp.eq.s32.totalorder %s9287_s24, 0  ;;  %p157_p3 = scmp.ne.s32.totalorder %s9279_s22, %s9275_s21 }
   0xa   : > { %s9379_s29 = scalar_select %p142_p0, %s9283_s23, %s144_s28  }
   0xb   : > { %p9381_p4 = por %p152_p2, %p151_p1  ;;  %p10039_p5 = scmp.eq.s32.totalorder %s9366_s25, 0 }
   0xc   : > { %p8621_p6 = scmp.ge.s32.totalorder %s9287_s24, 1  ;;  %p189_p7 = scmp.lt.s32.totalorder %s9287_s24, 3 }
   0xd   : > { %p9390_p8 = por %p10039_p5, %p157_p3  ;;  %s202_s11 = sshll.u32 %s10032_s0, 4  ;;  %s203_s11 = int_to_ptr.vmem [resolvable:$true] %s202_s11 }
   0xe   : > { %p9395_p10 = pnand %p8621_p6, %p189_p7  ;;  %p8925_p12 = scmp.lt.s32.totalorder %s9287_s24, 2 }
   0xf   : > { %s10042_s7 = scalar_select %p9390_p8, 1, 0 }
  0x10   : > { %p8912_p11 = pneg %p9395_p10  ;;  %s9289_s13 = smov [#allocation6]  }
  0x11   : > { %s213_s14 = sshll.u32 %s9289_s13, 4  ;;  %p9413_p0 = pnand %p8925_p12, %p9381_p4  ;;  %s9417_s14 = int_to_ptr.vmem [resolvable:$true] %s213_s14 }
  0x12   : > { %p9407_p13 = pnand %p8912_p11, %p10039_p5  ;;  %s241_s16 = sand.u32 1, %s9283_s23  }
  0x13   : > { %s9142_s17 = scalar_lea.vmem %s203_s11, 16  ;;  %p9150_p7 = scmp.lt.s32.totalorder %s203_s11, %s203_s11 }
  0x14   : > { %p9143_p1 = scmp.ne.s32.totalorder %s203_s11, %s9142_s17  ;;  %p9144_p2 = pneg %p9407_p13 }
  0x15   : > { %p9151_p11 = scmp.lt.s32.totalorder %s9142_s17, %s9142_s17 }
  0x16   : > { %p9145_p3 = pnand %p9144_p2, %p9143_p1 }
  0x17   : > { %p9152_p9 = por %p9151_p11, %p9150_p7 }
  0x18   : > { %p9146_p6 = pneg %p9145_p3 }
  0x1a   : > { %p9153_p5 = pnand %p9152_p9, %p9146_p6 }
  0x1c   : > { %9156 = shalt.err (!%p9153_p5)
}
  0x1d   : > { %s9290_s18 = smov [#allocation2]   ;;  %s9157_s21 = scalar_lea.hbm %s10033_s1, 256 }
  0x1e   : > { %8915 = dma.vmem_to_smem (!%p9407_p13), %s203_s11, 16, %s9290_s18, [#allocation5]  }
  0x1f   : > { %p9158_p4 = scmp.ne.s32.totalorder %s10033_s1, %s9157_s21  ;;  %p9164_p5 = scmp.lt.u32.totalorder %s9157_s21, %s10033_s1 }
  0x21   : > { %p9160_p12 = pnand %p9158_p4, %p9144_p2 }
  0x23   : > { %p9161_p1 = pneg %p9160_p12 }
  0x25   : > { %p9166_p9 = pnand %p9164_p5, %p9161_p1 }
  0x27   : > { %9169 = shalt.err (!%p9166_p9)
}
  0x28   : > { %s9170_s10 = scalar_lea.vmem %s9417_s14, 256  ;;  %p9178_p11 = scmp.lt.s32.totalorder %s9417_s14, %s9417_s14 }
  0x29   : > { %p9171_p3 = scmp.ne.s32.totalorder %s9417_s14, %s9170_s10  ;;  %p9179_p4 = scmp.lt.s32.totalorder %s9170_s10, %s9170_s10 }
  0x2b   : > { %p9173_p6 = pnand %p9171_p3, %p9144_p2  ;;  %p9180_p12 = por %p9179_p4, %p9178_p11 }
  0x2d   : > { %p9174_p7 = pneg %p9173_p6 }
  0x2f   : > { %p9181_p8 = pnand %p9180_p12, %p9174_p7 }
  0x31   : > { %9184 = shalt.err (!%p9181_p8)
}
  0x32   : > { %8918 = dma.hbm_to_vmem [thread:$0]  (!%p9407_p13), %s10033_s1, 256, %s9417_s14, [#allocation3]  }
  0x33   : > { %s8625_s17 = sshll.u32 %s241_s16, 8  ;;  %s8692_s18 = sshll.u32 %s9287_s24, 12 }
  0x34   : > { %s9458_s21 = scalar_lea.hbm %s10037_s5, %s8692_s18  ;;  %s245_s12 = scalar_lea.vmem [#allocation7], %s8625_s17 }
  0x35   : > { %s253_s27 = sshll.u32 %s245_s12, 4  ;;  %s9464_s28 = scalar_lea.sflag [#allocation8], %s241_s16  ;;  %s9460_s27 = int_to_ptr.vmem [resolvable:$true] %s253_s27 }
  0x36   : > { %s9185_s14 = scalar_lea.hbm %s9458_s21, 4096  ;;  %p9187_p13 = pneg %p9413_p0 }
  0x37   : > { %p9186_p8 = scmp.ne.s32.totalorder %s9458_s21, %s9185_s14  ;;  %s9190_s9 = scalar_lea.hbm %s10037_s5, 8192 }
  0x38   : > { %p9191_p5 = scmp.lt.u32.totalorder %s9458_s21, %s10037_s5  ;;  %p9192_p9 = scmp.lt.u32.totalorder %s9190_s9, %s9185_s14 }
  0x39   : > { %p9188_p2 = pnand %p9187_p13, %p9186_p8  ;;  %p9194_p6 = scmp.lt.u32.totalorder %s9185_s14, %s9458_s21 }
  0x3a   : > { %p9193_p3 = por %p9192_p9, %p9191_p5 }
  0x3b   : > { %p9189_p1 = pneg %p9188_p2 }
  0x3c   : > { %p9195_p7 = por %p9194_p6, %p9193_p3 }
  0x3e   : > { %p9196_p11 = pnand %p9195_p7, %p9189_p1 }
  0x40   : > { %9199 = shalt.err (!%p9196_p11)
}
  0x41   : > { %s9200_s16 = scalar_lea.vmem %s9460_s27, 4096  ;;  %s9291_s13 = smov [#allocation7]  }
  0x42   : > { %p9201_p4 = scmp.ne.s32.totalorder %s9460_s27, %s9200_s16  ;;  %s9205_s17 = sshll.u32 %s9291_s13, 4  ;;  %s9206_s17 = int_to_ptr.vmem [resolvable:$false] %s9205_s17 }
  0x43   : > { %s9207_s18 = scalar_lea.vmem %s9206_s17, 8192  ;;  %p9208_p2 = scmp.lt.s32.totalorder %s9460_s27, %s9206_s17 }
  0x44   : > { %p9203_p12 = pnand %p9201_p4, %p9187_p13  ;;  %p9209_p5 = scmp.lt.s32.totalorder %s9207_s18, %s9200_s16 }
  0x46   : > { %p9204_p8 = pneg %p9203_p12  ;;  %p9210_p9 = por %p9209_p5, %p9208_p2 }
  0x48   : > { %p9211_p3 = pnand %p9210_p9, %p9204_p8 }
  0x4a   : > { %9214 = shalt.err (!%p9211_p3)
}
  0x4b   : > { %s9292_s19 = smov 256   ;;  %s9293_s20 = smov 16  }
  0x4c   : > { %8922 = dma.hbm_to_vmem [thread:$0]  (!%p9413_p0), %s9458_s21, 4096, %s9460_s27, %s9464_s28, %s9292_s19, %s9292_s19, %s9293_s20  }
  0x4d   : > { %265 = sbr.rel (%p9395_p10) target bundleno = 4660 (0x1234), region = 44  ;;  %p10046_p13 = scmp.eq.s32.totalorder (!%p9395_p10), %s9366_s25, 0 }
  0x54   : > { %9258 = dma.done.wait (%p10046_p13), [#allocation5], 16   ;;  %p10047_p1 = pmov %p10046_p13 }
  0x56   : > { %9260 = vsyncadd (%p10047_p1), [#allocation5], 4294967280  ;;  %p10048_p6 = pmov %p10047_p1 }
  0x57   : > { %p10049_p7 = pmov %p10047_p1 }
  0x58   : > { %9262 = dma.done.wait (%p10048_p6), [#allocation3], 256  }
  0x59   : > { %9264 = vsyncadd (%p10049_p7), [#allocation3], 4294967040  ;;  %s275_s12 = sand.u32 1, %s9279_s22   ;;  %p10050_p10 = scmp.ne.s32.totalorder %s10042_s7, 0 }
  0x5a   : > { %s8632_s15 = sshll.u32 %s275_s12, 8  ;;  %s276_s21 = scalar_lea.sflag [#allocation8], %s275_s12 }
  0x5b   : > { %s9503_s27 = scalar_lea.vmem [#allocation7], %s8632_s15 }
  0x5c   : > { %9266 = dma.done.wait (%p10050_p10), %s276_s21, 4096  }
  0x5d   : > { %9268 = vsyncadd (%p10050_p10), %s276_s21, 4294963200 }
  0x5e   : > { %284 = sfence }
  0x5f   : > { %p312_p0 = scmp.lt.s32.totalorder %s9366_s25, 1  ;;  %p10051_p11 = scmp.ne.s32.totalorder %s9366_s25, 0 }
  0x60   : > { %v325_v0 = vld [vmem:[#allocation6] sm:$0xff] (!%p10051_p11)  ;;  %v326_v1 = vld [vmem:[#allocation6 + $0x8] sm:$0xff] (!%p10051_p11) }
  0x61   : > { %s313_s8 = scalar_select %p312_p0, %s9366_s25, 1 }
  0x62   : > { %324 = sbr.rel (%p10051_p11) target bundleno = 105 (0x69), region = 60  ;;  %327 = vst [vmem:[#allocation9] sm:$0xff] (!%p10051_p11), %v325_v0  ;;  %328 = vst [vmem:[#allocation9 + $0x8] sm:$0xff] (!%p10051_p11), %v326_v1 }
  0x63   : > { %s8633_s28 = sshll.u32 %s313_s8, 3 }
  0x64   : > { %s9514_s30 = scalar_lea.vmem %s10035_s3, %s8633_s28  ;;  %s9519_s11 = scalar_lea.vmem %s10036_s4, %s8633_s28 }
  0x69 PF: > { %v9523_v2 = vld [vmem:[#allocation9 + $0x8] sm:$0xff]  ;;  %v9525_v3 = vld [vmem:[#allocation9] sm:$0xff]  ;;  %v331_v4 = vld [vmem:[%s10034_s2] sm:$0xff]  ;;  %vm333_vm0 = vcmask 64512   ;;  %v9294_v7 = vmov 0.0   ;;  %v9295_v11 = vmov 0  }
  0x6a   : > { %v337_v5 = vand.u32 4294901760, %v9523_v2  ;;  %v339_v6 = vand.u32 4294901760, %v9525_v3  ;;  %403 = vmatprep.mubr.f32.mxu0 %v9294_v7  ;;  %v335_v8 = vsel %vm333_vm0, %v331_v4, 0  ;;  %v9534_v9 = vld [vmem:[%s9514_s30] sm:$0xff]  ;;  %917 = vmatprep.mubr.f32.mxu1 %v9294_v7  ;;  %v9296_v25 = vmov 1   ;;  %s9571_s13 = sshll.u32 %s9366_s25, 6 }
  0x6b   : > { %v9537_v10 = vand.u32 4294901760, %v335_v8  ;;  %8984 = vset.pattern.permute.xlu0 %v9295_v11  ;;  %v9546_v15 = vld [vmem:[%s9519_s11] sm:$0xff]  ;;  %8985 = vset.pattern.permute.xlu1 %v9296_v25  ;;  %s829_s17 = sadd.s32 1, %s9571_s13  ;;  %s831_s18 = sadd.s32 2, %s9571_s13  ;;  %v841_v44 = vld [vmem:[%s9503_s27] sm:$0xff]  ;;  %v842_v48 = vld [vmem:[%s9503_s27 + $0x8] sm:$0xff] }
  0x6c   : > { %338 = vmatprep.subr.mxu0 %v337_v5  ;;  %v422_v12 = vsub.f32 %v9525_v3, %v339_v6  ;;  %v416_v13 = vsub.f32 %v9523_v2, %v337_v5  ;;  %805 = vperm.xlu0 %8984, %v9534_v9   ;;  %s828_s19 = sld [smem:[#allocation2 + %s9571_s13]]  ;;  %s8694_s15 = sadd.s32 4, %s9571_s13 }
  0x6d   : > { %340 = vmatpush1.msra.mxu0 %v339_v6  ;;  %v9543_v14 = vsub.f32 %v335_v8, %v9537_v10  ;;  %1317 = vperm.xlu1 %8985, %v9534_v9   ;;  %s830_s20 = sld [smem:[#allocation2 + %s829_s17]]  ;;  %s1339_s21 = sadd.s32 1, %s8694_s15 }
  0x6e   : > { %v417_v16 = vand.u32 4294901760, %v416_v13  ;;  %v423_v17 = vand.u32 4294901760, %v422_v12  ;;  %s832_s12 = sld [smem:[#allocation2 + %s831_s18]]  ;;  %s1341_s8 = sadd.s32 2, %s8694_s15 }
  0x6f   : > { %v9549_v18 = vand.u32 4294901760, %v9543_v14  ;;  %s1338_s28 = sld [smem:[#allocation2 + %s8694_s15]]  ;;  %s8696_s9 = sadd.s32 8, %s9571_s13 }
  0x70   : > { %v418_v19 = vsub.f32 %v416_v13, %v417_v16  ;;  %v424_v20 = vsub.f32 %v422_v12, %v423_v17  ;;  %815 = vperm.xlu0 %8984, %v9546_v15   ;;  %s1340_s14 = sld [smem:[#allocation2 + %s1339_s21]]  ;;  %s1849_s10 = sadd.s32 1, %s8696_s9 }
  0x71   : > { %v407_v21 = vsub.f32 %v9543_v14, %v9549_v18  ;;  %1325 = vperm.xlu1 %8985, %v9546_v15   ;;  %s1342_s24 = sld [smem:[#allocation2 + %s1341_s8]]  ;;  %s1851_s7 = sadd.s32 2, %s8696_s9 }
  0x72   : > { %v419_v22 = vand.u32 4294901760, %v418_v19  ;;  %v425_v23 = vand.u32 4294901760, %v424_v20  ;;  %v833_v36 = vstv %s828_s19  ;;  %s1848_s16 = sld [smem:[#allocation2 + %s8696_s9]]  ;;  %s8698_s19 = sadd.s32 12, %s9571_s13 }
  0x73   : > { %v9554_v24 = vand.u32 4294901760, %v407_v21  ;;  %v836_v41 = vstv %s830_s20  ;;  %v834_v45 = vmul.f32 %v833_v36, %v9525_v3  ;;  %v835_v49 = vmul.f32 %v833_v36, %v9523_v2  ;;  %s1850_s17 = sld [smem:[#allocation2 + %s1849_s10]]  ;;  %s2359_s20 = sadd.s32 1, %s8698_s19 }
  0x74   : > { %420 = vmatprep.subr.mxu0 %v419_v22  ;;  %v843_v43 = vstv %s832_s12  ;;  %s1852_s18 = sld [smem:[#allocation2 + %s1851_s7]]  ;;  %s2361_s12 = sadd.s32 2, %s8698_s19 }
  0x75   : > { %409 = vmatmul.mubr.f32.vlgmr.msra.gmra.mrb[0].mxu0 %v9554_v24  ;;  %v844_v52 = vmul.f32 %v843_v43, %v841_v44  ;;  %v845_v55 = vmul.f32 %v843_v43, %v842_v48  ;;  %s2358_s15 = sld [smem:[#allocation2 + %s8698_s19]]  ;;  %p8683_p4 = scmp.eq.s32.totalorder %s9366_s25, 1 }
  0x76   : > { %426 = vmatpush1.msra.mxu0 %v425_v23  ;;  %489 = vmatprep.mubr.f32.mxu0 %v9294_v7  ;;  %s2360_s21 = sld [smem:[#allocation2 + %s2359_s20]] }
  0x77   : > { %499 = vmatprep.subr.mxu0 %v416_v13  ;;  %s2362_s8 = sld [smem:[#allocation2 + %s2361_s12]] }
  0x7d   : > { %491 = vmatmul.mubr.f32.vlgmr.msra.gmra.mrb[0].mxu0 %v9537_v10 }
  0x7e   : > { %502 = vmatpush1.msra.mxu0 %v422_v12  ;;  %565 = vmatprep.mubr.f32.mxu0 %v9294_v7 }
  0x7f   : > { %575 = vmatprep.subr.mxu0 %v337_v5 }
  0x85   : > { %568 = vmatmul.mubr.f32.vlgmr.msra.gmra.mrb[0].mxu0 %v9543_v14 }
  0x86   : > { %577 = vmatpush1.msra.mxu0 %v339_v6  ;;  %640 = vmatprep.mubr.f32.mxu0 %v9294_v7 }
  0x87   : > { %653 = vmatprep.subr.mxu0 %v417_v16 }
  0x8d   : > { %644 = vmatmul.mubr.f32.vlgmr.msra.gmra.mrb[0].mxu0 %v9549_v18 }
  0x8e   : > { %657 = vmatpush1.msra.mxu0 %v423_v17  ;;  %720 = vmatprep.mubr.f32.mxu0 %v9294_v7 }
  0x8f   : > { %729 = vmatprep.subr.mxu0 %v337_v5  ;;  %v9297_v5 = vmov 2  }
  0x90   : > { %8987 = vset.pattern.permute.xlu1 %v9297_v5  ;;  %8986 = vset.pattern.permute.xlu0 %v9297_v5 }
  0x91   : > { %1835 = vperm.xlu1 %8987, %v9546_v15   ;;  %1827 = vperm.xlu0 %8986, %v9534_v9  }
  0x95   : > { %722 = vmatmul.mubr.f32.vlgmr.msra.gmra.mrb[0].mxu0 %v9537_v10 }
  0x96   : > { %731 = vmatpush1.msra.mxu0 %v339_v6  ;;  %794 = vmatprep.mubr.f32.mxu0 %v9294_v7 }
  0x9d   : > { %796 = vmatmul.mubr.f32.vlgmr.msra.gmra.mrb[0].mxu0 %v9537_v10 }
  0x9e   : > { %1427 = vmatprep.mubr.f32.mxu0 %v9294_v7 }
  0xeb   : > { %v806_v26 = vpop.permute.xlu0 %805 }
  0xec   : > { %v1318_v6 = vpop.permute.xlu1 %1317 }
  0xef   : > { %v816_v27 = vpop.permute.xlu0 %815 }
  0xf0   : > { %v1326_v8 = vpop.permute.xlu1 %1325 }
 0x170   : > { %v797_v28 = vpop.f32.mrb[0].mxu0 }
 0x171   : > { %v808_v29 = vadd.f32 %v806_v26, %v797_v28  ;;  %v818_v30 = vadd.f32 %v816_v27, %v797_v28  ;;  %v799_v31 = vpop.f32.mrb[1].mxu0  ;;  %v1346_v28 = vstv %s1340_s14 }
 0x172   : > { %v809_v32 = vadd.f32 %v806_v26, %v799_v31  ;;  %v819_v33 = vadd.f32 %v816_v27, %v799_v31  ;;  %v1343_v27 = vstv %s1338_s28  ;;  %v8639_v31 = vld [vmem:[%s9503_s27 + $0x10] sm:$0xff]  ;;  %s8700_s28 = sadd.s32 16, %s9571_s13 }
 0x173   : > { %9010 = vtanh.f32 %v808_v29  ;;  %s2869_s14 = sadd.s32 1, %s8700_s28  ;;  %s2868_s9 = sld [smem:[#allocation2 + %s8700_s28]] }
 0x174   : > { %9012 = vtanh.f32 %v818_v30  ;;  %v1354_v30 = vstv %s1342_s24  ;;  %s2871_s24 = sadd.s32 2, %s8700_s28  ;;  %s2870_s10 = sld [smem:[#allocation2 + %s2869_s14]] }
 0x175   : > { %9014 = vtanh.f32 %v809_v32  ;;  %s2872_s7 = sld [smem:[#allocation2 + %s2871_s24]] }
 0x176   : > { %9016 = vtanh.f32 %v819_v33 }
 0x17d   : > { %v9011_v34 = vpop.eup %9010 }
 0x17e   : > { %v9013_v35 = vpop.eup %9012  ;;  %v822_v37 = vmul.f32 2.5, %v9011_v34  ;;  %v8640_v34 = vld [vmem:[%s9503_s27 + $0x18] sm:$0xff] }
 0x17f   : > { %v9015_v38 = vpop.eup %9014  ;;  %v824_v39 = vmul.f32 1.5, %v9013_v35 }
 0x180   : > { %v9017_v40 = vpop.eup %9016  ;;  %v823_v42 = vmul.f32 2.5, %v9015_v38  ;;  %v1355_v38 = vmul.f32 %v8639_v31, %v1354_v30 }
 0x181   : > { %v826_v46 = vsub.f32 %v822_v37, %v824_v39  ;;  %v825_v47 = vmul.f32 1.5, %v9017_v40 }
 0x183   : > { %v837_v50 = vmul.f32 %v836_v41, %v826_v46  ;;  %v827_v51 = vsub.f32 %v823_v42, %v825_v47  ;;  %v1356_v42 = vmul.f32 %v8640_v34, %v1354_v30 }
 0x185   : > { %v839_v53 = vsub.f32 %v834_v45, %v837_v50  ;;  %v838_v54 = vmul.f32 %v836_v41, %v827_v51 }
 0x187   : > { %v840_v56 = vsub.f32 %v835_v49, %v838_v54  ;;  %v9580_v57 = vadd.f32 %v844_v52, %v839_v53 }
 0x189   : > { %v9582_v58 = vadd.f32 %v845_v55, %v840_v56  ;;  %v853_v59 = vand.u32 4294901760, %v9580_v57  ;;  %v1344_v35 = vmul.f32 %v1343_v27, %v9580_v57  ;;  %v9298_v56 = vmov 3  }
 0x18a   : > { %8988 = vset.pattern.permute.xlu1 %v9298_v56  ;;  %8989 = vset.pattern.permute.xlu0 %v9298_v56 }
 0x18b   : > { %v851_v60 = vand.u32 4294901760, %v9582_v58  ;;  %v936_v61 = vsub.f32 %v9580_v57, %v853_v59  ;;  %v1345_v40 = vmul.f32 %v1343_v27, %v9582_v58  ;;  %2337 = vperm.xlu1 %8988, %v9534_v9   ;;  %2345 = vperm.xlu0 %8989, %v9546_v15   ;;  %v1836_v57 = vpop.permute.xlu1 %1835 }
 0x18d   : > { %852 = vmatprep.subr.mxu1 %v851_v60  ;;  %v930_v62 = vsub.f32 %v9582_v58, %v851_v60  ;;  %v937_v63 = vand.u32 4294901760, %v936_v61  ;;  %v1828_v58 = vpop.permute.xlu0 %1827 }
 0x18e   : > { %854 = vmatpush1.msra.mxu1 %v853_v59 }
 0x18f   : > { %923 = vmatmul.mubr.f32.vlgmr.msra.gmra.mrb[0].mxu1 %v9554_v24  ;;  %v931_v0 = vand.u32 4294901760, %v930_v62  ;;  %v938_v1 = vsub.f32 %v936_v61, %v937_v63 }
 0x190   : > { %1003 = vmatprep.mubr.f32.mxu1 %v9294_v7 }
 0x191   : > { %v932_v2 = vsub.f32 %v930_v62, %v931_v0  ;;  %v939_v4 = vand.u32 4294901760, %v938_v1 }
 0x193   : > { %v933_v3 = vand.u32 4294901760, %v932_v2 }
 0x195   : > { %934 = vmatprep.subr.mxu1 %v933_v3 }
 0x196   : > { %940 = vmatpush1.msra.mxu1 %v939_v4 }
 0x197   : > { %1005 = vmatmul.mubr.f32.vlgmr.msra.gmra.mrb[0].mxu1 %v9537_v10  ;;  %1013 = vmatprep.subr.mxu1 %v930_v62 }
 0x198   : > { %1016 = vmatpush1.msra.mxu1 %v936_v61  ;;  %1079 = vmatprep.mubr.f32.mxu1 %v9294_v7 }
 0x199   : > { %1089 = vmatprep.subr.mxu1 %v851_v60 }
 0x19f   : > { %1082 = vmatmul.mubr.f32.vlgmr.msra.gmra.mrb[0].mxu1 %v9543_v14 }
 0x1a0   : > { %1091 = vmatpush1.msra.mxu1 %v853_v59  ;;  %1154 = vmatprep.mubr.f32.mxu1 %v9294_v7 }
 0x1a1   : > { %1167 = vmatprep.subr.mxu1 %v931_v0 }
 0x1a7   : > { %1158 = vmatmul.mubr.f32.vlgmr.msra.gmra.mrb[0].mxu1 %v9549_v18 }
 0x1a8   : > { %1171 = vmatpush1.msra.mxu1 %v937_v63  ;;  %1234 = vmatprep.mubr.f32.mxu1 %v9294_v7 }
 0x1a9   : > { %1243 = vmatprep.subr.mxu1 %v851_v60 }
 0x1af   : > { %1236 = vmatmul.mubr.f32.vlgmr.msra.gmra.mrb[0].mxu1 %v9537_v10 }
 0x1b0   : > { %1245 = vmatpush1.msra.mxu1 %v853_v59  ;;  %1308 = vmatprep.mubr.f32.mxu1 %v9294_v7 }
 0x1b7   : > { %1310 = vmatmul.mubr.f32.vlgmr.msra.gmra.mrb[0].mxu1 %v9537_v10 }
 0x1b8   : > { %1937 = vmatprep.mubr.f32.mxu1 %v9294_v7 }
 0x28a   : > { %v1311_v11 = vpop.f32.mrb[0].mxu1 }
 0x28b   : > { %v1320_v12 = vadd.f32 %v1318_v6, %v1311_v11  ;;  %v1328_v13 = vadd.f32 %v1326_v8, %v1311_v11  ;;  %v1313_v16 = vpop.f32.mrb[1].mxu1  ;;  %v1856_v11 = vstv %s1850_s17 }
 0x28c   : > { %v1321_v17 = vadd.f32 %v1318_v6, %v1313_v16  ;;  %v1329_v19 = vadd.f32 %v1326_v8, %v1313_v16  ;;  %v1853_v8 = vstv %s1848_s16  ;;  %v8642_v16 = vld [vmem:[%s9503_s27 + $0x20] sm:$0xff]  ;;  %s8702_s16 = sadd.s32 20, %s9571_s13 }
 0x28d   : > { %9018 = vtanh.f32 %v1320_v12  ;;  %s3379_s17 = sadd.s32 1, %s8702_s16  ;;  %s3378_s19 = sld [smem:[#allocation2 + %s8702_s16]] }
 0x28e   : > { %9020 = vtanh.f32 %v1328_v13  ;;  %v1864_v13 = vstv %s1852_s18  ;;  %s3381_s18 = sadd.s32 2, %s8702_s16  ;;  %s3380_s20 = sld [smem:[#allocation2 + %s3379_s17]] }
 0x28f   : > { %9022 = vtanh.f32 %v1321_v17  ;;  %s3382_s12 = sld [smem:[#allocation2 + %s3381_s18]] }
 0x290   : > { %9024 = vtanh.f32 %v1329_v19 }
 0x297   : > { %v9019_v20 = vpop.eup %9018 }
 0x298   : > { %v9021_v21 = vpop.eup %9020  ;;  %v1332_v22 = vmul.f32 2.5, %v9019_v20  ;;  %v8643_v20 = vld [vmem:[%s9503_s27 + $0x28] sm:$0xff] }
 0x299   : > { %v9023_v23 = vpop.eup %9022  ;;  %v1334_v25 = vmul.f32 1.5, %v9021_v21 }
 0x29a   : > { %v9025_v26 = vpop.eup %9024  ;;  %v1333_v29 = vmul.f32 2.5, %v9023_v23 }
 0x29b   : > { %v1336_v32 = vsub.f32 %v1332_v22, %v1334_v25  ;;  %v1335_v33 = vmul.f32 1.5, %v9025_v26  ;;  %v1865_v25 = vmul.f32 %v8642_v16, %v1864_v13 }
 0x29d   : > { %v1347_v36 = vmul.f32 %v1346_v28, %v1336_v32  ;;  %v1337_v37 = vsub.f32 %v1333_v29, %v1335_v33  ;;  %v1866_v29 = vmul.f32 %v8643_v20, %v1864_v13 }
 0x29f   : > { %v1349_v39 = vsub.f32 %v1344_v35, %v1347_v36  ;;  %v1348_v41 = vmul.f32 %v1346_v28, %v1337_v37 }
 0x2a1   : > { %v1350_v43 = vsub.f32 %v1345_v40, %v1348_v41  ;;  %v9607_v44 = vadd.f32 %v1355_v38, %v1349_v39 }
 0x2a3   : > { %v9609_v45 = vadd.f32 %v1356_v42, %v1350_v43  ;;  %v1363_v46 = vand.u32 4294901760, %v9607_v44  ;;  %v1854_v21 = vmul.f32 %v1853_v8, %v9607_v44  ;;  %v9299_v43 = vmov 4  }
 0x2a4   : > { %8990 = vset.pattern.permute.xlu1 %v9299_v43 }
 0x2a5   : > { %v1361_v47 = vand.u32 4294901760, %v9609_v45  ;;  %v1446_v48 = vsub.f32 %v9607_v44, %v1363_v46  ;;  %v1855_v27 = vmul.f32 %v1853_v8, %v9609_v45  ;;  %2847 = vperm.xlu1 %8990, %v9534_v9   ;;  %v2338_v44 = vpop.permute.xlu1 %2337 }
 0x2a7   : > { %1362 = vmatprep.subr.mxu0 %v1361_v47  ;;  %v1440_v49 = vsub.f32 %v9609_v45, %v1361_v47  ;;  %v1447_v50 = vand.u32 4294901760, %v1446_v48  ;;  %v2346_v45 = vpop.permute.xlu0 %2345 }
 0x2a8   : > { %1364 = vmatpush1.msra.mxu0 %v1363_v46 }
 0x2a9   : > { %1433 = vmatmul.mubr.f32.vlgmr.msra.gmra.mrb[2].mxu0 %v9554_v24  ;;  %v1441_v51 = vand.u32 4294901760, %v1440_v49  ;;  %v1448_v52 = vsub.f32 %v1446_v48, %v1447_v50  ;;  %2855 = vperm.xlu1 %8990, %v9546_v15  }
 0x2aa   : > { %1513 = vmatprep.mubr.f32.mxu0 %v9294_v7 }
 0x2ab   : > { %v1442_v53 = vsub.f32 %v1440_v49, %v1441_v51  ;;  %v1449_v55 = vand.u32 4294901760, %v1448_v52 }
 0x2ad   : > { %v1443_v54 = vand.u32 4294901760, %v1442_v53 }
 0x2af   : > { %1444 = vmatprep.subr.mxu0 %v1443_v54 }
 0x2b0   : > { %1450 = vmatpush1.msra.mxu0 %v1449_v55 }
 0x2b1   : > { %1515 = vmatmul.mubr.f32.vlgmr.msra.gmra.mrb[2].mxu0 %v9537_v10  ;;  %1523 = vmatprep.subr.mxu0 %v1440_v49 }
 0x2b2   : > { %1526 = vmatpush1.msra.mxu0 %v1446_v48  ;;  %1589 = vmatprep.mubr.f32.mxu0 %v9294_v7 }
 0x2b3   : > { %1599 = vmatprep.subr.mxu0 %v1361_v47 }
 0x2b9   : > { %1592 = vmatmul.mubr.f32.vlgmr.msra.gmra.mrb[2].mxu0 %v9543_v14 }
 0x2ba   : > { %1601 = vmatpush1.msra.mxu0 %v1363_v46  ;;  %1664 = vmatprep.mubr.f32.mxu0 %v9294_v7 }
 0x2bb   : > { %1677 = vmatprep.subr.mxu0 %v1441_v51 }
 0x2c1   : > { %1668 = vmatmul.mubr.f32.vlgmr.msra.gmra.mrb[2].mxu0 %v9549_v18 }
 0x2c2   : > { %1681 = vmatpush1.msra.mxu0 %v1447_v50  ;;  %1744 = vmatprep.mubr.f32.mxu0 %v9294_v7 }
 0x2c3   : > { %1753 = vmatprep.subr.mxu0 %v1361_v47 }
 0x2c9   : > { %1746 = vmatmul.mubr.f32.vlgmr.msra.gmra.mrb[2].mxu0 %v9537_v10 }
 0x2ca   : > { %1755 = vmatpush1.msra.mxu0 %v1363_v46  ;;  %1818 = vmatprep.mubr.f32.mxu0 %v9294_v7 }
 0x2d1   : > { %1820 = vmatmul.mubr.f32.vlgmr.msra.gmra.mrb[2].mxu0 %v9537_v10 }
 0x2d2   : > { %2447 = vmatprep.mubr.f32.mxu0 %v9294_v7 }
 0x3a4   : > { %v1821_v59 = vpop.f32.mrb[2].mxu0 }
 0x3a5   : > { %v1830_v60 = vadd.f32 %v1828_v58, %v1821_v59  ;;  %v1838_v61 = vadd.f32 %v1836_v57, %v1821_v59  ;;  %v1823_v62 = vpop.f32.mrb[3].mxu0  ;;  %v2366_v59 = vstv %s2360_s21 }
 0x3a6   : > { %v1831_v63 = vadd.f32 %v1828_v58, %v1823_v62  ;;  %v1839_v0 = vadd.f32 %v1836_v57, %v1823_v62  ;;  %v2363_v58 = vstv %s2358_s15  ;;  %v8645_v62 = vld [vmem:[%s9503_s27 + $0x30] sm:$0xff]  ;;  %s8704_s15 = sadd.s32 24, %s9571_s13 }
 0x3a7   : > { %9026 = vtanh.f32 %v1830_v60  ;;  %s3889_s21 = sadd.s32 1, %s8704_s15  ;;  %s3888_s28 = sld [smem:[#allocation2 + %s8704_s15]] }
 0x3a8   : > { %9028 = vtanh.f32 %v1838_v61  ;;  %v2374_v61 = vstv %s2362_s8  ;;  %s3891_s8 = sadd.s32 2, %s8704_s15  ;;  %s3890_s14 = sld [smem:[#allocation2 + %s3889_s21]] }
 0x3a9   : > { %9030 = vtanh.f32 %v1831_v63  ;;  %s3892_s24 = sld [smem:[#allocation2 + %s3891_s8]] }
 0x3aa   : > { %9032 = vtanh.f32 %v1839_v0 }
 0x3b1   : > { %v9027_v1 = vpop.eup %9026 }
 0x3b2   : > { %v9029_v2 = vpop.eup %9028  ;;  %v1842_v3 = vmul.f32 2.5, %v9027_v1  ;;  %v8646_v1 = vld [vmem:[%s9503_s27 + $0x38] sm:$0xff] }
 0x3b3   : > { %v9031_v4 = vpop.eup %9030  ;;  %v1844_v5 = vmul.f32 1.5, %v9029_v2 }
 0x3b4   : > { %v9033_v6 = vpop.eup %9032  ;;  %v1843_v12 = vmul.f32 2.5, %v9031_v4 }
 0x3b5   : > { %v1846_v17 = vsub.f32 %v1842_v3, %v1844_v5  ;;  %v1845_v19 = vmul.f32 1.5, %v9033_v6  ;;  %v2375_v5 = vmul.f32 %v8645_v62, %v2374_v61 }
 0x3b7   : > { %v1857_v22 = vmul.f32 %v1856_v11, %v1846_v17  ;;  %v1847_v23 = vsub.f32 %v1843_v12, %v1845_v19  ;;  %v2376_v12 = vmul.f32 %v8646_v1, %v2374_v61 }
 0x3b9   : > { %v1859_v26 = vsub.f32 %v1854_v21, %v1857_v22  ;;  %v1858_v28 = vmul.f32 %v1856_v11, %v1847_v23 }
 0x3bb   : > { %v1860_v30 = vsub.f32 %v1855_v27, %v1858_v28  ;;  %v9634_v31 = vadd.f32 %v1865_v25, %v1859_v26 }
 0x3bd   : > { %v9636_v32 = vadd.f32 %v1866_v29, %v1860_v30  ;;  %v1873_v33 = vand.u32 4294901760, %v9634_v31  ;;  %v2364_v2 = vmul.f32 %v2363_v58, %v9634_v31  ;;  %v9300_v30 = vmov 5  }
 0x3be   : > { %8992 = vset.pattern.permute.xlu1 %v9300_v30  ;;  %8991 = vset.pattern.permute.xlu0 %v9300_v30  ;;  %v3383_v30 = vstv %s3378_s19  ;;  %s8708_s19 = sadd.s32 32, %s9571_s13 }
 0x3bf   : > { %v1871_v34 = vand.u32 4294901760, %v9636_v32  ;;  %v1956_v35 = vsub.f32 %v9634_v31, %v1873_v33  ;;  %v2365_v8 = vmul.f32 %v2363_v58, %v9636_v32  ;;  %3365 = vperm.xlu1 %8992, %v9546_v15   ;;  %3357 = vperm.xlu0 %8991, %v9534_v9   ;;  %v2848_v31 = vpop.permute.xlu1 %2847  ;;  %s4908_s15 = sld [smem:[#allocation2 + %s8708_s19]] }
 0x3c1   : > { %1872 = vmatprep.subr.mxu1 %v1871_v34  ;;  %v1950_v36 = vsub.f32 %v9636_v32, %v1871_v34  ;;  %v1957_v37 = vand.u32 4294901760, %v1956_v35 }
 0x3c2   : > { %1874 = vmatpush1.msra.mxu1 %v1873_v33 }
 0x3c3   : > { %1943 = vmatmul.mubr.f32.vlgmr.msra.gmra.mrb[2].mxu1 %v9554_v24  ;;  %v1951_v38 = vand.u32 4294901760, %v1950_v36  ;;  %v1958_v39 = vsub.f32 %v1956_v35, %v1957_v37  ;;  %v2856_v32 = vpop.permute.xlu1 %2855 }
 0x3c4   : > { %2023 = vmatprep.mubr.f32.mxu1 %v9294_v7 }
 0x3c5   : > { %v1952_v40 = vsub.f32 %v1950_v36, %v1951_v38  ;;  %v1959_v42 = vand.u32 4294901760, %v1958_v39 }
 0x3c7   : > { %v1953_v41 = vand.u32 4294901760, %v1952_v40 }
 0x3c9   : > { %1954 = vmatprep.subr.mxu1 %v1953_v41 }
 0x3ca   : > { %1960 = vmatpush1.msra.mxu1 %v1959_v42 }
 0x3cb   : > { %2025 = vmatmul.mubr.f32.vlgmr.msra.gmra.mrb[2].mxu1 %v9537_v10  ;;  %2033 = vmatprep.subr.mxu1 %v1950_v36 }
 0x3cc   : > { %2036 = vmatpush1.msra.mxu1 %v1956_v35  ;;  %2099 = vmatprep.mubr.f32.mxu1 %v9294_v7 }
 0x3cd   : > { %2109 = vmatprep.subr.mxu1 %v1871_v34 }
 0x3d3   : > { %2102 = vmatmul.mubr.f32.vlgmr.msra.gmra.mrb[2].mxu1 %v9543_v14 }
 0x3d4   : > { %2111 = vmatpush1.msra.mxu1 %v1873_v33  ;;  %2174 = vmatprep.mubr.f32.mxu1 %v9294_v7 }
 0x3d5   : > { %2187 = vmatprep.subr.mxu1 %v1951_v38 }
 0x3db   : > { %2178 = vmatmul.mubr.f32.vlgmr.msra.gmra.mrb[2].mxu1 %v9549_v18 }
 0x3dc   : > { %2191 = vmatpush1.msra.mxu1 %v1957_v37  ;;  %2254 = vmatprep.mubr.f32.mxu1 %v9294_v7 }
 0x3dd   : > { %2263 = vmatprep.subr.mxu1 %v1871_v34 }
 0x3e3   : > { %2256 = vmatmul.mubr.f32.vlgmr.msra.gmra.mrb[2].mxu1 %v9537_v10 }
 0x3e4   : > { %2265 = vmatpush1.msra.mxu1 %v1873_v33  ;;  %2328 = vmatprep.mubr.f32.mxu1 %v9294_v7 }
 0x3eb   : > { %2330 = vmatmul.mubr.f32.vlgmr.msra.gmra.mrb[2].mxu1 %v9537_v10 }
 0x3ec   : > { %2957 = vmatprep.mubr.f32.mxu1 %v9294_v7 }
 0x4be   : > { %v2331_v46 = vpop.f32.mrb[2].mxu1 }
 0x4bf   : > { %v2340_v47 = vadd.f32 %v2338_v44, %v2331_v46  ;;  %v2348_v48 = vadd.f32 %v2346_v45, %v2331_v46  ;;  %v2333_v49 = vpop.f32.mrb[3].mxu1  ;;  %v2876_v46 = vstv %s2870_s10 }
 0x4c0   : > { %v2341_v50 = vadd.f32 %v2338_v44, %v2333_v49  ;;  %v2349_v51 = vadd.f32 %v2346_v45, %v2333_v49  ;;  %v2873_v45 = vstv %s2868_s9  ;;  %v8648_v49 = vld [vmem:[%s9503_s27 + $0x40] sm:$0xff]  ;;  %s8706_s9 = sadd.s32 28, %s9571_s13 }
 0x4c1   : > { %9034 = vtanh.f32 %v2340_v47  ;;  %s4399_s10 = sadd.s32 1, %s8706_s9  ;;  %s4398_s16 = sld [smem:[#allocation2 + %s8706_s9]] }
 0x4c2   : > { %9036 = vtanh.f32 %v2348_v48  ;;  %v2884_v48 = vstv %s2872_s7  ;;  %s4401_s7 = sadd.s32 2, %s8706_s9  ;;  %s4400_s17 = sld [smem:[#allocation2 + %s4399_s10]] }
 0x4c3   : > { %9038 = vtanh.f32 %v2341_v50  ;;  %s4402_s18 = sld [smem:[#allocation2 + %s4401_s7]] }
 0x4c4   : > { %9040 = vtanh.f32 %v2349_v51 }
 0x4cb   : > { %v9035_v52 = vpop.eup %9034 }
 0x4cc   : > { %v9037_v53 = vpop.eup %9036  ;;  %v2352_v54 = vmul.f32 2.5, %v9035_v52  ;;  %v8649_v52 = vld [vmem:[%s9503_s27 + $0x48] sm:$0xff] }
 0x4cd   : > { %v9039_v55 = vpop.eup %9038  ;;  %v2354_v56 = vmul.f32 1.5, %v9037_v53 }
 0x4ce   : > { %v9041_v57 = vpop.eup %9040  ;;  %v2353_v60 = vmul.f32 2.5, %v9039_v55 }
 0x4cf   : > { %v2356_v63 = vsub.f32 %v2352_v54, %v2354_v56  ;;  %v2355_v0 = vmul.f32 1.5, %v9041_v57  ;;  %v2885_v56 = vmul.f32 %v8648_v49, %v2884_v48 }
 0x4d1   : > { %v2367_v3 = vmul.f32 %v2366_v59, %v2356_v63  ;;  %v2357_v4 = vsub.f32 %v2353_v60, %v2355_v0  ;;  %v2886_v60 = vmul.f32 %v8649_v52, %v2884_v48 }
 0x4d3   : > { %v2369_v6 = vsub.f32 %v2364_v2, %v2367_v3  ;;  %v2368_v11 = vmul.f32 %v2366_v59, %v2357_v4 }
 0x4d5   : > { %v2370_v13 = vsub.f32 %v2365_v8, %v2368_v11  ;;  %v9661_v16 = vadd.f32 %v2375_v5, %v2369_v6 }
 0x4d7   : > { %v9663_v17 = vadd.f32 %v2376_v12, %v2370_v13  ;;  %v2383_v19 = vand.u32 4294901760, %v9661_v16  ;;  %v2874_v53 = vmul.f32 %v2873_v45, %v9661_v16  ;;  %v9301_v13 = vmov 6  }
 0x4d8   : > { %8993 = vset.pattern.permute.xlu1 %v9301_v13  ;;  %8994 = vset.pattern.permute.xlu0 %v9301_v13 }
 0x4d9   : > { %v2381_v20 = vand.u32 4294901760, %v9663_v17  ;;  %v2466_v21 = vsub.f32 %v9661_v16, %v2383_v19  ;;  %v2875_v58 = vmul.f32 %v2873_v45, %v9663_v17  ;;  %3867 = vperm.xlu1 %8993, %v9534_v9   ;;  %3875 = vperm.xlu0 %8994, %v9546_v15   ;;  %v3366_v16 = vpop.permute.xlu1 %3365 }
 0x4db   : > { %2382 = vmatprep.subr.mxu0 %v2381_v20  ;;  %v2460_v22 = vsub.f32 %v9663_v17, %v2381_v20  ;;  %v2467_v23 = vand.u32 4294901760, %v2466_v21  ;;  %v3358_v17 = vpop.permute.xlu0 %3357 }
 0x4dc   : > { %2384 = vmatpush1.msra.mxu0 %v2383_v19 }
 0x4dd   : > { %2453 = vmatmul.mubr.f32.vlgmr.msra.gmra.mrb[4].mxu0 %v9554_v24  ;;  %v2461_v25 = vand.u32 4294901760, %v2460_v22  ;;  %v2468_v26 = vsub.f32 %v2466_v21, %v2467_v23 }
 0x4de   : > { %2533 = vmatprep.mubr.f32.mxu0 %v9294_v7 }
 0x4df   : > { %v2462_v27 = vsub.f32 %v2460_v22, %v2461_v25  ;;  %v2469_v29 = vand.u32 4294901760, %v2468_v26 }
 0x4e1   : > { %v2463_v28 = vand.u32 4294901760, %v2462_v27 }
 0x4e3   : > { %2464 = vmatprep.subr.mxu0 %v2463_v28 }
 0x4e4   : > { %2470 = vmatpush1.msra.mxu0 %v2469_v29 }
 0x4e5   : > { %2535 = vmatmul.mubr.f32.vlgmr.msra.gmra.mrb[4].mxu0 %v9537_v10  ;;  %2543 = vmatprep.subr.mxu0 %v2460_v22 }
 0x4e6   : > { %2546 = vmatpush1.msra.mxu0 %v2466_v21  ;;  %2609 = vmatprep.mubr.f32.mxu0 %v9294_v7 }
 0x4e7   : > { %2619 = vmatprep.subr.mxu0 %v2381_v20 }
 0x4ed   : > { %2612 = vmatmul.mubr.f32.vlgmr.msra.gmra.mrb[4].mxu0 %v9543_v14 }
 0x4ee   : > { %2621 = vmatpush1.msra.mxu0 %v2383_v19  ;;  %2684 = vmatprep.mubr.f32.mxu0 %v9294_v7 }
 0x4ef   : > { %2697 = vmatprep.subr.mxu0 %v2461_v25 }
 0x4f5   : > { %2688 = vmatmul.mubr.f32.vlgmr.msra.gmra.mrb[4].mxu0 %v9549_v18 }
 0x4f6   : > { %2701 = vmatpush1.msra.mxu0 %v2467_v23  ;;  %2764 = vmatprep.mubr.f32.mxu0 %v9294_v7 }
 0x4f7   : > { %2773 = vmatprep.subr.mxu0 %v2381_v20 }
 0x4fd   : > { %2766 = vmatmul.mubr.f32.vlgmr.msra.gmra.mrb[4].mxu0 %v9537_v10 }
 0x4fe   : > { %2775 = vmatpush1.msra.mxu0 %v2383_v19  ;;  %2838 = vmatprep.mubr.f32.mxu0 %v9294_v7 }
 0x505   : > { %2840 = vmatmul.mubr.f32.vlgmr.msra.gmra.mrb[4].mxu0 %v9537_v10 }
 0x506   : > { %3467 = vmatprep.mubr.f32.mxu0 %v9294_v7 }
 0x5d8   : > { %v2841_v33 = vpop.f32.mrb[4].mxu0 }
 0x5d9   : > { %v2850_v34 = vadd.f32 %v2848_v31, %v2841_v33  ;;  %v2858_v35 = vadd.f32 %v2856_v32, %v2841_v33  ;;  %v2843_v36 = vpop.f32.mrb[5].mxu0  ;;  %v3394_v33 = vstv %s3382_s12  ;;  %s4911_s12 = sadd.s32 2, %s8708_s19 }
 0x5da   : > { %v2851_v37 = vadd.f32 %v2848_v31, %v2843_v36  ;;  %v2859_v38 = vadd.f32 %v2856_v32, %v2843_v36  ;;  %v3386_v31 = vstv %s3380_s20  ;;  %s4909_s20 = sadd.s32 1, %s8708_s19  ;;  %s4912_s8 = sld [smem:[#allocation2 + %s4911_s12]] }
 0x5db   : > { %9042 = vtanh.f32 %v2850_v34  ;;  %v8651_v34 = vld [vmem:[%s9503_s27 + $0x50] sm:$0xff]  ;;  %s4910_s21 = sld [smem:[#allocation2 + %s4909_s20]] }
 0x5dc   : > { %9044 = vtanh.f32 %v2858_v35 }
 0x5dd   : > { %9046 = vtanh.f32 %v2851_v37  ;;  %v8652_v37 = vld [vmem:[%s9503_s27 + $0x58] sm:$0xff] }
 0x5de   : > { %9048 = vtanh.f32 %v2859_v38  ;;  %v3396_v45 = vmul.f32 %v8652_v37, %v3394_v33 }
 0x5e5   : > { %v9043_v39 = vpop.eup %9042 }
 0x5e6   : > { %v9045_v40 = vpop.eup %9044  ;;  %v2862_v41 = vmul.f32 2.5, %v9043_v39 }
 0x5e7   : > { %v9047_v42 = vpop.eup %9046  ;;  %v2864_v43 = vmul.f32 1.5, %v9045_v40 }
 0x5e8   : > { %v9049_v44 = vpop.eup %9048  ;;  %v2863_v47 = vmul.f32 2.5, %v9047_v42 }
 0x5e9   : > { %v2866_v50 = vsub.f32 %v2862_v41, %v2864_v43  ;;  %v2865_v51 = vmul.f32 1.5, %v9049_v44  ;;  %v3395_v41 = vmul.f32 %v8651_v34, %v3394_v33 }
 0x5eb   : > { %v2877_v54 = vmul.f32 %v2876_v46, %v2866_v50  ;;  %v2867_v55 = vsub.f32 %v2863_v47, %v2865_v51 }
 0x5ed   : > { %v2879_v57 = vsub.f32 %v2874_v53, %v2877_v54  ;;  %v2878_v59 = vmul.f32 %v2876_v46, %v2867_v55 }
 0x5ef   : > { %v2880_v61 = vsub.f32 %v2875_v58, %v2878_v59  ;;  %v9688_v62 = vadd.f32 %v2885_v56, %v2879_v57  ;;  %v9302_v59 = vmov 7  }
 0x5f0   : > { %8995 = vset.pattern.permute.xlu1 %v9302_v59 }
 0x5f1   : > { %v9690_v63 = vadd.f32 %v2886_v60, %v2880_v61  ;;  %v2893_v0 = vand.u32 4294901760, %v9688_v62  ;;  %v3384_v38 = vmul.f32 %v3383_v30, %v9688_v62  ;;  %v9736_v60 = vld [vmem:[%s9514_s30] sm:$0xff] }
 0x5f2   : > { %4377 = vperm.xlu1 %8995, %v9736_v60   ;;  %v9740_v61 = vld [vmem:[%s9519_s11] sm:$0xff] }
 0x5f3   : > { %v2891_v1 = vand.u32 4294901760, %v9690_v63  ;;  %v2976_v2 = vsub.f32 %v9688_v62, %v2893_v0  ;;  %v3385_v43 = vmul.f32 %v3383_v30, %v9690_v63  ;;  %v3868_v62 = vpop.permute.xlu1 %3867 }
 0x5f5   : > { %2892 = vmatprep.subr.mxu1 %v2891_v1  ;;  %v2970_v3 = vsub.f32 %v9690_v63, %v2891_v1  ;;  %v2977_v4 = vand.u32 4294901760, %v2976_v2  ;;  %v3876_v63 = vpop.permute.xlu0 %3875 }
 0x5f6   : > { %2894 = vmatpush1.msra.mxu1 %v2893_v0  ;;  %4385 = vperm.xlu1 %8995, %v9740_v61  }
 0x5f7   : > { %2963 = vmatmul.mubr.f32.vlgmr.msra.gmra.mrb[4].mxu1 %v9554_v24  ;;  %v2971_v5 = vand.u32 4294901760, %v2970_v3  ;;  %v2978_v6 = vsub.f32 %v2976_v2, %v2977_v4 }
 0x5f8   : > { %3043 = vmatprep.mubr.f32.mxu1 %v9294_v7 }
 0x5f9   : > { %v2972_v8 = vsub.f32 %v2970_v3, %v2971_v5  ;;  %v2979_v12 = vand.u32 4294901760, %v2978_v6 }
 0x5fb   : > { %v2973_v11 = vand.u32 4294901760, %v2972_v8 }
 0x5fd   : > { %2974 = vmatprep.subr.mxu1 %v2973_v11 }
 0x5fe   : > { %2980 = vmatpush1.msra.mxu1 %v2979_v12 }
 0x5ff   : > { %3045 = vmatmul.mubr.f32.vlgmr.msra.gmra.mrb[4].mxu1 %v9537_v10  ;;  %3053 = vmatprep.subr.mxu1 %v2970_v3 }
 0x600   : > { %3056 = vmatpush1.msra.mxu1 %v2976_v2  ;;  %3119 = vmatprep.mubr.f32.mxu1 %v9294_v7 }
 0x601   : > { %3129 = vmatprep.subr.mxu1 %v2891_v1 }
 0x607   : > { %3122 = vmatmul.mubr.f32.vlgmr.msra.gmra.mrb[4].mxu1 %v9543_v14 }
 0x608   : > { %3131 = vmatpush1.msra.mxu1 %v2893_v0  ;;  %3194 = vmatprep.mubr.f32.mxu1 %v9294_v7 }
 0x609   : > { %3207 = vmatprep.subr.mxu1 %v2971_v5 }
 0x60f   : > { %3198 = vmatmul.mubr.f32.vlgmr.msra.gmra.mrb[4].mxu1 %v9549_v18 }
 0x610   : > { %3211 = vmatpush1.msra.mxu1 %v2977_v4  ;;  %3274 = vmatprep.mubr.f32.mxu1 %v9294_v7 }
 0x611   : > { %3283 = vmatprep.subr.mxu1 %v2891_v1 }
 0x617   : > { %3276 = vmatmul.mubr.f32.vlgmr.msra.gmra.mrb[4].mxu1 %v9537_v10 }
 0x618   : > { %3285 = vmatpush1.msra.mxu1 %v2893_v0  ;;  %3348 = vmatprep.mubr.f32.mxu1 %v9294_v7 }
 0x61f   : > { %3350 = vmatmul.mubr.f32.vlgmr.msra.gmra.mrb[4].mxu1 %v9537_v10 }
 0x620   : > { %3977 = vmatprep.mubr.f32.mxu1 %v9294_v7 }
 0x6f2   : > { %v3351_v19 = vpop.f32.mrb[4].mxu1 }
 0x6f3   : > { %v3360_v20 = vadd.f32 %v3358_v17, %v3351_v19  ;;  %v3368_v21 = vadd.f32 %v3366_v16, %v3351_v19  ;;  %v3353_v22 = vpop.f32.mrb[5].mxu1  ;;  %v3896_v19 = vstv %s3890_s14 }
 0x6f4   : > { %v3361_v23 = vadd.f32 %v3358_v17, %v3353_v22  ;;  %v3369_v25 = vadd.f32 %v3366_v16, %v3353_v22  ;;  %v3893_v17 = vstv %s3888_s28  ;;  %v8654_v22 = vld [vmem:[%s9503_s27 + $0x60] sm:$0xff]  ;;  %s8710_s28 = sadd.s32 36, %s9571_s13 }
 0x6f5   : > { %9050 = vtanh.f32 %v3360_v20  ;;  %s5419_s14 = sadd.s32 1, %s8710_s28  ;;  %s5418_s9 = sld [smem:[#allocation2 + %s8710_s28]] }
 0x6f6   : > { %9052 = vtanh.f32 %v3368_v21  ;;  %v3904_v21 = vstv %s3892_s24  ;;  %s5421_s24 = sadd.s32 2, %s8710_s28  ;;  %s5420_s10 = sld [smem:[#allocation2 + %s5419_s14]] }
 0x6f7   : > { %9054 = vtanh.f32 %v3361_v23  ;;  %s5422_s7 = sld [smem:[#allocation2 + %s5421_s24]] }
 0x6f8   : > { %9056 = vtanh.f32 %v3369_v25 }
 0x6ff   : > { %v9051_v9 = vpop.eup %9050 }
 0x700   : > { %v9053_v15 = vpop.eup %9052  ;;  %v3372_v26 = vmul.f32 2.5, %v9051_v9  ;;  %v8655_v9 = vld [vmem:[%s9503_s27 + $0x68] sm:$0xff] }
 0x701   : > { %v9055_v27 = vpop.eup %9054  ;;  %v3374_v28 = vmul.f32 1.5, %v9053_v15 }
 0x702   : > { %v9057_v29 = vpop.eup %9056  ;;  %v3373_v32 = vmul.f32 2.5, %v9055_v27 }
 0x703   : > { %v3376_v35 = vsub.f32 %v3372_v26, %v3374_v28  ;;  %v3375_v36 = vmul.f32 1.5, %v9057_v29  ;;  %v3905_v28 = vmul.f32 %v8654_v22, %v3904_v21 }
 0x705   : > { %v3387_v39 = vmul.f32 %v3386_v31, %v3376_v35  ;;  %v3377_v40 = vsub.f32 %v3373_v32, %v3375_v36  ;;  %v3906_v32 = vmul.f32 %v8655_v9, %v3904_v21 }
 0x707   : > { %v3389_v42 = vsub.f32 %v3384_v38, %v3387_v39  ;;  %v3388_v44 = vmul.f32 %v3386_v31, %v3377_v40 }
 0x709   : > { %v3390_v46 = vsub.f32 %v3385_v43, %v3388_v44  ;;  %v9715_v47 = vadd.f32 %v3395_v41, %v3389_v42 }
 0x70b   : > { %v9717_v48 = vadd.f32 %v3396_v45, %v3390_v46  ;;  %v3403_v49 = vand.u32 4294901760, %v9715_v47  ;;  %v3894_v15 = vmul.f32 %v3893_v17, %v9715_v47  ;;  %v9303_v46 = vmov 8  }
 0x70c   : > { %8997 = vset.pattern.permute.xlu1 %v9303_v46  ;;  %8996 = vset.pattern.permute.xlu0 %v9303_v46 }
 0x70d   : > { %v3401_v50 = vand.u32 4294901760, %v9717_v48  ;;  %v3486_v51 = vsub.f32 %v9715_v47, %v3403_v49  ;;  %v3895_v30 = vmul.f32 %v3893_v17, %v9717_v48  ;;  %4895 = vperm.xlu1 %8997, %v9740_v61   ;;  %4887 = vperm.xlu0 %8996, %v9736_v60   ;;  %v4378_v47 = vpop.permute.xlu1 %4377 }
 0x70f   : > { %3402 = vmatprep.subr.mxu0 %v3401_v50  ;;  %v3480_v52 = vsub.f32 %v9717_v48, %v3401_v50  ;;  %v3487_v53 = vand.u32 4294901760, %v3486_v51 }
 0x710   : > { %3404 = vmatpush1.msra.mxu0 %v3403_v49 }
 0x711   : > { %3473 = vmatmul.mubr.f32.vlgmr.msra.gmra.mrb[6].mxu0 %v9554_v24  ;;  %v3481_v54 = vand.u32 4294901760, %v3480_v52  ;;  %v3488_v55 = vsub.f32 %v3486_v51, %v3487_v53  ;;  %v4386_v48 = vpop.permute.xlu1 %4385 }
 0x712   : > { %3553 = vmatprep.mubr.f32.mxu0 %v9294_v7 }
 0x713   : > { %v3482_v56 = vsub.f32 %v3480_v52, %v3481_v54  ;;  %v3489_v58 = vand.u32 4294901760, %v3488_v55 }
 0x715   : > { %v3483_v57 = vand.u32 4294901760, %v3482_v56 }
 0x717   : > { %3484 = vmatprep.subr.mxu0 %v3483_v57 }
 0x718   : > { %3490 = vmatpush1.msra.mxu0 %v3489_v58 }
 0x719   : > { %3555 = vmatmul.mubr.f32.vlgmr.msra.gmra.mrb[6].mxu0 %v9537_v10  ;;  %3563 = vmatprep.subr.mxu0 %v3480_v52 }
 0x71a   : > { %3566 = vmatpush1.msra.mxu0 %v3486_v51  ;;  %3629 = vmatprep.mubr.f32.mxu0 %v9294_v7 }
 0x71b   : > { %3639 = vmatprep.subr.mxu0 %v3401_v50 }
 0x721   : > { %3632 = vmatmul.mubr.f32.vlgmr.msra.gmra.mrb[6].mxu0 %v9543_v14 }
 0x722   : > { %3641 = vmatpush1.msra.mxu0 %v3403_v49  ;;  %3704 = vmatprep.mubr.f32.mxu0 %v9294_v7 }
 0x723   : > { %3717 = vmatprep.subr.mxu0 %v3481_v54 }
 0x729   : > { %3708 = vmatmul.mubr.f32.vlgmr.msra.gmra.mrb[6].mxu0 %v9549_v18 }
 0x72a   : > { %3721 = vmatpush1.msra.mxu0 %v3487_v53  ;;  %3784 = vmatprep.mubr.f32.mxu0 %v9294_v7 }
 0x72b   : > { %3793 = vmatprep.subr.mxu0 %v3401_v50 }
 0x731   : > { %3786 = vmatmul.mubr.f32.vlgmr.msra.gmra.mrb[6].mxu0 %v9537_v10 }
 0x732   : > { %3795 = vmatpush1.msra.mxu0 %v3403_v49  ;;  %3858 = vmatprep.mubr.f32.mxu0 %v9294_v7 }
 0x739   : > { %3860 = vmatmul.mubr.f32.vlgmr.msra.gmra.mrb[6].mxu0 %v9537_v10 }
 0x73a   : > { %4487 = vmatprep.mubr.f32.mxu0 %v9294_v7 }
 0x80c   : > { %v3861_v0 = vpop.f32.mrb[6].mxu0 }
 0x80d   : > { %v3870_v1 = vadd.f32 %v3868_v62, %v3861_v0  ;;  %v3878_v2 = vadd.f32 %v3876_v63, %v3861_v0  ;;  %v3863_v3 = vpop.f32.mrb[7].mxu0  ;;  %v4406_v0 = vstv %s4400_s17 }
 0x80e   : > { %v3871_v4 = vadd.f32 %v3868_v62, %v3863_v3  ;;  %v3879_v5 = vadd.f32 %v3876_v63, %v3863_v3  ;;  %v4403_v63 = vstv %s4398_s16  ;;  %v8657_v3 = vld [vmem:[%s9503_s27 + $0x70] sm:$0xff]  ;;  %s8712_s16 = sadd.s32 40, %s9571_s13 }
 0x80f   : > { %9058 = vtanh.f32 %v3870_v1  ;;  %s5929_s17 = sadd.s32 1, %s8712_s16  ;;  %s5928_s19 = sld [smem:[#allocation2 + %s8712_s16]] }
 0x810   : > { %9060 = vtanh.f32 %v3878_v2  ;;  %v4414_v2 = vstv %s4402_s18  ;;  %s5931_s18 = sadd.s32 2, %s8712_s16  ;;  %s5930_s20 = sld [smem:[#allocation2 + %s5929_s17]] }
 0x811   : > { %9062 = vtanh.f32 %v3871_v4  ;;  %s5932_s12 = sld [smem:[#allocation2 + %s5931_s18]] }
 0x812   : > { %9064 = vtanh.f32 %v3879_v5 }
 0x819   : > { %v9059_v6 = vpop.eup %9058 }
 0x81a   : > { %v9061_v8 = vpop.eup %9060  ;;  %v3882_v11 = vmul.f32 2.5, %v9059_v6  ;;  %v8658_v6 = vld [vmem:[%s9503_s27 + $0x78] sm:$0xff] }
 0x81b   : > { %v9063_v12 = vpop.eup %9062  ;;  %v3884_v13 = vmul.f32 1.5, %v9061_v8 }
 0x81c   : > { %v9065_v16 = vpop.eup %9064  ;;  %v3883_v20 = vmul.f32 2.5, %v9063_v12 }
 0x81d   : > { %v3886_v23 = vsub.f32 %v3882_v11, %v3884_v13  ;;  %v3885_v25 = vmul.f32 1.5, %v9065_v16  ;;  %v4415_v13 = vmul.f32 %v8657_v3, %v4414_v2 }
 0x81f   : > { %v3897_v26 = vmul.f32 %v3896_v19, %v3886_v23  ;;  %v3887_v27 = vsub.f32 %v3883_v20, %v3885_v25  ;;  %v4416_v20 = vmul.f32 %v8658_v6, %v4414_v2 }
 0x821   : > { %v3899_v29 = vsub.f32 %v3894_v15, %v3897_v26  ;;  %v3898_v31 = vmul.f32 %v3896_v19, %v3887_v27 }
 0x823   : > { %v3900_v33 = vsub.f32 %v3895_v30, %v3898_v31  ;;  %v9748_v34 = vadd.f32 %v3905_v28, %v3899_v29 }
 0x825   : > { %v9750_v35 = vadd.f32 %v3906_v32, %v3900_v33  ;;  %v3913_v36 = vand.u32 4294901760, %v9748_v34  ;;  %v4404_v8 = vmul.f32 %v4403_v63, %v9748_v34  ;;  %v9304_v33 = vmov 9  }
 0x826   : > { %8998 = vset.pattern.permute.xlu1 %v9304_v33  ;;  %8999 = vset.pattern.permute.xlu0 %v9304_v33 }
 0x827   : > { %v3911_v37 = vand.u32 4294901760, %v9750_v35  ;;  %v3996_v38 = vsub.f32 %v9748_v34, %v3913_v36  ;;  %v4405_v17 = vmul.f32 %v4403_v63, %v9750_v35  ;;  %5397 = vperm.xlu1 %8998, %v9736_v60   ;;  %5405 = vperm.xlu0 %8999, %v9740_v61   ;;  %v4896_v34 = vpop.permute.xlu1 %4895 }
 0x829   : > { %3912 = vmatprep.subr.mxu1 %v3911_v37  ;;  %v3990_v39 = vsub.f32 %v9750_v35, %v3911_v37  ;;  %v3997_v40 = vand.u32 4294901760, %v3996_v38  ;;  %v4888_v35 = vpop.permute.xlu0 %4887 }
 0x82a   : > { %3914 = vmatpush1.msra.mxu1 %v3913_v36 }
 0x82b   : > { %3983 = vmatmul.mubr.f32.vlgmr.msra.gmra.mrb[6].mxu1 %v9554_v24  ;;  %v3991_v41 = vand.u32 4294901760, %v3990_v39  ;;  %v3998_v42 = vsub.f32 %v3996_v38, %v3997_v40 }
 0x82c   : > { %4063 = vmatprep.mubr.f32.mxu1 %v9294_v7 }
 0x82d   : > { %v3992_v43 = vsub.f32 %v3990_v39, %v3991_v41  ;;  %v3999_v45 = vand.u32 4294901760, %v3998_v42 }
 0x82f   : > { %v3993_v44 = vand.u32 4294901760, %v3992_v43 }
 0x831   : > { %3994 = vmatprep.subr.mxu1 %v3993_v44 }
 0x832   : > { %4000 = vmatpush1.msra.mxu1 %v3999_v45 }
 0x833   : > { %4065 = vmatmul.mubr.f32.vlgmr.msra.gmra.mrb[6].mxu1 %v9537_v10  ;;  %4073 = vmatprep.subr.mxu1 %v3990_v39 }
 0x834   : > { %4076 = vmatpush1.msra.mxu1 %v3996_v38  ;;  %4139 = vmatprep.mubr.f32.mxu1 %v9294_v7 }
 0x835   : > { %4149 = vmatprep.subr.mxu1 %v3911_v37 }
 0x83b   : > { %4142 = vmatmul.mubr.f32.vlgmr.msra.gmra.mrb[6].mxu1 %v9543_v14 }
 0x83c   : > { %4151 = vmatpush1.msra.mxu1 %v3913_v36  ;;  %4214 = vmatprep.mubr.f32.mxu1 %v9294_v7 }
 0x83d   : > { %4227 = vmatprep.subr.mxu1 %v3991_v41 }
 0x843   : > { %4218 = vmatmul.mubr.f32.vlgmr.msra.gmra.mrb[6].mxu1 %v9549_v18 }
 0x844   : > { %4231 = vmatpush1.msra.mxu1 %v3997_v40  ;;  %4294 = vmatprep.mubr.f32.mxu1 %v9294_v7 }
 0x845   : > { %4303 = vmatprep.subr.mxu1 %v3911_v37 }
 0x84b   : > { %4296 = vmatmul.mubr.f32.vlgmr.msra.gmra.mrb[6].mxu1 %v9537_v10 }
 0x84c   : > { %4305 = vmatpush1.msra.mxu1 %v3913_v36  ;;  %4368 = vmatprep.mubr.f32.mxu1 %v9294_v7 }
 0x853   : > { %4370 = vmatmul.mubr.f32.vlgmr.msra.gmra.mrb[6].mxu1 %v9537_v10 }
 0x854   : > { %4997 = vmatprep.mubr.f32.mxu1 %v9294_v7 }
 0x926   : > { %v4371_v49 = vpop.f32.mrb[6].mxu1 }
 0x927   : > { %v4380_v50 = vadd.f32 %v4378_v47, %v4371_v49  ;;  %v4388_v51 = vadd.f32 %v4386_v48, %v4371_v49  ;;  %v4373_v52 = vpop.f32.mrb[7].mxu1  ;;  %v4916_v49 = vstv %s4910_s21 }
 0x928   : > { %v4381_v53 = vadd.f32 %v4378_v47, %v4373_v52  ;;  %v4389_v54 = vadd.f32 %v4386_v48, %v4373_v52  ;;  %v4913_v48 = vstv %s4908_s15  ;;  %v8660_v52 = vld [vmem:[%s9503_s27 + $0x80] sm:$0xff]  ;;  %s8714_s15 = sadd.s32 44, %s9571_s13 }
 0x929   : > { %9066 = vtanh.f32 %v4380_v50  ;;  %s6439_s21 = sadd.s32 1, %s8714_s15  ;;  %s6438_s28 = sld [smem:[#allocation2 + %s8714_s15]] }
 0x92a   : > { %9068 = vtanh.f32 %v4388_v51  ;;  %v4924_v51 = vstv %s4912_s8  ;;  %s6441_s8 = sadd.s32 2, %s8714_s15  ;;  %s6440_s14 = sld [smem:[#allocation2 + %s6439_s21]] }
 0x92b   : > { %9070 = vtanh.f32 %v4381_v53  ;;  %s6442_s24 = sld [smem:[#allocation2 + %s6441_s8]]  ;;  %s8720_s21 = sadd.s32 56, %s9571_s13 }
 0x92c   : > { %9072 = vtanh.f32 %v4389_v54  ;;  %s7969_s8 = sadd.s32 1, %s8720_s21 }
 0x933   : > { %v9067_v55 = vpop.eup %9066 }
 0x934   : > { %v9069_v56 = vpop.eup %9068  ;;  %v4392_v57 = vmul.f32 2.5, %v9067_v55  ;;  %v8661_v55 = vld [vmem:[%s9503_s27 + $0x88] sm:$0xff] }
 0x935   : > { %v9071_v58 = vpop.eup %9070  ;;  %v4394_v59 = vmul.f32 1.5, %v9069_v56 }
 0x936   : > { %v9073_v62 = vpop.eup %9072  ;;  %v4393_v1 = vmul.f32 2.5, %v9071_v58 }
 0x937   : > { %v4396_v4 = vsub.f32 %v4392_v57, %v4394_v59  ;;  %v4395_v5 = vmul.f32 1.5, %v9073_v62  ;;  %v4925_v59 = vmul.f32 %v8660_v52, %v4924_v51 }
 0x939   : > { %v4407_v11 = vmul.f32 %v4406_v0, %v4396_v4  ;;  %v4397_v12 = vsub.f32 %v4393_v1, %v4395_v5  ;;  %v4926_v1 = vmul.f32 %v8661_v55, %v4924_v51 }
 0x93b   : > { %v4409_v16 = vsub.f32 %v4404_v8, %v4407_v11  ;;  %v4408_v19 = vmul.f32 %v4406_v0, %v4397_v12 }
 0x93d   : > { %v4410_v21 = vsub.f32 %v4405_v17, %v4408_v19  ;;  %v9775_v22 = vadd.f32 %v4415_v13, %v4409_v16 }
 0x93f   : > { %v9777_v23 = vadd.f32 %v4416_v20, %v4410_v21  ;;  %v4423_v25 = vand.u32 4294901760, %v9775_v22  ;;  %v4914_v56 = vmul.f32 %v4913_v48, %v9775_v22  ;;  %v9305_v21 = vmov 10  }
 0x940   : > { %9000 = vset.pattern.permute.xlu1 %v9305_v21 }
 0x941   : > { %v4421_v9 = vand.u32 4294901760, %v9777_v23  ;;  %v4506_v15 = vsub.f32 %v9775_v22, %v4423_v25  ;;  %v4915_v63 = vmul.f32 %v4913_v48, %v9777_v23  ;;  %5907 = vperm.xlu1 %9000, %v9736_v60   ;;  %v5398_v22 = vpop.permute.xlu1 %5397 }
 0x943   : > { %4422 = vmatprep.subr.mxu0 %v4421_v9  ;;  %v4500_v26 = vsub.f32 %v9777_v23, %v4421_v9  ;;  %v4507_v27 = vand.u32 4294901760, %v4506_v15  ;;  %v5406_v23 = vpop.permute.xlu0 %5405 }
 0x944   : > { %4424 = vmatpush1.msra.mxu0 %v4423_v25 }
 0x945   : > { %4493 = vmatmul.mubr.f32.vlgmr.msra.gmra.mrb[8].mxu0 %v9554_v24  ;;  %v4501_v28 = vand.u32 4294901760, %v4500_v26  ;;  %v4508_v29 = vsub.f32 %v4506_v15, %v4507_v27  ;;  %5915 = vperm.xlu1 %9000, %v9740_v61  }
 0x946   : > { %4573 = vmatprep.mubr.f32.mxu0 %v9294_v7 }
 0x947   : > { %v4502_v30 = vsub.f32 %v4500_v26, %v4501_v28  ;;  %v4509_v32 = vand.u32 4294901760, %v4508_v29 }
 0x949   : > { %v4503_v31 = vand.u32 4294901760, %v4502_v30 }
 0x94b   : > { %4504 = vmatprep.subr.mxu0 %v4503_v31 }
 0x94c   : > { %4510 = vmatpush1.msra.mxu0 %v4509_v32 }
 0x94d   : > { %4575 = vmatmul.mubr.f32.vlgmr.msra.gmra.mrb[8].mxu0 %v9537_v10  ;;  %4583 = vmatprep.subr.mxu0 %v4500_v26 }
 0x94e   : > { %4586 = vmatpush1.msra.mxu0 %v4506_v15  ;;  %4649 = vmatprep.mubr.f32.mxu0 %v9294_v7 }
 0x94f   : > { %4659 = vmatprep.subr.mxu0 %v4421_v9 }
 0x955   : > { %4652 = vmatmul.mubr.f32.vlgmr.msra.gmra.mrb[8].mxu0 %v9543_v14 }
 0x956   : > { %4661 = vmatpush1.msra.mxu0 %v4423_v25  ;;  %4724 = vmatprep.mubr.f32.mxu0 %v9294_v7 }
 0x957   : > { %4737 = vmatprep.subr.mxu0 %v4501_v28 }
 0x95d   : > { %4728 = vmatmul.mubr.f32.vlgmr.msra.gmra.mrb[8].mxu0 %v9549_v18 }
 0x95e   : > { %4741 = vmatpush1.msra.mxu0 %v4507_v27  ;;  %4804 = vmatprep.mubr.f32.mxu0 %v9294_v7 }
 0x95f   : > { %4813 = vmatprep.subr.mxu0 %v4421_v9 }
 0x965   : > { %4806 = vmatmul.mubr.f32.vlgmr.msra.gmra.mrb[8].mxu0 %v9537_v10 }
 0x966   : > { %4815 = vmatpush1.msra.mxu0 %v4423_v25  ;;  %4878 = vmatprep.mubr.f32.mxu0 %v9294_v7 }
 0x96d   : > { %4880 = vmatmul.mubr.f32.vlgmr.msra.gmra.mrb[8].mxu0 %v9537_v10 }
 0x96e   : > { %5507 = vmatprep.mubr.f32.mxu0 %v9294_v7 }
 0xa40   : > { %v4881_v36 = vpop.f32.mrb[8].mxu0 }
 0xa41   : > { %v4890_v37 = vadd.f32 %v4888_v35, %v4881_v36  ;;  %v4898_v38 = vadd.f32 %v4896_v34, %v4881_v36  ;;  %v4883_v39 = vpop.f32.mrb[9].mxu0  ;;  %v5426_v36 = vstv %s5420_s10 }
 0xa42   : > { %v4891_v40 = vadd.f32 %v4888_v35, %v4883_v39  ;;  %v4899_v41 = vadd.f32 %v4896_v34, %v4883_v39  ;;  %v5423_v35 = vstv %s5418_s9  ;;  %v8663_v39 = vld [vmem:[%s9503_s27 + $0x90] sm:$0xff]  ;;  %s8716_s9 = sadd.s32 48, %s9571_s13 }
 0xa43   : > { %9074 = vtanh.f32 %v4890_v37  ;;  %s6949_s10 = sadd.s32 1, %s8716_s9  ;;  %s6948_s16 = sld [smem:[#allocation2 + %s8716_s9]] }
 0xa44   : > { %9076 = vtanh.f32 %v4898_v38  ;;  %v5434_v38 = vstv %s5422_s7  ;;  %s6951_s7 = sadd.s32 2, %s8716_s9  ;;  %s6950_s17 = sld [smem:[#allocation2 + %s6949_s10]] }
 0xa45   : > { %9078 = vtanh.f32 %v4891_v40  ;;  %s6952_s18 = sld [smem:[#allocation2 + %s6951_s7]]  ;;  %s8722_s10 = sadd.s32 60, %s9571_s13 }
 0xa46   : > { %9080 = vtanh.f32 %v4899_v41  ;;  %s8479_s7 = sadd.s32 1, %s8722_s10 }
 0xa4d   : > { %v9075_v42 = vpop.eup %9074 }
 0xa4e   : > { %v9077_v43 = vpop.eup %9076  ;;  %v4902_v44 = vmul.f32 2.5, %v9075_v42  ;;  %v8664_v42 = vld [vmem:[%s9503_s27 + $0x98] sm:$0xff] }
 0xa4f   : > { %v9079_v45 = vpop.eup %9078  ;;  %v4904_v46 = vmul.f32 1.5, %v9077_v43 }
 0xa50   : > { %v9081_v47 = vpop.eup %9080  ;;  %v4903_v50 = vmul.f32 2.5, %v9079_v45 }
 0xa51   : > { %v4906_v53 = vsub.f32 %v4902_v44, %v4904_v46  ;;  %v4905_v54 = vmul.f32 1.5, %v9081_v47  ;;  %v5435_v46 = vmul.f32 %v8663_v39, %v5434_v38 }
 0xa53   : > { %v4917_v57 = vmul.f32 %v4916_v49, %v4906_v53  ;;  %v4907_v58 = vsub.f32 %v4903_v50, %v4905_v54  ;;  %v5436_v50 = vmul.f32 %v8664_v42, %v5434_v38 }
 0xa55   : > { %v4919_v62 = vsub.f32 %v4914_v56, %v4917_v57  ;;  %v4918_v0 = vmul.f32 %v4916_v49, %v4907_v58 }
 0xa57   : > { %v4920_v2 = vsub.f32 %v4915_v63, %v4918_v0  ;;  %v9802_v3 = vadd.f32 %v4925_v59, %v4919_v62 }
 0xa59   : > { %v9804_v4 = vadd.f32 %v4926_v1, %v4920_v2  ;;  %v4933_v5 = vand.u32 4294901760, %v9802_v3  ;;  %v5424_v43 = vmul.f32 %v5423_v35, %v9802_v3  ;;  %v9306_v2 = vmov 11  }
 0xa5a   : > { %9002 = vset.pattern.permute.xlu1 %v9306_v2  ;;  %9001 = vset.pattern.permute.xlu0 %v9306_v2 }
 0xa5b   : > { %v4931_v6 = vand.u32 4294901760, %v9804_v4  ;;  %v5016_v8 = vsub.f32 %v9802_v3, %v4933_v5  ;;  %v5425_v48 = vmul.f32 %v5423_v35, %v9804_v4  ;;  %6425 = vperm.xlu1 %9002, %v9740_v61   ;;  %6417 = vperm.xlu0 %9001, %v9736_v60   ;;  %v5908_v3 = vpop.permute.xlu1 %5907 }
 0xa5d   : > { %4932 = vmatprep.subr.mxu1 %v4931_v6  ;;  %v5010_v11 = vsub.f32 %v9804_v4, %v4931_v6  ;;  %v5017_v12 = vand.u32 4294901760, %v5016_v8 }
 0xa5e   : > { %4934 = vmatpush1.msra.mxu1 %v4933_v5 }
 0xa5f   : > { %5003 = vmatmul.mubr.f32.vlgmr.msra.gmra.mrb[8].mxu1 %v9554_v24  ;;  %v5011_v13 = vand.u32 4294901760, %v5010_v11  ;;  %v5018_v16 = vsub.f32 %v5016_v8, %v5017_v12  ;;  %v5916_v4 = vpop.permute.xlu1 %5915 }
 0xa60   : > { %5083 = vmatprep.mubr.f32.mxu1 %v9294_v7 }
 0xa61   : > { %v5012_v17 = vsub.f32 %v5010_v11, %v5011_v13  ;;  %v5019_v20 = vand.u32 4294901760, %v5018_v16 }
 0xa63   : > { %v5013_v19 = vand.u32 4294901760, %v5012_v17 }
 0xa65   : > { %5014 = vmatprep.subr.mxu1 %v5013_v19 }
 0xa66   : > { %5020 = vmatpush1.msra.mxu1 %v5019_v20 }
 0xa67   : > { %5085 = vmatmul.mubr.f32.vlgmr.msra.gmra.mrb[8].mxu1 %v9537_v10  ;;  %5093 = vmatprep.subr.mxu1 %v5010_v11 }
 0xa68   : > { %5096 = vmatpush1.msra.mxu1 %v5016_v8  ;;  %5159 = vmatprep.mubr.f32.mxu1 %v9294_v7 }
 0xa69   : > { %5169 = vmatprep.subr.mxu1 %v4931_v6 }
 0xa6f   : > { %5162 = vmatmul.mubr.f32.vlgmr.msra.gmra.mrb[8].mxu1 %v9543_v14 }
 0xa70   : > { %5171 = vmatpush1.msra.mxu1 %v4933_v5  ;;  %5234 = vmatprep.mubr.f32.mxu1 %v9294_v7 }
 0xa71   : > { %5247 = vmatprep.subr.mxu1 %v5011_v13 }
 0xa77   : > { %5238 = vmatmul.mubr.f32.vlgmr.msra.gmra.mrb[8].mxu1 %v9549_v18 }
 0xa78   : > { %5251 = vmatpush1.msra.mxu1 %v5017_v12  ;;  %5314 = vmatprep.mubr.f32.mxu1 %v9294_v7 }
 0xa79   : > { %5323 = vmatprep.subr.mxu1 %v4931_v6 }
 0xa7f   : > { %5316 = vmatmul.mubr.f32.vlgmr.msra.gmra.mrb[8].mxu1 %v9537_v10 }
 0xa80   : > { %5325 = vmatpush1.msra.mxu1 %v4933_v5  ;;  %5388 = vmatprep.mubr.f32.mxu1 %v9294_v7 }
 0xa87   : > { %5390 = vmatmul.mubr.f32.vlgmr.msra.gmra.mrb[8].mxu1 %v9537_v10 }
 0xa88   : > { %6017 = vmatprep.mubr.f32.mxu1 %v9294_v7 }
 0xb5a   : > { %v5391_v25 = vpop.f32.mrb[8].mxu1 }
 0xb5b   : > { %v5400_v9 = vadd.f32 %v5398_v22, %v5391_v25  ;;  %v5408_v15 = vadd.f32 %v5406_v23, %v5391_v25  ;;  %v5393_v26 = vpop.f32.mrb[9].mxu1  ;;  %v5936_v25 = vstv %s5930_s20 }
 0xb5c   : > { %v5401_v27 = vadd.f32 %v5398_v22, %v5393_v26  ;;  %v5409_v28 = vadd.f32 %v5406_v23, %v5393_v26  ;;  %v5933_v23 = vstv %s5928_s19  ;;  %v8666_v26 = vld [vmem:[%s9503_s27 + $0xa0] sm:$0xff]  ;;  %s8718_s19 = sadd.s32 52, %s9571_s13 }
 0xb5d   : > { %9082 = vtanh.f32 %v5400_v9  ;;  %s7459_s20 = sadd.s32 1, %s8718_s19 }
 0xb5e   : > { %9084 = vtanh.f32 %v5408_v15  ;;  %v5944_v15 = vstv %s5932_s12  ;;  %s7460_s12 = sld [smem:[#allocation2 + %s7459_s20]] }
 0xb5f   : > { %9086 = vtanh.f32 %v5401_v27 }
 0xb60   : > { %9088 = vtanh.f32 %v5409_v28 }
 0xb67   : > { %v9083_v29 = vpop.eup %9082 }
 0xb68   : > { %v9085_v30 = vpop.eup %9084  ;;  %v5412_v31 = vmul.f32 2.5, %v9083_v29  ;;  %v8667_v29 = vld [vmem:[%s9503_s27 + $0xa8] sm:$0xff] }
 0xb69   : > { %v9087_v32 = vpop.eup %9086  ;;  %v5414_v33 = vmul.f32 1.5, %v9085_v30 }
 0xb6a   : > { %v9089_v34 = vpop.eup %9088  ;;  %v5413_v37 = vmul.f32 2.5, %v9087_v32 }
 0xb6b   : > { %v5416_v40 = vsub.f32 %v5412_v31, %v5414_v33  ;;  %v5415_v41 = vmul.f32 1.5, %v9089_v34  ;;  %v5945_v33 = vmul.f32 %v8666_v26, %v5944_v15 }
 0xb6d   : > { %v5427_v44 = vmul.f32 %v5426_v36, %v5416_v40  ;;  %v5417_v45 = vsub.f32 %v5413_v37, %v5415_v41  ;;  %v5946_v37 = vmul.f32 %v8667_v29, %v5944_v15 }
 0xb6f   : > { %v5429_v47 = vsub.f32 %v5424_v43, %v5427_v44  ;;  %v5428_v49 = vmul.f32 %v5426_v36, %v5417_v45 }
 0xb71   : > { %v5430_v51 = vsub.f32 %v5425_v48, %v5428_v49  ;;  %v9829_v52 = vadd.f32 %v5435_v46, %v5429_v47 }
 0xb73   : > { %v9831_v53 = vadd.f32 %v5436_v50, %v5430_v51  ;;  %v5443_v54 = vand.u32 4294901760, %v9829_v52  ;;  %v5934_v30 = vmul.f32 %v5933_v23, %v9829_v52  ;;  %v9307_v51 = vmov 12  }
 0xb74   : > { %9003 = vset.pattern.permute.xlu1 %v9307_v51  ;;  %9004 = vset.pattern.permute.xlu0 %v9307_v51  ;;  %v6953_v51 = vstv %s6948_s16  ;;  %s8481_s16 = sadd.s32 2, %s8722_s10 }
 0xb75   : > { %v5441_v55 = vand.u32 4294901760, %v9831_v53  ;;  %v5526_v56 = vsub.f32 %v9829_v52, %v5443_v54  ;;  %v5935_v35 = vmul.f32 %v5933_v23, %v9831_v53  ;;  %6927 = vperm.xlu1 %9003, %v9736_v60   ;;  %6935 = vperm.xlu0 %9004, %v9740_v61   ;;  %v6426_v52 = vpop.permute.xlu1 %6425 }
 0xb77   : > { %5442 = vmatprep.subr.mxu0 %v5441_v55  ;;  %v5520_v57 = vsub.f32 %v9831_v53, %v5441_v55  ;;  %v5527_v58 = vand.u32 4294901760, %v5526_v56  ;;  %v6418_v53 = vpop.permute.xlu0 %6417 }
 0xb78   : > { %5444 = vmatpush1.msra.mxu0 %v5443_v54 }
 0xb79   : > { %5513 = vmatmul.mubr.f32.vlgmr.msra.gmra.mrb[10].mxu0 %v9554_v24  ;;  %v5521_v59 = vand.u32 4294901760, %v5520_v57  ;;  %v5528_v62 = vsub.f32 %v5526_v56, %v5527_v58 }
 0xb7a   : > { %5593 = vmatprep.mubr.f32.mxu0 %v9294_v7 }
 0xb7b   : > { %v5522_v63 = vsub.f32 %v5520_v57, %v5521_v59  ;;  %v5529_v1 = vand.u32 4294901760, %v5528_v62 }
 0xb7d   : > { %v5523_v0 = vand.u32 4294901760, %v5522_v63 }
 0xb7f   : > { %5524 = vmatprep.subr.mxu0 %v5523_v0 }
 0xb80   : > { %5530 = vmatpush1.msra.mxu0 %v5529_v1 }
 0xb81   : > { %5595 = vmatmul.mubr.f32.vlgmr.msra.gmra.mrb[10].mxu0 %v9537_v10  ;;  %5603 = vmatprep.subr.mxu0 %v5520_v57 }
 0xb82   : > { %5606 = vmatpush1.msra.mxu0 %v5526_v56  ;;  %5669 = vmatprep.mubr.f32.mxu0 %v9294_v7 }
 0xb83   : > { %5679 = vmatprep.subr.mxu0 %v5441_v55 }
 0xb89   : > { %5672 = vmatmul.mubr.f32.vlgmr.msra.gmra.mrb[10].mxu0 %v9543_v14 }
 0xb8a   : > { %5681 = vmatpush1.msra.mxu0 %v5443_v54  ;;  %5744 = vmatprep.mubr.f32.mxu0 %v9294_v7 }
 0xb8b   : > { %5757 = vmatprep.subr.mxu0 %v5521_v59 }
 0xb91   : > { %5748 = vmatmul.mubr.f32.vlgmr.msra.gmra.mrb[10].mxu0 %v9549_v18 }
 0xb92   : > { %5761 = vmatpush1.msra.mxu0 %v5527_v58  ;;  %5824 = vmatprep.mubr.f32.mxu0 %v9294_v7 }
 0xb93   : > { %5833 = vmatprep.subr.mxu0 %v5441_v55 }
 0xb99   : > { %5826 = vmatmul.mubr.f32.vlgmr.msra.gmra.mrb[10].mxu0 %v9537_v10 }
 0xb9a   : > { %5835 = vmatpush1.msra.mxu0 %v5443_v54  ;;  %5898 = vmatprep.mubr.f32.mxu0 %v9294_v7 }
 0xba1   : > { %5900 = vmatmul.mubr.f32.vlgmr.msra.gmra.mrb[10].mxu0 %v9537_v10 }
 0xba2   : > { %6527 = vmatprep.mubr.f32.mxu0 %v9294_v7 }
 0xc74   : > { %v5901_v5 = vpop.f32.mrb[10].mxu0 }
 0xc75   : > { %v5910_v6 = vadd.f32 %v5908_v3, %v5901_v5  ;;  %v5918_v8 = vadd.f32 %v5916_v4, %v5901_v5  ;;  %v5903_v11 = vpop.f32.mrb[11].mxu0  ;;  %v6446_v5 = vstv %s6440_s14  ;;  %s7968_s14 = sld [smem:[#allocation2 + %s8720_s21]] }
 0xc76   : > { %v5911_v12 = vadd.f32 %v5908_v3, %v5903_v11  ;;  %v5919_v13 = vadd.f32 %v5916_v4, %v5903_v11  ;;  %v6443_v4 = vstv %s6438_s28  ;;  %v8669_v11 = vld [vmem:[%s9503_s27 + $0xb0] sm:$0xff]  ;;  %s7971_s28 = sadd.s32 2, %s8720_s21 }
 0xc77   : > { %9090 = vtanh.f32 %v5910_v6  ;;  %s7972_s9 = sld [smem:[#allocation2 + %s7971_s28]] }
 0xc78   : > { %9092 = vtanh.f32 %v5918_v8  ;;  %v6454_v8 = vstv %s6442_s24  ;;  %s7970_s24 = sld [smem:[#allocation2 + %s7969_s8]] }
 0xc79   : > { %9094 = vtanh.f32 %v5911_v12 }
 0xc7a   : > { %9096 = vtanh.f32 %v5919_v13 }
 0xc81   : > { %v9091_v16 = vpop.eup %9090 }
 0xc82   : > { %v9093_v17 = vpop.eup %9092  ;;  %v5922_v19 = vmul.f32 2.5, %v9091_v16  ;;  %v8670_v16 = vld [vmem:[%s9503_s27 + $0xb8] sm:$0xff] }
 0xc83   : > { %v9095_v20 = vpop.eup %9094  ;;  %v5924_v21 = vmul.f32 1.5, %v9093_v17 }
 0xc84   : > { %v9097_v22 = vpop.eup %9096  ;;  %v5923_v9 = vmul.f32 2.5, %v9095_v20 }
 0xc85   : > { %v5926_v27 = vsub.f32 %v5922_v19, %v5924_v21  ;;  %v5925_v28 = vmul.f32 1.5, %v9097_v22  ;;  %v6455_v21 = vmul.f32 %v8669_v11, %v6454_v8 }
 0xc87   : > { %v5937_v31 = vmul.f32 %v5936_v25, %v5926_v27  ;;  %v5927_v32 = vsub.f32 %v5923_v9, %v5925_v28  ;;  %v6456_v9 = vmul.f32 %v8670_v16, %v6454_v8 }
 0xc89   : > { %v5939_v34 = vsub.f32 %v5934_v30, %v5937_v31  ;;  %v5938_v36 = vmul.f32 %v5936_v25, %v5927_v32 }
 0xc8b   : > { %v5940_v38 = vsub.f32 %v5935_v35, %v5938_v36  ;;  %v9856_v39 = vadd.f32 %v5945_v33, %v5939_v34 }
 0xc8d   : > { %v9858_v40 = vadd.f32 %v5946_v37, %v5940_v38  ;;  %v5953_v41 = vand.u32 4294901760, %v9856_v39  ;;  %v6444_v17 = vmul.f32 %v6443_v4, %v9856_v39  ;;  %v9308_v38 = vmov 13  }
 0xc8e   : > { %9005 = vset.pattern.permute.xlu1 %v9308_v38 }
 0xc8f   : > { %v5951_v42 = vand.u32 4294901760, %v9858_v40  ;;  %v6036_v43 = vsub.f32 %v9856_v39, %v5953_v41  ;;  %v6445_v23 = vmul.f32 %v6443_v4, %v9858_v40  ;;  %7437 = vperm.xlu1 %9005, %v9736_v60   ;;  %v6928_v39 = vpop.permute.xlu1 %6927 }
 0xc91   : > { %5952 = vmatprep.subr.mxu1 %v5951_v42  ;;  %v6030_v44 = vsub.f32 %v9858_v40, %v5951_v42  ;;  %v6037_v45 = vand.u32 4294901760, %v6036_v43  ;;  %v6936_v40 = vpop.permute.xlu0 %6935 }
 0xc92   : > { %5954 = vmatpush1.msra.mxu1 %v5953_v41 }
 0xc93   : > { %6023 = vmatmul.mubr.f32.vlgmr.msra.gmra.mrb[10].mxu1 %v9554_v24  ;;  %v6031_v46 = vand.u32 4294901760, %v6030_v44  ;;  %v6038_v47 = vsub.f32 %v6036_v43, %v6037_v45  ;;  %7445 = vperm.xlu1 %9005, %v9740_v61  }
 0xc94   : > { %6103 = vmatprep.mubr.f32.mxu1 %v9294_v7 }
 0xc95   : > { %v6032_v48 = vsub.f32 %v6030_v44, %v6031_v46  ;;  %v6039_v50 = vand.u32 4294901760, %v6038_v47 }
 0xc97   : > { %v6033_v49 = vand.u32 4294901760, %v6032_v48 }
 0xc99   : > { %6034 = vmatprep.subr.mxu1 %v6033_v49 }
 0xc9a   : > { %6040 = vmatpush1.msra.mxu1 %v6039_v50 }
 0xc9b   : > { %6105 = vmatmul.mubr.f32.vlgmr.msra.gmra.mrb[10].mxu1 %v9537_v10  ;;  %6113 = vmatprep.subr.mxu1 %v6030_v44 }
 0xc9c   : > { %6116 = vmatpush1.msra.mxu1 %v6036_v43  ;;  %6179 = vmatprep.mubr.f32.mxu1 %v9294_v7 }
 0xc9d   : > { %6189 = vmatprep.subr.mxu1 %v5951_v42 }
 0xca3   : > { %6182 = vmatmul.mubr.f32.vlgmr.msra.gmra.mrb[10].mxu1 %v9543_v14 }
 0xca4   : > { %6191 = vmatpush1.msra.mxu1 %v5953_v41  ;;  %6254 = vmatprep.mubr.f32.mxu1 %v9294_v7 }
 0xca5   : > { %6267 = vmatprep.subr.mxu1 %v6031_v46 }
 0xcab   : > { %6258 = vmatmul.mubr.f32.vlgmr.msra.gmra.mrb[10].mxu1 %v9549_v18 }
 0xcac   : > { %6271 = vmatpush1.msra.mxu1 %v6037_v45  ;;  %6334 = vmatprep.mubr.f32.mxu1 %v9294_v7 }
 0xcad   : > { %6343 = vmatprep.subr.mxu1 %v5951_v42 }
 0xcb3   : > { %6336 = vmatmul.mubr.f32.vlgmr.msra.gmra.mrb[10].mxu1 %v9537_v10 }
 0xcb4   : > { %6345 = vmatpush1.msra.mxu1 %v5953_v41  ;;  %6408 = vmatprep.mubr.f32.mxu1 %v9294_v7 }
 0xcbb   : > { %6410 = vmatmul.mubr.f32.vlgmr.msra.gmra.mrb[10].mxu1 %v9537_v10 }
 0xcbc   : > { %7037 = vmatprep.mubr.f32.mxu1 %v9294_v7 }
 0xd8e   : > { %v6411_v54 = vpop.f32.mrb[10].mxu1 }
 0xd8f   : > { %v6420_v55 = vadd.f32 %v6418_v53, %v6411_v54  ;;  %v6428_v56 = vadd.f32 %v6426_v52, %v6411_v54  ;;  %v6413_v57 = vpop.f32.mrb[11].mxu1  ;;  %v6964_v54 = vstv %s6952_s18  ;;  %s8480_s18 = sld [smem:[#allocation2 + %s8479_s7]] }
 0xd90   : > { %v6421_v58 = vadd.f32 %v6418_v53, %v6413_v57  ;;  %v6429_v59 = vadd.f32 %v6426_v52, %v6413_v57  ;;  %v6956_v52 = vstv %s6950_s17  ;;  %s8478_s17 = sld [smem:[#allocation2 + %s8722_s10]] }
 0xd91   : > { %9098 = vtanh.f32 %v6420_v55  ;;  %v8672_v55 = vld [vmem:[%s9503_s27 + $0xc0] sm:$0xff] }
 0xd92   : > { %9100 = vtanh.f32 %v6428_v56 }
 0xd93   : > { %9102 = vtanh.f32 %v6421_v58  ;;  %v8673_v58 = vld [vmem:[%s9503_s27 + $0xc8] sm:$0xff] }
 0xd94   : > { %9104 = vtanh.f32 %v6429_v59  ;;  %v6966_v4 = vmul.f32 %v8673_v58, %v6964_v54 }
 0xd9b   : > { %v9099_v62 = vpop.eup %9098 }
 0xd9c   : > { %v9101_v63 = vpop.eup %9100  ;;  %v6432_v0 = vmul.f32 2.5, %v9099_v62 }
 0xd9d   : > { %v9103_v1 = vpop.eup %9102  ;;  %v6434_v2 = vmul.f32 1.5, %v9101_v63 }
 0xd9e   : > { %v9105_v3 = vpop.eup %9104  ;;  %v6433_v6 = vmul.f32 2.5, %v9103_v1 }
 0xd9f   : > { %v6436_v12 = vsub.f32 %v6432_v0, %v6434_v2  ;;  %v6435_v13 = vmul.f32 1.5, %v9105_v3  ;;  %v6965_v0 = vmul.f32 %v8672_v55, %v6964_v54 }
 0xda1   : > { %v6447_v19 = vmul.f32 %v6446_v5, %v6436_v12  ;;  %v6437_v20 = vsub.f32 %v6433_v6, %v6435_v13 }
 0xda3   : > { %v6449_v22 = vsub.f32 %v6444_v17, %v6447_v19  ;;  %v6448_v25 = vmul.f32 %v6446_v5, %v6437_v20 }
 0xda5   : > { %v6450_v15 = vsub.f32 %v6445_v23, %v6448_v25  ;;  %v9883_v26 = vadd.f32 %v6455_v21, %v6449_v22  ;;  %v9309_v25 = vmov 14  }
 0xda6   : > { %9007 = vset.pattern.permute.xlu1 %v9309_v25  ;;  %9006 = vset.pattern.permute.xlu0 %v9309_v25 }
 0xda7   : > { %v9885_v27 = vadd.f32 %v6456_v9, %v6450_v15  ;;  %v6463_v28 = vand.u32 4294901760, %v9883_v26  ;;  %v6954_v59 = vmul.f32 %v6953_v51, %v9883_v26  ;;  %v9931_v9 = vld [vmem:[%s9519_s11] sm:$0xff]  ;;  %s7461_s11 = sadd.s32 2, %s8718_s19 }
 0xda8   : > { %7955 = vperm.xlu1 %9007, %v9931_v9   ;;  %v9935_v15 = vld [vmem:[%s9514_s30] sm:$0xff]  ;;  %s7458_s30 = sld [smem:[#allocation2 + %s8718_s19]] }
 0xda9   : > { %v6461_v29 = vand.u32 4294901760, %v9885_v27  ;;  %v6546_v30 = vsub.f32 %v9883_v26, %v6463_v28  ;;  %v6955_v2 = vmul.f32 %v6953_v51, %v9885_v27  ;;  %7947 = vperm.xlu0 %9006, %v9935_v15   ;;  %v7438_v26 = vpop.permute.xlu1 %7437  ;;  %s7462_s15 = sld [smem:[#allocation2 + %s7461_s11]] }
 0xdaa   : > { %s8482_s19 = sld [smem:[#allocation2 + %s8481_s16]] }
 0xdab   : > { %6462 = vmatprep.subr.mxu0 %v6461_v29  ;;  %v6540_v31 = vsub.f32 %v9885_v27, %v6461_v29  ;;  %v6547_v32 = vand.u32 4294901760, %v6546_v30 }
 0xdac   : > { %6464 = vmatpush1.msra.mxu0 %v6463_v28 }
 0xdad   : > { %6533 = vmatmul.mubr.f32.vlgmr.msra.gmra.mrb[12].mxu0 %v9554_v24  ;;  %v6541_v33 = vand.u32 4294901760, %v6540_v31  ;;  %v6548_v34 = vsub.f32 %v6546_v30, %v6547_v32  ;;  %v7446_v27 = vpop.permute.xlu1 %7445 }
 0xdae   : > { %6613 = vmatprep.mubr.f32.mxu0 %v9294_v7 }
 0xdaf   : > { %v6542_v35 = vsub.f32 %v6540_v31, %v6541_v33  ;;  %v6549_v37 = vand.u32 4294901760, %v6548_v34 }
 0xdb1   : > { %v6543_v36 = vand.u32 4294901760, %v6542_v35 }
 0xdb3   : > { %6544 = vmatprep.subr.mxu0 %v6543_v36 }
 0xdb4   : > { %6550 = vmatpush1.msra.mxu0 %v6549_v37 }
 0xdb5   : > { %6615 = vmatmul.mubr.f32.vlgmr.msra.gmra.mrb[12].mxu0 %v9537_v10  ;;  %6623 = vmatprep.subr.mxu0 %v6540_v31 }
 0xdb6   : > { %6626 = vmatpush1.msra.mxu0 %v6546_v30  ;;  %6689 = vmatprep.mubr.f32.mxu0 %v9294_v7 }
 0xdb7   : > { %6699 = vmatprep.subr.mxu0 %v6461_v29 }
 0xdbd   : > { %6692 = vmatmul.mubr.f32.vlgmr.msra.gmra.mrb[12].mxu0 %v9543_v14 }
 0xdbe   : > { %6701 = vmatpush1.msra.mxu0 %v6463_v28  ;;  %6764 = vmatprep.mubr.f32.mxu0 %v9294_v7 }
 0xdbf   : > { %6777 = vmatprep.subr.mxu0 %v6541_v33 }
 0xdc5   : > { %6768 = vmatmul.mubr.f32.vlgmr.msra.gmra.mrb[12].mxu0 %v9549_v18 }
 0xdc6   : > { %6781 = vmatpush1.msra.mxu0 %v6547_v32  ;;  %6844 = vmatprep.mubr.f32.mxu0 %v9294_v7 }
 0xdc7   : > { %6853 = vmatprep.subr.mxu0 %v6461_v29 }
 0xdcd   : > { %6846 = vmatmul.mubr.f32.vlgmr.msra.gmra.mrb[12].mxu0 %v9537_v10 }
 0xdce   : > { %6855 = vmatpush1.msra.mxu0 %v6463_v28  ;;  %6918 = vmatprep.mubr.f32.mxu0 %v9294_v7 }
 0xdd5   : > { %6920 = vmatmul.mubr.f32.vlgmr.msra.gmra.mrb[12].mxu0 %v9537_v10 }
 0xdd6   : > { %7547 = vmatprep.mubr.f32.mxu0 %v9294_v7 }
 0xea8   : > { %v6921_v41 = vpop.f32.mrb[12].mxu0 }
 0xea9   : > { %v6930_v42 = vadd.f32 %v6928_v39, %v6921_v41  ;;  %v6938_v43 = vadd.f32 %v6936_v40, %v6921_v41  ;;  %v6923_v44 = vpop.f32.mrb[13].mxu0  ;;  %v7466_v41 = vstv %s7460_s12 }
 0xeaa   : > { %v6931_v45 = vadd.f32 %v6928_v39, %v6923_v44  ;;  %v6939_v46 = vadd.f32 %v6936_v40, %v6923_v44  ;;  %v7463_v40 = vstv %s7458_s30  ;;  %v8675_v44 = vld [vmem:[%s9503_s27 + $0xd0] sm:$0xff] }
 0xeab   : > { %9106 = vtanh.f32 %v6930_v42 }
 0xeac   : > { %9108 = vtanh.f32 %v6938_v43  ;;  %v7474_v43 = vstv %s7462_s15 }
 0xead   : > { %9110 = vtanh.f32 %v6931_v45 }
 0xeae   : > { %9112 = vtanh.f32 %v6939_v46 }
 0xeb5   : > { %v9107_v60 = vpop.eup %9106 }
 0xeb6   : > { %v9109_v61 = vpop.eup %9108  ;;  %v6942_v47 = vmul.f32 2.5, %v9107_v60  ;;  %v8676_v60 = vld [vmem:[%s9503_s27 + $0xd8] sm:$0xff] }
 0xeb7   : > { %v9111_v48 = vpop.eup %9110  ;;  %v6944_v49 = vmul.f32 1.5, %v9109_v61 }
 0xeb8   : > { %v9113_v50 = vpop.eup %9112  ;;  %v6943_v53 = vmul.f32 2.5, %v9111_v48 }
 0xeb9   : > { %v6946_v56 = vsub.f32 %v6942_v47, %v6944_v49  ;;  %v6945_v57 = vmul.f32 1.5, %v9113_v50  ;;  %v7475_v49 = vmul.f32 %v8675_v44, %v7474_v43 }
 0xebb   : > { %v6957_v62 = vmul.f32 %v6956_v52, %v6946_v56  ;;  %v6947_v63 = vsub.f32 %v6943_v53, %v6945_v57  ;;  %v7476_v53 = vmul.f32 %v8676_v60, %v7474_v43 }
 0xebd   : > { %v6959_v1 = vsub.f32 %v6954_v59, %v6957_v62  ;;  %v6958_v3 = vmul.f32 %v6956_v52, %v6947_v63 }
 0xebf   : > { %v6960_v5 = vsub.f32 %v6955_v2, %v6958_v3  ;;  %v9910_v6 = vadd.f32 %v6965_v0, %v6959_v1 }
 0xec1   : > { %v9912_v8 = vadd.f32 %v6966_v4, %v6960_v5  ;;  %v6973_v11 = vand.u32 4294901760, %v9910_v6  ;;  %v7464_v61 = vmul.f32 %v7463_v40, %v9910_v6  ;;  %v9310_v5 = vmov 15  }
 0xec2   : > { %9008 = vset.pattern.permute.xlu1 %v9310_v5  ;;  %9009 = vset.pattern.permute.xlu0 %v9310_v5 }
 0xec3   : > { %v6971_v12 = vand.u32 4294901760, %v9912_v8  ;;  %v7056_v13 = vsub.f32 %v9910_v6, %v6973_v11  ;;  %v7465_v51 = vmul.f32 %v7463_v40, %v9912_v8  ;;  %8457 = vperm.xlu1 %9008, %v9935_v15   ;;  %8465 = vperm.xlu0 %9009, %v9931_v9   ;;  %v7956_v6 = vpop.permute.xlu1 %7955 }
 0xec5   : > { %6972 = vmatprep.subr.mxu1 %v6971_v12  ;;  %v7050_v16 = vsub.f32 %v9912_v8, %v6971_v12  ;;  %v7057_v17 = vand.u32 4294901760, %v7056_v13  ;;  %v7948_v8 = vpop.permute.xlu0 %7947 }
 0xec6   : > { %6974 = vmatpush1.msra.mxu1 %v6973_v11 }
 0xec7   : > { %7043 = vmatmul.mubr.f32.vlgmr.msra.gmra.mrb[12].mxu1 %v9554_v24  ;;  %v7051_v19 = vand.u32 4294901760, %v7050_v16  ;;  %v7058_v20 = vsub.f32 %v7056_v13, %v7057_v17 }
 0xec8   : > { %7123 = vmatprep.mubr.f32.mxu1 %v9294_v7 }
 0xec9   : > { %v7052_v21 = vsub.f32 %v7050_v16, %v7051_v19  ;;  %v7059_v23 = vand.u32 4294901760, %v7058_v20 }
 0xecb   : > { %v7053_v22 = vand.u32 4294901760, %v7052_v21 }
 0xecd   : > { %7054 = vmatprep.subr.mxu1 %v7053_v22 }
 0xece   : > { %7060 = vmatpush1.msra.mxu1 %v7059_v23 }
 0xecf   : > { %7125 = vmatmul.mubr.f32.vlgmr.msra.gmra.mrb[12].mxu1 %v9537_v10  ;;  %7133 = vmatprep.subr.mxu1 %v7050_v16 }
 0xed0   : > { %7136 = vmatpush1.msra.mxu1 %v7056_v13  ;;  %7199 = vmatprep.mubr.f32.mxu1 %v9294_v7 }
 0xed1   : > { %7209 = vmatprep.subr.mxu1 %v6971_v12 }
 0xed7   : > { %7202 = vmatmul.mubr.f32.vlgmr.msra.gmra.mrb[12].mxu1 %v9543_v14 }
 0xed8   : > { %7211 = vmatpush1.msra.mxu1 %v6973_v11  ;;  %7274 = vmatprep.mubr.f32.mxu1 %v9294_v7 }
 0xed9   : > { %7287 = vmatprep.subr.mxu1 %v7051_v19 }
 0xedf   : > { %7278 = vmatmul.mubr.f32.vlgmr.msra.gmra.mrb[12].mxu1 %v9549_v18 }
 0xee0   : > { %7291 = vmatpush1.msra.mxu1 %v7057_v17  ;;  %7354 = vmatprep.mubr.f32.mxu1 %v9294_v7 }
 0xee1   : > { %7363 = vmatprep.subr.mxu1 %v6971_v12 }
 0xee7   : > { %7356 = vmatmul.mubr.f32.vlgmr.msra.gmra.mrb[12].mxu1 %v9537_v10 }
 0xee8   : > { %7365 = vmatpush1.msra.mxu1 %v6973_v11  ;;  %7428 = vmatprep.mubr.f32.mxu1 %v9294_v7 }
 0xeef   : > { %7430 = vmatmul.mubr.f32.vlgmr.msra.gmra.mrb[12].mxu1 %v9537_v10 }
 0xef0   : > { %8057 = vmatprep.mubr.f32.mxu1 %v9294_v7 }
 0xfc2   : > { %v7431_v28 = vpop.f32.mrb[12].mxu1 }
 0xfc3   : > { %v7440_v29 = vadd.f32 %v7438_v26, %v7431_v28  ;;  %v7448_v30 = vadd.f32 %v7446_v27, %v7431_v28  ;;  %v7433_v31 = vpop.f32.mrb[13].mxu1  ;;  %v7984_v28 = vstv %s7972_s9 }
 0xfc4   : > { %v7441_v32 = vadd.f32 %v7438_v26, %v7433_v31  ;;  %v7449_v33 = vadd.f32 %v7446_v27, %v7433_v31  ;;  %v7973_v26 = vstv %s7968_s14  ;;  %v7976_v27 = vstv %s7970_s24 }
 0xfc5   : > { %9114 = vtanh.f32 %v7440_v29  ;;  %v8678_v29 = vld [vmem:[%s9503_s27 + $0xe0] sm:$0xff] }
 0xfc6   : > { %9116 = vtanh.f32 %v7448_v30 }
 0xfc7   : > { %9118 = vtanh.f32 %v7441_v32  ;;  %v8679_v32 = vld [vmem:[%s9503_s27 + $0xe8] sm:$0xff] }
 0xfc8   : > { %9120 = vtanh.f32 %v7449_v33  ;;  %v7986_v40 = vmul.f32 %v8679_v32, %v7984_v28 }
 0xfcf   : > { %v9115_v34 = vpop.eup %9114 }
 0xfd0   : > { %v9117_v35 = vpop.eup %9116  ;;  %v7452_v36 = vmul.f32 2.5, %v9115_v34 }
 0xfd1   : > { %v9119_v37 = vpop.eup %9118  ;;  %v7454_v38 = vmul.f32 1.5, %v9117_v35 }
 0xfd2   : > { %v9121_v39 = vpop.eup %9120  ;;  %v7453_v42 = vmul.f32 2.5, %v9119_v37 }
 0xfd3   : > { %v7456_v45 = vsub.f32 %v7452_v36, %v7454_v38  ;;  %v7455_v46 = vmul.f32 1.5, %v9121_v39  ;;  %v7985_v36 = vmul.f32 %v8678_v29, %v7984_v28 }
 0xfd5   : > { %v7467_v47 = vmul.f32 %v7466_v41, %v7456_v45  ;;  %v7457_v48 = vsub.f32 %v7453_v42, %v7455_v46 }
 0xfd7   : > { %v7469_v50 = vsub.f32 %v7464_v61, %v7467_v47  ;;  %v7468_v52 = vmul.f32 %v7466_v41, %v7457_v48 }
 0xfd9   : > { %v7470_v54 = vsub.f32 %v7465_v51, %v7468_v52  ;;  %v9943_v55 = vadd.f32 %v7475_v49, %v7469_v50 }
 0xfdb   : > { %v9945_v56 = vadd.f32 %v7476_v53, %v7470_v54  ;;  %v7483_v57 = vand.u32 4294901760, %v9943_v55  ;;  %v7974_v34 = vmul.f32 %v7973_v26, %v9943_v55 }
 0xfdd   : > { %v7481_v58 = vand.u32 4294901760, %v9945_v56  ;;  %v7566_v59 = vsub.f32 %v9943_v55, %v7483_v57  ;;  %v7975_v37 = vmul.f32 %v7973_v26, %v9945_v56 }
 0xfdf   : > { %7482 = vmatprep.subr.mxu0 %v7481_v58  ;;  %v7560_v62 = vsub.f32 %v9945_v56, %v7481_v58  ;;  %v7567_v63 = vand.u32 4294901760, %v7566_v59 }
 0xfe0   : > { %7484 = vmatpush1.msra.mxu0 %v7483_v57 }
 0xfe1   : > { %7553 = vmatmul.mubr.f32.vlgmr.msra.gmra.mrb[14].mxu0 %v9554_v24  ;;  %v7561_v0 = vand.u32 4294901760, %v7560_v62  ;;  %v7568_v1 = vsub.f32 %v7566_v59, %v7567_v63 }
 0xfe2   : > { %7633 = vmatprep.mubr.f32.mxu0 %v9294_v7 }
 0xfe3   : > { %v7562_v2 = vsub.f32 %v7560_v62, %v7561_v0  ;;  %v7569_v4 = vand.u32 4294901760, %v7568_v1  ;;  %v8486_v1 = vstv %s8480_s18 }
 0xfe5   : > { %v7563_v3 = vand.u32 4294901760, %v7562_v2  ;;  %v8681_v2 = vld [vmem:[%s9503_s27 + $0xf0] sm:$0xff] }
 0xfe7   : > { %7564 = vmatprep.subr.mxu0 %v7563_v3  ;;  %v8494_v3 = vstv %s8482_s19 }
 0xfe8   : > { %7570 = vmatpush1.msra.mxu0 %v7569_v4 }
 0xfe9   : > { %7635 = vmatmul.mubr.f32.vlgmr.msra.gmra.mrb[14].mxu0 %v9537_v10  ;;  %7643 = vmatprep.subr.mxu0 %v7560_v62 }
 0xfea   : > { %7646 = vmatpush1.msra.mxu0 %v7566_v59  ;;  %7709 = vmatprep.mubr.f32.mxu0 %v9294_v7 }
 0xfeb   : > { %7719 = vmatprep.subr.mxu0 %v7481_v58 }
 0xff1   : > { %7712 = vmatmul.mubr.f32.vlgmr.msra.gmra.mrb[14].mxu0 %v9543_v14 }
 0xff2   : > { %7721 = vmatpush1.msra.mxu0 %v7483_v57  ;;  %7784 = vmatprep.mubr.f32.mxu0 %v9294_v7 }
 0xff3   : > { %7797 = vmatprep.subr.mxu0 %v7561_v0  ;;  %v8483_v0 = vstv %s8478_s17 }
 0xff9   : > { %7788 = vmatmul.mubr.f32.vlgmr.msra.gmra.mrb[14].mxu0 %v9549_v18 }
 0xffa   : > { %7801 = vmatpush1.msra.mxu0 %v7567_v63  ;;  %7864 = vmatprep.mubr.f32.mxu0 %v9294_v7 }
 0xffb   : > { %7873 = vmatprep.subr.mxu0 %v7481_v58 }
0x1001   : > { %7866 = vmatmul.mubr.f32.vlgmr.msra.gmra.mrb[14].mxu0 %v9537_v10 }
0x1002   : > { %7875 = vmatpush1.msra.mxu0 %v7483_v57  ;;  %7938 = vmatprep.mubr.f32.mxu0 %v9294_v7 }
0x1009   : > { %7940 = vmatmul.mubr.f32.vlgmr.msra.gmra.mrb[14].mxu0 %v9537_v10 }
0x10dc   : > { %v7941_v11 = vpop.f32.mrb[14].mxu0 }
0x10dd   : > { %v7950_v12 = vadd.f32 %v7948_v8, %v7941_v11  ;;  %v7958_v13 = vadd.f32 %v7956_v6, %v7941_v11  ;;  %v7943_v16 = vpop.f32.mrb[15].mxu0 }
0x10de   : > { %v7951_v17 = vadd.f32 %v7948_v8, %v7943_v16  ;;  %v7959_v19 = vadd.f32 %v7956_v6, %v7943_v16  ;;  %v8682_v6 = vld [vmem:[%s9503_s27 + $0xf8] sm:$0xff] }
0x10df   : > { %9122 = vtanh.f32 %v7950_v12 }
0x10e0   : > { %9124 = vtanh.f32 %v7958_v13  ;;  %v8495_v13 = vmul.f32 %v8681_v2, %v8494_v3 }
0x10e1   : > { %9126 = vtanh.f32 %v7951_v17 }
0x10e2   : > { %9128 = vtanh.f32 %v7959_v19 }
0x10e9   : > { %v9123_v20 = vpop.eup %9122 }
0x10ea   : > { %v9125_v21 = vpop.eup %9124  ;;  %v7962_v22 = vmul.f32 2.5, %v9123_v20  ;;  %v8496_v20 = vmul.f32 %v8682_v6, %v8494_v3 }
0x10eb   : > { %v9127_v23 = vpop.eup %9126  ;;  %v7964_v25 = vmul.f32 1.5, %v9125_v21 }
0x10ec   : > { %v9129_v9 = vpop.eup %9128  ;;  %v7963_v15 = vmul.f32 2.5, %v9127_v23 }
0x10ed   : > { %v7966_v30 = vsub.f32 %v7962_v22, %v7964_v25  ;;  %v7965_v31 = vmul.f32 1.5, %v9129_v9 }
0x10ef   : > { %v7967_v33 = vsub.f32 %v7963_v15, %v7965_v31  ;;  %v7977_v35 = vmul.f32 %v7976_v27, %v7966_v30 }
0x10f1   : > { %v7978_v38 = vmul.f32 %v7976_v27, %v7967_v33  ;;  %v7979_v39 = vsub.f32 %v7974_v34, %v7977_v35 }
0x10f3   : > { %v7980_v41 = vsub.f32 %v7975_v37, %v7978_v38  ;;  %v9969_v42 = vadd.f32 %v7985_v36, %v7979_v39 }
0x10f5   : > { %v9971_v43 = vadd.f32 %v7986_v40, %v7980_v41  ;;  %v7993_v44 = vand.u32 4294901760, %v9969_v42  ;;  %v8484_v11 = vmul.f32 %v8483_v0, %v9969_v42 }
0x10f7   : > { %v7991_v45 = vand.u32 4294901760, %v9971_v43  ;;  %v8076_v46 = vsub.f32 %v9969_v42, %v7993_v44  ;;  %v8485_v16 = vmul.f32 %v8483_v0, %v9971_v43 }
0x10f9   : > { %7992 = vmatprep.subr.mxu1 %v7991_v45  ;;  %v8070_v60 = vsub.f32 %v9971_v43, %v7991_v45  ;;  %v8077_v61 = vand.u32 4294901760, %v8076_v46 }
0x10fa   : > { %7994 = vmatpush1.msra.mxu1 %v7993_v44 }
0x10fb   : > { %8063 = vmatmul.mubr.f32.vlgmr.msra.gmra.mrb[14].mxu1 %v9554_v24  ;;  %v8071_v47 = vand.u32 4294901760, %v8070_v60  ;;  %v8078_v48 = vsub.f32 %v8076_v46, %v8077_v61  ;;  %v8458_v24 = vpop.permute.xlu1 %8457 }
0x10fc   : > { %8143 = vmatprep.mubr.f32.mxu1 %v9294_v7 }
0x10fd   : > { %v8072_v49 = vsub.f32 %v8070_v60, %v8071_v47  ;;  %v8079_v51 = vand.u32 4294901760, %v8078_v48 }
0x10ff   : > { %v8073_v50 = vand.u32 4294901760, %v8072_v49 }
0x1101   : > { %8074 = vmatprep.subr.mxu1 %v8073_v50 }
0x1102   : > { %8080 = vmatpush1.msra.mxu1 %v8079_v51 }
0x1103   : > { %8145 = vmatmul.mubr.f32.vlgmr.msra.gmra.mrb[14].mxu1 %v9537_v10  ;;  %8153 = vmatprep.subr.mxu1 %v8070_v60 }
0x1104   : > { %8156 = vmatpush1.msra.mxu1 %v8076_v46  ;;  %8219 = vmatprep.mubr.f32.mxu1 %v9294_v7 }
0x1105   : > { %8229 = vmatprep.subr.mxu1 %v7991_v45 }
0x110b   : > { %8222 = vmatmul.mubr.f32.vlgmr.msra.gmra.mrb[14].mxu1 %v9543_v14  ;;  %v8466_v14 = vpop.permute.xlu0 %8465 }
0x110c   : > { %8231 = vmatpush1.msra.mxu1 %v7993_v44  ;;  %8294 = vmatprep.mubr.f32.mxu1 %v9294_v7 }
0x110d   : > { %8307 = vmatprep.subr.mxu1 %v8071_v47 }
0x1113   : > { %8298 = vmatmul.mubr.f32.vlgmr.msra.gmra.mrb[14].mxu1 %v9549_v18 }
0x1114   : > { %8311 = vmatpush1.msra.mxu1 %v8077_v61  ;;  %8374 = vmatprep.mubr.f32.mxu1 %v9294_v7 }
0x1115   : > { %8383 = vmatprep.subr.mxu1 %v7991_v45 }
0x111b   : > { %8376 = vmatmul.mubr.f32.vlgmr.msra.gmra.mrb[14].mxu1 %v9537_v10 }
0x111c   : > { %8385 = vmatpush1.msra.mxu1 %v7993_v44  ;;  %8448 = vmatprep.mubr.f32.mxu1 %v9294_v7 }
0x1123   : > { %8450 = vmatmul.mubr.f32.vlgmr.msra.gmra.mrb[14].mxu1 %v9537_v10 }
0x11f6   : > { %v8451_v52 = vpop.f32.mrb[14].mxu1 }
0x11f7   : > { %v8460_v53 = vadd.f32 %v8458_v24, %v8451_v52  ;;  %v8468_v54 = vadd.f32 %v8466_v14, %v8451_v52  ;;  %v8453_v55 = vpop.f32.mrb[15].mxu1 }
0x11f8   : > { %v8461_v56 = vadd.f32 %v8458_v24, %v8453_v55  ;;  %v8469_v18 = vadd.f32 %v8466_v14, %v8453_v55 }
0x11f9   : > { %9130 = vtanh.f32 %v8460_v53 }
0x11fa   : > { %9132 = vtanh.f32 %v8468_v54 }
0x11fb   : > { %9134 = vtanh.f32 %v8461_v56 }
0x11fc   : > { %9136 = vtanh.f32 %v8469_v18 }
0x1203   : > { %v9131_v7 = vpop.eup %9130 }
0x1204   : > { %v9133_v10 = vpop.eup %9132  ;;  %v8472_v57 = vmul.f32 2.5, %v9131_v7 }
0x1205   : > { %v9135_v58 = vpop.eup %9134  ;;  %v8474_v59 = vmul.f32 1.5, %v9133_v10 }
0x1206   : > { %v9137_v62 = vpop.eup %9136  ;;  %v8473_v63 = vmul.f32 2.5, %v9135_v58 }
0x1207   : > { %v8476_v4 = vsub.f32 %v8472_v57, %v8474_v59  ;;  %v8475_v5 = vmul.f32 1.5, %v9137_v62 }
0x1209   : > { %v8477_v8 = vsub.f32 %v8473_v63, %v8475_v5  ;;  %v8487_v12 = vmul.f32 %v8486_v1, %v8476_v4  ;;  %8502 = sbr.rel (%p8683_p4) target bundleno = 4626 (0x1212), region = 64 }
0x120b   : > { %v8488_v17 = vmul.f32 %v8486_v1, %v8477_v8  ;;  %v8489_v19 = vsub.f32 %v8484_v11, %v8487_v12 }
0x120d   : > { %v8490_v21 = vsub.f32 %v8485_v16, %v8488_v17  ;;  %v8497_v22 = vadd.f32 %v8495_v13, %v8489_v19 }
0x120f   : > { %v8498_v23 = vadd.f32 %v8496_v20, %v8490_v21  ;;  %8503 = vst [vmem:[#allocation9] sm:$0xff] (!%p8683_p4), %v8497_v22 }
0x1211   : > { %8504 = vst [vmem:[#allocation9 + $0x8] sm:$0xff] %v8498_v23 }
0x1212 PF: > { %p8684_p12 = scmp.ne.s32.totalorder %s9366_s25, 1 }
0x1213   : > { %v8685_v25 = vclamps-f32 (!%p8684_p12), %v8497_v22, 1.0  ;;  %v8686_v9 = vclamps-f32 (!%p8684_p12), %v8498_v23, 1.0 }
0x1214   : > { %8508 = sbr.rel (%p8684_p12) target bundleno = 4635 (0x121b), region = 68 }
0x1215   : > { %8513 = vst [vmem:[#allocation9] sm:$0xff] (!%p8684_p12), %v8685_v25  ;;  %8514 = vst [vmem:[#allocation9 + $0x8] sm:$0xff] (!%p8684_p12), %v8686_v9 }
0x121b PF: > { %s9311_s27 = smov [#allocation9]  }
0x121c   : > { %s8522_s13 = sshll.u32 %s9311_s27, 4  ;;  %s8523_s13 = int_to_ptr.vmem [resolvable:$true] %s8522_s13 }
0x121d   : > { %s9215_s20 = scalar_lea.vmem %s8523_s13, 256  ;;  %p9222_p9 = scmp.lt.s32.totalorder %s8523_s13, %s8523_s13 }
0x121e   : > { %p9216_p8 = scmp.ne.s32.totalorder %s8523_s13, %s9215_s20  ;;  %p9223_p3 = scmp.lt.s32.totalorder %s9215_s20, %s9215_s20 }
0x1220   : > { %p9217_p2 = pnand %p9216_p8, %p8683_p4  ;;  %p9224_p13 = por %p9223_p3, %p9222_p9 }
0x1222   : > { %p9218_p5 = pneg %p9217_p2 }
0x1224   : > { %p9225_p1 = pnand %p9224_p13, %p9218_p5 }
0x1226   : > { %9228 = shalt.err (!%p9225_p1)
}
0x1227   : > { %s9229_s12 = scalar_lea.hbm %s10038_s6, 256 }
0x1228   : > { %p9230_p6 = scmp.ne.s32.totalorder %s10038_s6, %s9229_s12  ;;  %p9235_p0 = scmp.lt.u32.totalorder %s9229_s12, %s10038_s6 }
0x122a   : > { %p9231_p7 = pnand %p9230_p6, %p8683_p4 }
0x122c   : > { %p9232_p10 = pneg %p9231_p7 }
0x122e   : > { %p9237_p11 = pnand %p9235_p0, %p9232_p10 }
0x1230   : > { %9240 = shalt.err (!%p9237_p11)
}
0x1231   : > { %8909 = dma.vmem_to_hbm [thread:$0]  (%p8683_p4), %s8523_s13, 256, %s10038_s6, [#allocation4]  }
0x1232   : > { %9270 = dma.done.wait (%p8683_p4), [#allocation4], 256  }
0x1233   : > { %9272 = vsyncadd (%p8683_p4), [#allocation4], 4294967040 }
0x1234 PF: > { %p19_p12 = scmp.ge.s32.totalorder %s9369_s26, 4   ;;  %s10052_s21 = smov %s9279_s22 }
0x1235   : > { %s10053_s22 = smov %s9283_s23  ;;  %s10054_s23 = smov %s9379_s29 }
0x1236   : > { %s10055_s24 = smov %s9369_s26  ;;  %21 = sbr.rel (!%p19_p12) target bundleno = 6 (0x6), region = 124 }
0x123d   :  { %8535 = vsyncpa [#allocation3], 1 }
0x123e   :  { %8537 = vsyncpa [#allocation3 + $0x1], 1 }
0x123f   :  { %8538 = vsyncpa [#allocation8], 1 }
0x1240   :  { %8540 = vsyncpa [#allocation8 + $0x1], 1 }
0x1241   :  { %8541 = vsyncpa [#allocation4], 1 }
0x1242   :  { %8543 = vsyncpa [#allocation4 + $0x1], 1 }
0x1243   :  { %8544 = vsyncpa [#allocation5], 1 }
0x1244   :  { %8546 = vsyncpa [#allocation5 + $0x1], 1 }

</bundles_post_ra>
